<compile_context>
chip_gen: v7x
topology: tpu7x:2x2x1
jax: 0.10.0
libtpu: 0.0.40
codegen_flags: <defaults>
</compile_context>

<pallas_src>
import math
import functools

import jax
import jax.numpy as jnp
from jax.experimental import pallas as pl
from jax.experimental.pallas import tpu as pltpu


MXU_DTYPE = jnp.bfloat16      # matmul operand dtype (accumulation is always f32)


# ----------------------------------------------------------------------------- helpers
def factorize(x):
    """Same as AttentionBlock.factorize(x, n=2): returns (smaller, bigger)."""
    bigger = next(f for f in range(1, x + 1) if x % f == 0 and f > math.sqrt(x))
    return x // bigger, bigger


def make_btt_matrix(wk, wq, num_heads, c, d, a, b):
    """Fold the two normalized BTT projections into one (C, num_heads*C) matrix.

    K[n, he, a_i*b + b_i] = sum_{c_i,d_i} WQn[he*b+b_i, a_i, c_i]
                                        * WKn[c_i, d_i, he*b+b_i] * X[n, c_i*d + d_i]
    """
    # W_K normalization (BilinearBTT_W_K_Projection.forward)
    rms_k = jnp.sqrt(jnp.mean(wk ** 2) + 1e-8)
    d_in_k, d_out_k = d, num_heads * b               # s = 1
    init_k = (min(d_in_k, d_out_k) / (d_in_k * d_in_k)) ** 0.5
    wk_n = wk / jnp.maximum(1.0, rms_k / init_k)

    # W_Q normalization (BilinearBTT_W_Q_Projection.forward)
    rms_q = jnp.sqrt(jnp.mean(wq ** 2) + 1e-8)
    d_in_q, d_out_q = c, a
    init_q = (min(d_in_q, d_out_q) / (d_in_q * d_in_q)) ** 0.5
    wq_n = wq / jnp.maximum(1.0, rms_q / init_q)

    wq_r = wq_n.reshape(num_heads, b, a, c)          # (he, b, a, c)
    wk_r = wk_n.reshape(c, d, num_heads, b)          # (c, d, he, b)
    m5 = jnp.einsum('hbac,cdhb->cdhab', wq_r, wk_r)
    return m5.reshape(c * d, num_heads * a * b)      # (C, he*C)


def prepare_params(params, num_heads, C):
    """One-time weight preprocessing (done once, outside the forward).

    * Folds the BTT K projection and the V linear into one (C, he*C + C) matrix.
    * Pre-transposes the 1x1-conv weight for a channel-last matmul.
    * Packs all per-channel vectors into one lane-packed (8, C) table.
    """
    c_, d_ = factorize(C)
    a_, b_ = c_, d_
    m = make_btt_matrix(params['wk'], params['wq'], num_heads, c_, d_, a_, b_)
    w_comb = jnp.concatenate([m, params['wv'].T], axis=1)      # (C, he*C + C)
    vecs = jnp.stack([params['in1_w'], params['in1_b'],
                      params['lnx_w'], params['lnk_w'],
                      params['in2_w'], params['in2_b'],
                      params['conv_b'], params['gamma']], axis=0)   # (8, C)
    return dict(
        w_comb=w_comb.astype(MXU_DTYPE),
        conv_wT=params['conv_w'].T.astype(MXU_DTYPE),
        vecs=vecs.astype(jnp.float32),
    )


# ----------------------------------------------------------------------------- fused kernel
def _fused_block_kernel(x_ref, wcomb_ref, wct_ref, vec_ref, o_ref, *, num_heads):
    he = num_heads
    x = x_ref[...]                                   # (Bb, HW, T, C) f32, original input
    Bb, HW, T, C = x.shape
    G = Bb * HW
    hd = C // he
    S = he * T

    # lane-packed per-channel parameter rows, hoisted once
    vecs = vec_ref[...]                              # (8, C) f32
    in1_w, in1_b = vecs[0:1], vecs[1:2]
    lnx_w, lnk_w = vecs[2:3], vecs[3:4]
    in2_w, in2_b = vecs[4:5], vecs[5:6]
    conv_b, gamma = vecs[6:7], vecs[7:8]

    def layer_norm(z, w):                            # F.layer_norm over last axis, no bias
        mu = jnp.mean(z, axis=-1, keepdims=True)
        var = jnp.mean(jnp.square(z - mu), axis=-1, keepdims=True)
        return (z - mu) * jax.lax.rsqrt(var + 1e-5) * w

    def inst_norm(z, w, b):                          # InstanceNorm2d: stats over spatial axis
        mu = jnp.mean(z, axis=1, keepdims=True)
        var = jnp.mean(jnp.square(z - mu), axis=1, keepdims=True)
        return (z - mu) * jax.lax.rsqrt(var + 1e-5) * w + b

    def bucket_id(idx, bucket):                      # idx // bucket (he buckets), no int div
        acc = jnp.zeros_like(idx)
        for t in range(1, he):
            acc = acc + (idx >= t * bucket).astype(jnp.int32)
        return acc

    # ---- norm1 (InstanceNorm2d) in channel-last layout ------------------------------
    xn = inst_norm(x, in1_w, in1_b)                  # (Bb, HW, T, C)
    xn_g = xn.reshape(G, T, C)

    # ---- Q path: bilinear_btt_ln_X -----------------------------------------------
    q = layer_norm(xn_g, lnx_w)                      # (G, T, C) f32

    # ---- fused K/V projection: one flattened (G*T, C) x (C, he*C + C) matmul -------
    x2d = xn_g.reshape(G * T, C).astype(MXU_DTYPE)
    kv = jnp.dot(x2d, wcomb_ref[...], preferred_element_type=jnp.float32)  # (G*T, he*C+C)
    k_raw = kv[:, :he * C].reshape(G, T, he * C)
    v = kv[:, he * C:].reshape(G, T, C)              # channel layout (he, hd), head-major

    # ---- K: head-major sequence layout (G, he*T, C), then bilinear_btt_ln_PLPRXT ----
    k_all = jnp.concatenate(
        [k_raw[:, :, h * C:(h + 1) * C] for h in range(he)], axis=1)        # (G, S, C)
    kn = layer_norm(k_all, lnk_w)                    # (G, S, C)

    # ---- attention scores: one batched matmul over all heads ------------------------
    scale = 1.0 / math.sqrt(C)
    s = jnp.einsum('gqc,gkc->gqk', q.astype(MXU_DTYPE), kn.astype(MXU_DTYPE),
                   preferred_element_type=jnp.float32) * scale              # (G, T, S)
    # TODO(synk): bias_type='rel' uses RelativePositionBias whose source is not provided;
    # zero attention bias is used instead.

    # ---- per-head softmax, fully lane-dense ------------------------------------------
    # Subtract the per-(g,q) row max across all heads (a valid stabilizer for each
    # head's softmax) and build the per-head denominator with a block-diagonal ones
    # matrix, so no per-head slicing/reshaping is needed.
    m = jnp.max(s, axis=-1, keepdims=True)
    e = jnp.exp(s - m)                               # (G, T, S) f32
    r_ss = bucket_id(jax.lax.broadcasted_iota(jnp.int32, (S, S), 0), T)
    c_ss = bucket_id(jax.lax.broadcasted_iota(jnp.int32, (S, S), 1), T)
    seg = (r_ss == c_ss).astype(jnp.float32)         # (S, S) block-diagonal ones
    denom = jnp.einsum('gqi,ij->gqj', e, seg, preferred_element_type=jnp.float32)
    p = e * pl.reciprocal(denom, approx=True)        # per-head softmax probabilities

    # ---- P @ V as one lane-dense matmul using a block-diagonal V ---------------------
    row_head = bucket_id(jax.lax.broadcasted_iota(jnp.int32, (S, C), 0), T)
    col_head = bucket_id(jax.lax.broadcasted_iota(jnp.int32, (S, C), 1), hd)
    v_rep = jnp.concatenate([v] * he, axis=1)        # (G, S, C): row h*T+k holds v[g,k,:]
    v_bd = jnp.where(row_head == col_head, v_rep, 0.0).astype(MXU_DTYPE)
    y = jnp.einsum('gqs,gsc->gqc', p.astype(MXU_DTYPE), v_bd,
                   preferred_element_type=jnp.float32)                       # (G, T, C)

    # ---- norm2 + 1x1 conv head + layer-scale + residual ------------------------------
    y4 = y.reshape(Bb, HW, T, C)
    yn = inst_norm(y4, in2_w, in2_b)                 # (Bb, HW, T, C)
    yn2 = yn.reshape(G * T, C).astype(MXU_DTYPE)
    conv = jnp.dot(yn2, wct_ref[...], preferred_element_type=jnp.float32) + conv_b
    out = gamma * conv                               # drop_path = Identity (drop_path=0)
    o_ref[...] = out.reshape(Bb, HW, T, C) + x       # residual with the original input


# ----------------------------------------------------------------------------- wrapper
def _pick_block_batch(B, HW, T, C, num_heads, budget_bytes=8 * 1024 * 1024):
    """Pick how many images go into one grid step: biggest block that fits the VMEM
    budget (sized conservatively for v7x's 64 MiB), while keeping >= 2 grid steps
    when possible so both v7x TensorCores get work."""
    he = num_heads
    per_b = 4 * HW * T * ((6 + 5 * he) * C + 3 * he * T)     # rough f32 working set / image
    bb = max(1, min(B, budget_bytes // max(per_b, 1)))
    if B >= 2:
        bb = min(bb, max(1, B // 2))
    while B % bb:
        bb -= 1
    return bb


def fused_attention_block(x_cl, prep, num_heads, block_batch=None):
    """x_cl: (B, HW, T, C) float32 in '(b h w) t c' layout."""
    B, HW, T, C = x_cl.shape
    he = num_heads
    bb = block_batch or _pick_block_batch(B, HW, T, C, he)
    kern = functools.partial(_fused_block_kernel, num_heads=he)
    return pl.pallas_call(
        kern,
        out_shape=jax.ShapeDtypeStruct((B, HW, T, C), jnp.float32),
        grid=(B // bb,),
        in_specs=[
            pl.BlockSpec((bb, HW, T, C), lambda i: (i, 0, 0, 0)),   # activations
            pl.BlockSpec((C, he * C + C), lambda i: (0, 0)),        # folded K|V weights (bf16)
            pl.BlockSpec((C, C), lambda i: (0, 0)),                 # 1x1-conv weight^T (bf16)
            pl.BlockSpec((8, C), lambda i: (0, 0)),                 # packed per-channel vectors
        ],
        out_specs=pl.BlockSpec((bb, HW, T, C), lambda i: (i, 0, 0, 0)),
        input_output_aliases={0: 0},                 # reuse the activation buffer for the output
        compiler_params=pltpu.CompilerParams(
            dimension_semantics=("parallel",),
            vmem_limit_bytes=48 * 1024 * 1024),
    )(x_cl, prep['w_comb'], prep['conv_wT'], prep['vecs'])


def attention_block_forward(x, prep, num_heads, block_batch=None):
    T, B, C, H, W = x.shape
    HW = H * W
    # t b c h w -> (b h w) t c   (single layout transpose into the kernel layout)
    x_cl = jnp.transpose(x, (1, 3, 4, 0, 2)).reshape(B, HW, T, C)
    out_cl = fused_attention_block(x_cl, prep, num_heads, block_batch)
    # (b h w) t c -> t b c h w
    return jnp.transpose(out_cl.reshape(B, H, W, T, C), (3, 0, 4, 1, 2))


# ----------------------------------------------------------------------------- main
if __name__ == "__main__":
    T, B, C, H, W = 8, 2, 32, 4, 4
    num_heads = 4
    c_, d_ = factorize(C)
    a_, b_ = c_, d_

    key = jax.random.PRNGKey(0)
    kx, kk, kq, kv, kc, kb = jax.random.split(key, 6)

    x = jax.random.normal(kx, (T, B, C, H, W), jnp.float32)

    params = dict(
        # InstanceNorm2d(affine=True) default init
        in1_w=jnp.ones((C,), jnp.float32), in1_b=jnp.zeros((C,), jnp.float32),
        in2_w=jnp.ones((C,), jnp.float32), in2_b=jnp.zeros((C,), jnp.float32),
        # BilinearBTT weights (torch.randn in __init__)
        wk=jax.random.normal(kk, (c_, d_, num_heads * b_), jnp.float32),
        wq=jax.random.normal(kq, (num_heads * b_, a_, c_), jnp.float32),
        # LayerNorm(bias=False) default init
        lnx_w=jnp.ones((C,), jnp.float32),
        lnk_w=jnp.ones((C,), jnp.float32),
        # c_attn_v (Linear, no bias) and output_head (Conv2d 1x1)
        wv=0.02 * jax.random.normal(kv, (C, C), jnp.float32),
        conv_w=0.02 * jax.random.normal(kc, (C, C), jnp.float32),
        conv_b=0.01 * jax.random.normal(kb, (C,), jnp.float32),
        # layer-scale gamma
        gamma=1e-6 * jnp.ones((C,), jnp.float32),
    )

    # one-time weight preprocessing (folded BTT matrix, packed vectors) -- outside the forward
    prep = prepare_params(params, num_heads, C)

    out = attention_block_forward(x, prep, num_heads)
    out = jax.block_until_ready(out)
    assert out.shape == (T, B, C, H, W) and out.dtype == jnp.float32
    print("KERNEL_OK")
</pallas_src>

<mosaic_0001>
module attributes {stable_mosaic.version = 11 : i64} {
  func.func @_fused_block_kernel(%arg0: i32, %arg1: memref<1x16x8x32xf32, #tpu.memory_space<vmem>>, %arg2: memref<32x160xbf16, #tpu.memory_space<vmem>>, %arg3: memref<32x32xbf16, #tpu.memory_space<vmem>>, %arg4: memref<8x32xf32, #tpu.memory_space<vmem>>, %arg5: memref<1x16x8x32xf32, #tpu.memory_space<vmem>>) attributes {dimension_semantics = [#tpu.dimension_semantics<parallel>], iteration_bounds = array<i64: 2>, scalar_prefetch = 0 : i64, scratch_operands = 0 : i64, tpu.core_type = #tpu.core_type<tc>, window_params = [{transform_indices = @transform_0, window_bounds = array<i64: 1, 16, 8, 32>}, {pipeline_mode = #tpu.pipeline_mode<synchronous>, transform_indices = @transform_1, window_bounds = array<i64: 32, 160>}, {pipeline_mode = #tpu.pipeline_mode<synchronous>, transform_indices = @transform_2, window_bounds = array<i64: 32, 32>}, {pipeline_mode = #tpu.pipeline_mode<synchronous>, transform_indices = @transform_3, window_bounds = array<i64: 8, 32>}, {transform_indices = @transform_4, window_bounds = array<i64: 1, 16, 8, 32>}]} {
    %c0 = arith.constant 0 : index
    %c0_0 = arith.constant 0 : index
    %c0_1 = arith.constant 0 : index
    %c0_2 = arith.constant 0 : index
    %0 = vector.load %arg1[%c0, %c0_0, %c0_1, %c0_2] : memref<1x16x8x32xf32, #tpu.memory_space<vmem>>, vector<1x16x8x32xf32>
    %c0_3 = arith.constant 0 : index
    %c0_4 = arith.constant 0 : index
    %1 = vector.load %arg4[%c0_3, %c0_4] : memref<8x32xf32, #tpu.memory_space<vmem>>, vector<8x32xf32>
    %2 = vector.extract_strided_slice %1 {offsets = [0, 0], sizes = [1, 32], strides = [1, 1]} : vector<8x32xf32> to vector<1x32xf32>
    %3 = vector.extract_strided_slice %1 {offsets = [1, 0], sizes = [1, 32], strides = [1, 1]} : vector<8x32xf32> to vector<1x32xf32>
    %4 = vector.extract_strided_slice %1 {offsets = [2, 0], sizes = [1, 32], strides = [1, 1]} : vector<8x32xf32> to vector<1x32xf32>
    %5 = vector.extract_strided_slice %1 {offsets = [3, 0], sizes = [1, 32], strides = [1, 1]} : vector<8x32xf32> to vector<1x32xf32>
    %6 = vector.extract_strided_slice %1 {offsets = [4, 0], sizes = [1, 32], strides = [1, 1]} : vector<8x32xf32> to vector<1x32xf32>
    %7 = vector.extract_strided_slice %1 {offsets = [5, 0], sizes = [1, 32], strides = [1, 1]} : vector<8x32xf32> to vector<1x32xf32>
    %8 = vector.extract_strided_slice %1 {offsets = [6, 0], sizes = [1, 32], strides = [1, 1]} : vector<8x32xf32> to vector<1x32xf32>
    %9 = vector.extract_strided_slice %1 {offsets = [7, 0], sizes = [1, 32], strides = [1, 1]} : vector<8x32xf32> to vector<1x32xf32>
    %cst = arith.constant dense<0.000000e+00> : vector<1x8x32xf32>
    %10 = vector.multi_reduction <add>, %0, %cst [1] : vector<1x16x8x32xf32> to vector<1x8x32xf32>
    %11 = vector.shape_cast %10 : vector<1x8x32xf32> to vector<1x1x8x32xf32>
    %cst_5 = arith.constant 1.600000e+01 : f32
    %12 = vector.broadcast %cst_5 : f32 to vector<1x1x8x32xf32>
    %13 = arith.divf %11, %12 : vector<1x1x8x32xf32>
    %14 = vector.broadcast %13 : vector<1x1x8x32xf32> to vector<1x16x8x32xf32>
    %15 = arith.subf %0, %14 : vector<1x16x8x32xf32>
    %16 = arith.mulf %15, %15 : vector<1x16x8x32xf32>
    %cst_6 = arith.constant dense<0.000000e+00> : vector<1x8x32xf32>
    %17 = vector.multi_reduction <add>, %16, %cst_6 [1] : vector<1x16x8x32xf32> to vector<1x8x32xf32>
    %18 = vector.shape_cast %17 : vector<1x8x32xf32> to vector<1x1x8x32xf32>
    %cst_7 = arith.constant 1.600000e+01 : f32
    %19 = vector.broadcast %cst_7 : f32 to vector<1x1x8x32xf32>
    %20 = arith.divf %18, %19 : vector<1x1x8x32xf32>
    %21 = vector.broadcast %13 : vector<1x1x8x32xf32> to vector<1x16x8x32xf32>
    %22 = arith.subf %0, %21 : vector<1x16x8x32xf32>
    %cst_8 = arith.constant 9.99999974E-6 : f32
    %23 = vector.broadcast %cst_8 : f32 to vector<1x1x8x32xf32>
    %24 = arith.addf %20, %23 : vector<1x1x8x32xf32>
    %25 = math.rsqrt %24 : vector<1x1x8x32xf32>
    %26 = vector.broadcast %25 : vector<1x1x8x32xf32> to vector<1x16x8x32xf32>
    %27 = arith.mulf %22, %26 : vector<1x16x8x32xf32>
    %28 = vector.shape_cast %2 : vector<1x32xf32> to vector<1x1x1x32xf32>
    %29 = vector.broadcast %28 : vector<1x1x1x32xf32> to vector<1x16x8x32xf32>
    %30 = arith.mulf %27, %29 : vector<1x16x8x32xf32>
    %31 = vector.shape_cast %3 : vector<1x32xf32> to vector<1x1x1x32xf32>
    %32 = vector.broadcast %31 : vector<1x1x1x32xf32> to vector<1x16x8x32xf32>
    %33 = arith.addf %30, %32 : vector<1x16x8x32xf32>
    %34 = vector.shape_cast %33 : vector<1x16x8x32xf32> to vector<16x8x32xf32>
    %cst_9 = arith.constant dense<0.000000e+00> : vector<16x8xf32>
    %35 = vector.multi_reduction <add>, %34, %cst_9 [2] : vector<16x8x32xf32> to vector<16x8xf32>
    %36 = vector.shape_cast %35 : vector<16x8xf32> to vector<16x8x1xf32>
    %cst_10 = arith.constant 3.200000e+01 : f32
    %37 = vector.broadcast %cst_10 : f32 to vector<16x8x1xf32>
    %38 = arith.divf %36, %37 : vector<16x8x1xf32>
    %39 = vector.broadcast %38 : vector<16x8x1xf32> to vector<16x8x32xf32>
    %40 = arith.subf %34, %39 : vector<16x8x32xf32>
    %41 = arith.mulf %40, %40 : vector<16x8x32xf32>
    %cst_11 = arith.constant dense<0.000000e+00> : vector<16x8xf32>
    %42 = vector.multi_reduction <add>, %41, %cst_11 [2] : vector<16x8x32xf32> to vector<16x8xf32>
    %43 = vector.shape_cast %42 : vector<16x8xf32> to vector<16x8x1xf32>
    %cst_12 = arith.constant 3.200000e+01 : f32
    %44 = vector.broadcast %cst_12 : f32 to vector<16x8x1xf32>
    %45 = arith.divf %43, %44 : vector<16x8x1xf32>
    %46 = vector.broadcast %38 : vector<16x8x1xf32> to vector<16x8x32xf32>
    %47 = arith.subf %34, %46 : vector<16x8x32xf32>
    %cst_13 = arith.constant 9.99999974E-6 : f32
    %48 = vector.broadcast %cst_13 : f32 to vector<16x8x1xf32>
    %49 = arith.addf %45, %48 : vector<16x8x1xf32>
    %50 = math.rsqrt %49 : vector<16x8x1xf32>
    %51 = vector.broadcast %50 : vector<16x8x1xf32> to vector<16x8x32xf32>
    %52 = arith.mulf %47, %51 : vector<16x8x32xf32>
    %53 = vector.shape_cast %4 : vector<1x32xf32> to vector<1x1x32xf32>
    %54 = vector.broadcast %53 : vector<1x1x32xf32> to vector<16x8x32xf32>
    %55 = arith.mulf %52, %54 : vector<16x8x32xf32>
    %56 = vector.shape_cast %34 : vector<16x8x32xf32> to vector<128x32xf32>
    %57 = arith.truncf %56 : vector<128x32xf32> to vector<128x32xbf16>
    %c0_14 = arith.constant 0 : index
    %c0_15 = arith.constant 0 : index
    %58 = vector.load %arg2[%c0_14, %c0_15] : memref<32x160xbf16, #tpu.memory_space<vmem>>, vector<32x160xbf16>
    %cst_16 = arith.constant dense<0.000000e+00> : vector<128x160xf32>
    %59 = tpu.matmul %57, %58, %cst_16 {dimension_numbers = #tpu.dot_dimension_numbers<[1], [0], [0], [1], [0, 0, 1, 1], [], []>} : vector<128x32xbf16>, vector<32x160xbf16>, vector<128x160xf32> -> vector<128x160xf32>
    %60 = vector.extract_strided_slice %59 {offsets = [0, 0], sizes = [128, 128], strides = [1, 1]} : vector<128x160xf32> to vector<128x128xf32>
    %61 = vector.shape_cast %60 : vector<128x128xf32> to vector<16x8x128xf32>
    %62 = vector.extract_strided_slice %59 {offsets = [0, 128], sizes = [128, 32], strides = [1, 1]} : vector<128x160xf32> to vector<128x32xf32>
    %63 = vector.shape_cast %62 : vector<128x32xf32> to vector<16x8x32xf32>
    %64 = vector.extract_strided_slice %61 {offsets = [0, 0, 0], sizes = [16, 8, 32], strides = [1, 1, 1]} : vector<16x8x128xf32> to vector<16x8x32xf32>
    %65 = vector.extract_strided_slice %61 {offsets = [0, 0, 32], sizes = [16, 8, 32], strides = [1, 1, 1]} : vector<16x8x128xf32> to vector<16x8x32xf32>
    %66 = vector.extract_strided_slice %61 {offsets = [0, 0, 64], sizes = [16, 8, 32], strides = [1, 1, 1]} : vector<16x8x128xf32> to vector<16x8x32xf32>
    %67 = vector.extract_strided_slice %61 {offsets = [0, 0, 96], sizes = [16, 8, 32], strides = [1, 1, 1]} : vector<16x8x128xf32> to vector<16x8x32xf32>
    %68 = tpu.concatenate %64, %65, %66, %67 in 1 : vector<16x8x32xf32>, vector<16x8x32xf32>, vector<16x8x32xf32>, vector<16x8x32xf32> -> vector<16x32x32xf32>
    %cst_17 = arith.constant dense<0.000000e+00> : vector<16x32xf32>
    %69 = vector.multi_reduction <add>, %68, %cst_17 [2] : vector<16x32x32xf32> to vector<16x32xf32>
    %70 = vector.shape_cast %69 : vector<16x32xf32> to vector<16x32x1xf32>
    %cst_18 = arith.constant 3.200000e+01 : f32
    %71 = vector.broadcast %cst_18 : f32 to vector<16x32x1xf32>
    %72 = arith.divf %70, %71 : vector<16x32x1xf32>
    %73 = vector.broadcast %72 : vector<16x32x1xf32> to vector<16x32x32xf32>
    %74 = arith.subf %68, %73 : vector<16x32x32xf32>
    %75 = arith.mulf %74, %74 : vector<16x32x32xf32>
    %cst_19 = arith.constant dense<0.000000e+00> : vector<16x32xf32>
    %76 = vector.multi_reduction <add>, %75, %cst_19 [2] : vector<16x32x32xf32> to vector<16x32xf32>
    %77 = vector.shape_cast %76 : vector<16x32xf32> to vector<16x32x1xf32>
    %cst_20 = arith.constant 3.200000e+01 : f32
    %78 = vector.broadcast %cst_20 : f32 to vector<16x32x1xf32>
    %79 = arith.divf %77, %78 : vector<16x32x1xf32>
    %80 = vector.broadcast %72 : vector<16x32x1xf32> to vector<16x32x32xf32>
    %81 = arith.subf %68, %80 : vector<16x32x32xf32>
    %cst_21 = arith.constant 9.99999974E-6 : f32
    %82 = vector.broadcast %cst_21 : f32 to vector<16x32x1xf32>
    %83 = arith.addf %79, %82 : vector<16x32x1xf32>
    %84 = math.rsqrt %83 : vector<16x32x1xf32>
    %85 = vector.broadcast %84 : vector<16x32x1xf32> to vector<16x32x32xf32>
    %86 = arith.mulf %81, %85 : vector<16x32x32xf32>
    %87 = vector.shape_cast %5 : vector<1x32xf32> to vector<1x1x32xf32>
    %88 = vector.broadcast %87 : vector<1x1x32xf32> to vector<16x32x32xf32>
    %89 = arith.mulf %86, %88 : vector<16x32x32xf32>
    %90 = arith.truncf %55 : vector<16x8x32xf32> to vector<16x8x32xbf16>
    %91 = arith.truncf %89 : vector<16x32x32xf32> to vector<16x32x32xbf16>
    "tpu.trace_start"() <{level = 10 : i32, message = "gqc,gkc->gqk"}> : () -> ()
    %cst_22 = arith.constant dense<0.000000e+00> : vector<16x8x32xf32>
    %92 = tpu.matmul %90, %91, %cst_22 {dimension_numbers = #tpu.dot_dimension_numbers<[2], [2], [1], [1], [0, 0, 0, 1, 1, 1], [0], [0]>} : vector<16x8x32xbf16>, vector<16x32x32xbf16>, vector<16x8x32xf32> -> vector<16x8x32xf32>
    "tpu.trace_stop"() : () -> ()
    %cst_23 = arith.constant 0.176776692 : f32
    %93 = vector.broadcast %cst_23 : f32 to vector<16x8x32xf32>
    %94 = arith.mulf %92, %93 : vector<16x8x32xf32>
    %cst_24 = arith.constant dense<0xFF800000> : vector<16x8xf32>
    %95 = vector.multi_reduction <maximumf>, %94, %cst_24 [2] : vector<16x8x32xf32> to vector<16x8xf32>
    %96 = vector.shape_cast %95 : vector<16x8xf32> to vector<16x8x1xf32>
    %97 = vector.broadcast %96 : vector<16x8x1xf32> to vector<16x8x32xf32>
    %98 = arith.subf %94, %97 : vector<16x8x32xf32>
    %99 = math.exp %98 : vector<16x8x32xf32>
    %100 = tpu.iota {dimensions = array<i32: 0>} : vector<32x32xi32>
    %c0_i32 = arith.constant 0 : i32
    %101 = vector.broadcast %c0_i32 : i32 to vector<32x32xi32>
    %c8_i32 = arith.constant 8 : i32
    %102 = vector.broadcast %c8_i32 : i32 to vector<32x32xi32>
    %103 = arith.cmpi sge, %100, %102 : vector<32x32xi32>
    %104 = arith.extui %103 : vector<32x32xi1> to vector<32x32xi32>
    %105 = arith.addi %101, %104 : vector<32x32xi32>
    %c16_i32 = arith.constant 16 : i32
    %106 = vector.broadcast %c16_i32 : i32 to vector<32x32xi32>
    %107 = arith.cmpi sge, %100, %106 : vector<32x32xi32>
    %108 = arith.extui %107 : vector<32x32xi1> to vector<32x32xi32>
    %109 = arith.addi %105, %108 : vector<32x32xi32>
    %c24_i32 = arith.constant 24 : i32
    %110 = vector.broadcast %c24_i32 : i32 to vector<32x32xi32>
    %111 = arith.cmpi sge, %100, %110 : vector<32x32xi32>
    %112 = arith.extui %111 : vector<32x32xi1> to vector<32x32xi32>
    %113 = arith.addi %109, %112 : vector<32x32xi32>
    %114 = tpu.iota {dimensions = array<i32: 1>} : vector<32x32xi32>
    %c0_i32_25 = arith.constant 0 : i32
    %115 = vector.broadcast %c0_i32_25 : i32 to vector<32x32xi32>
    %c8_i32_26 = arith.constant 8 : i32
    %116 = vector.broadcast %c8_i32_26 : i32 to vector<32x32xi32>
    %117 = arith.cmpi sge, %114, %116 : vector<32x32xi32>
    %118 = arith.extui %117 : vector<32x32xi1> to vector<32x32xi32>
    %119 = arith.addi %115, %118 : vector<32x32xi32>
    %c16_i32_27 = arith.constant 16 : i32
    %120 = vector.broadcast %c16_i32_27 : i32 to vector<32x32xi32>
    %121 = arith.cmpi sge, %114, %120 : vector<32x32xi32>
    %122 = arith.extui %121 : vector<32x32xi1> to vector<32x32xi32>
    %123 = arith.addi %119, %122 : vector<32x32xi32>
    %c24_i32_28 = arith.constant 24 : i32
    %124 = vector.broadcast %c24_i32_28 : i32 to vector<32x32xi32>
    %125 = arith.cmpi sge, %114, %124 : vector<32x32xi32>
    %126 = arith.extui %125 : vector<32x32xi1> to vector<32x32xi32>
    %127 = arith.addi %123, %126 : vector<32x32xi32>
    %128 = arith.cmpi eq, %113, %127 : vector<32x32xi32>
    %129 = arith.extui %128 : vector<32x32xi1> to vector<32x32xi32>
    %130 = arith.sitofp %129 : vector<32x32xi32> to vector<32x32xf32>
    "tpu.trace_start"() <{level = 10 : i32, message = "gqi,ij->gqj"}> : () -> ()
    %cst_29 = arith.constant dense<0.000000e+00> : vector<16x8x32xf32>
    %131 = tpu.matmul %99, %130, %cst_29 {dimension_numbers = #tpu.dot_dimension_numbers<[2], [0], [0, 1], [1], [0, 0, 0, 1, 1, 1], [], []>} : vector<16x8x32xf32>, vector<32x32xf32>, vector<16x8x32xf32> -> vector<16x8x32xf32>
    "tpu.trace_stop"() : () -> ()
    %132 = tpu.reciprocal %131 {approx = true} : vector<16x8x32xf32> -> vector<16x8x32xf32>
    %133 = arith.mulf %99, %132 : vector<16x8x32xf32>
    %134 = tpu.iota {dimensions = array<i32: 0>} : vector<32x32xi32>
    %c0_i32_30 = arith.constant 0 : i32
    %135 = vector.broadcast %c0_i32_30 : i32 to vector<32x32xi32>
    %c8_i32_31 = arith.constant 8 : i32
    %136 = vector.broadcast %c8_i32_31 : i32 to vector<32x32xi32>
    %137 = arith.cmpi sge, %134, %136 : vector<32x32xi32>
    %138 = arith.extui %137 : vector<32x32xi1> to vector<32x32xi32>
    %139 = arith.addi %135, %138 : vector<32x32xi32>
    %c16_i32_32 = arith.constant 16 : i32
    %140 = vector.broadcast %c16_i32_32 : i32 to vector<32x32xi32>
    %141 = arith.cmpi sge, %134, %140 : vector<32x32xi32>
    %142 = arith.extui %141 : vector<32x32xi1> to vector<32x32xi32>
    %143 = arith.addi %139, %142 : vector<32x32xi32>
    %c24_i32_33 = arith.constant 24 : i32
    %144 = vector.broadcast %c24_i32_33 : i32 to vector<32x32xi32>
    %145 = arith.cmpi sge, %134, %144 : vector<32x32xi32>
    %146 = arith.extui %145 : vector<32x32xi1> to vector<32x32xi32>
    %147 = arith.addi %143, %146 : vector<32x32xi32>
    %148 = tpu.iota {dimensions = array<i32: 1>} : vector<32x32xi32>
    %c0_i32_34 = arith.constant 0 : i32
    %149 = vector.broadcast %c0_i32_34 : i32 to vector<32x32xi32>
    %c8_i32_35 = arith.constant 8 : i32
    %150 = vector.broadcast %c8_i32_35 : i32 to vector<32x32xi32>
    %151 = arith.cmpi sge, %148, %150 : vector<32x32xi32>
    %152 = arith.extui %151 : vector<32x32xi1> to vector<32x32xi32>
    %153 = arith.addi %149, %152 : vector<32x32xi32>
    %c16_i32_36 = arith.constant 16 : i32
    %154 = vector.broadcast %c16_i32_36 : i32 to vector<32x32xi32>
    %155 = arith.cmpi sge, %148, %154 : vector<32x32xi32>
    %156 = arith.extui %155 : vector<32x32xi1> to vector<32x32xi32>
    %157 = arith.addi %153, %156 : vector<32x32xi32>
    %c24_i32_37 = arith.constant 24 : i32
    %158 = vector.broadcast %c24_i32_37 : i32 to vector<32x32xi32>
    %159 = arith.cmpi sge, %148, %158 : vector<32x32xi32>
    %160 = arith.extui %159 : vector<32x32xi1> to vector<32x32xi32>
    %161 = arith.addi %157, %160 : vector<32x32xi32>
    %162 = tpu.concatenate %63, %63, %63, %63 in 1 : vector<16x8x32xf32>, vector<16x8x32xf32>, vector<16x8x32xf32>, vector<16x8x32xf32> -> vector<16x32x32xf32>
    %163 = arith.cmpi eq, %147, %161 : vector<32x32xi32>
    %cst_38 = arith.constant 0.000000e+00 : f32
    %164 = vector.shape_cast %163 : vector<32x32xi1> to vector<1x32x32xi1>
    %165 = vector.broadcast %164 : vector<1x32x32xi1> to vector<16x32x32xi1>
    %166 = vector.broadcast %cst_38 : f32 to vector<16x32x32xf32>
    %167 = arith.select %165, %162, %166 : vector<16x32x32xi1>, vector<16x32x32xf32>
    %168 = arith.truncf %167 : vector<16x32x32xf32> to vector<16x32x32xbf16>
    %169 = arith.truncf %133 : vector<16x8x32xf32> to vector<16x8x32xbf16>
    "tpu.trace_start"() <{level = 10 : i32, message = "gqs,gsc->gqc"}> : () -> ()
    %cst_39 = arith.constant dense<0.000000e+00> : vector<16x8x32xf32>
    %170 = tpu.matmul %169, %168, %cst_39 {dimension_numbers = #tpu.dot_dimension_numbers<[2], [1], [1], [2], [0, 0, 0, 1, 1, 2], [0], [0]>} : vector<16x8x32xbf16>, vector<16x32x32xbf16>, vector<16x8x32xf32> -> vector<16x8x32xf32>
    "tpu.trace_stop"() : () -> ()
    %171 = vector.shape_cast %170 : vector<16x8x32xf32> to vector<1x16x8x32xf32>
    %cst_40 = arith.constant dense<0.000000e+00> : vector<1x8x32xf32>
    %172 = vector.multi_reduction <add>, %171, %cst_40 [1] : vector<1x16x8x32xf32> to vector<1x8x32xf32>
    %173 = vector.shape_cast %172 : vector<1x8x32xf32> to vector<1x1x8x32xf32>
    %cst_41 = arith.constant 1.600000e+01 : f32
    %174 = vector.broadcast %cst_41 : f32 to vector<1x1x8x32xf32>
    %175 = arith.divf %173, %174 : vector<1x1x8x32xf32>
    %176 = vector.broadcast %175 : vector<1x1x8x32xf32> to vector<1x16x8x32xf32>
    %177 = arith.subf %171, %176 : vector<1x16x8x32xf32>
    %178 = arith.mulf %177, %177 : vector<1x16x8x32xf32>
    %cst_42 = arith.constant dense<0.000000e+00> : vector<1x8x32xf32>
    %179 = vector.multi_reduction <add>, %178, %cst_42 [1] : vector<1x16x8x32xf32> to vector<1x8x32xf32>
    %180 = vector.shape_cast %179 : vector<1x8x32xf32> to vector<1x1x8x32xf32>
    %cst_43 = arith.constant 1.600000e+01 : f32
    %181 = vector.broadcast %cst_43 : f32 to vector<1x1x8x32xf32>
    %182 = arith.divf %180, %181 : vector<1x1x8x32xf32>
    %183 = vector.broadcast %175 : vector<1x1x8x32xf32> to vector<1x16x8x32xf32>
    %184 = arith.subf %171, %183 : vector<1x16x8x32xf32>
    %cst_44 = arith.constant 9.99999974E-6 : f32
    %185 = vector.broadcast %cst_44 : f32 to vector<1x1x8x32xf32>
    %186 = arith.addf %182, %185 : vector<1x1x8x32xf32>
    %187 = math.rsqrt %186 : vector<1x1x8x32xf32>
    %188 = vector.broadcast %187 : vector<1x1x8x32xf32> to vector<1x16x8x32xf32>
    %189 = arith.mulf %184, %188 : vector<1x16x8x32xf32>
    %190 = vector.shape_cast %6 : vector<1x32xf32> to vector<1x1x1x32xf32>
    %191 = vector.broadcast %190 : vector<1x1x1x32xf32> to vector<1x16x8x32xf32>
    %192 = arith.mulf %189, %191 : vector<1x16x8x32xf32>
    %193 = vector.shape_cast %7 : vector<1x32xf32> to vector<1x1x1x32xf32>
    %194 = vector.broadcast %193 : vector<1x1x1x32xf32> to vector<1x16x8x32xf32>
    %195 = arith.addf %192, %194 : vector<1x16x8x32xf32>
    %196 = vector.shape_cast %195 : vector<1x16x8x32xf32> to vector<128x32xf32>
    %197 = arith.truncf %196 : vector<128x32xf32> to vector<128x32xbf16>
    %c0_45 = arith.constant 0 : index
    %c0_46 = arith.constant 0 : index
    %198 = vector.load %arg3[%c0_45, %c0_46] : memref<32x32xbf16, #tpu.memory_space<vmem>>, vector<32x32xbf16>
    %cst_47 = arith.constant dense<0.000000e+00> : vector<128x32xf32>
    %199 = tpu.matmul %197, %198, %cst_47 {dimension_numbers = #tpu.dot_dimension_numbers<[1], [0], [0], [1], [0, 0, 1, 1], [], []>} : vector<128x32xbf16>, vector<32x32xbf16>, vector<128x32xf32> -> vector<128x32xf32>
    %200 = vector.broadcast %8 : vector<1x32xf32> to vector<128x32xf32>
    %201 = arith.addf %199, %200 : vector<128x32xf32>
    %202 = vector.broadcast %9 : vector<1x32xf32> to vector<128x32xf32>
    %203 = arith.mulf %202, %201 : vector<128x32xf32>
    %204 = vector.shape_cast %203 : vector<128x32xf32> to vector<1x16x8x32xf32>
    %205 = arith.addf %204, %0 : vector<1x16x8x32xf32>
    %c0_48 = arith.constant 0 : index
    %c0_49 = arith.constant 0 : index
    %c0_50 = arith.constant 0 : index
    %c0_51 = arith.constant 0 : index
    %206 = vector.load %arg5[%c0_48, %c0_49, %c0_50, %c0_51] : memref<1x16x8x32xf32, #tpu.memory_space<vmem>>, vector<1x16x8x32xf32>
    tpu.vector_store %arg5[%c0_48, %c0_49, %c0_50, %c0_51], %205 {strides = array<i32>} : memref<1x16x8x32xf32, #tpu.memory_space<vmem>>, vector<1x16x8x32xf32>,
    return
  }
  func.func @transform_0(%arg0: i32) -> (i32, i32, i32, i32) {
    %c0_i32 = arith.constant 0 : i32
    %c0_i32_0 = arith.constant 0 : i32
    %c0_i32_1 = arith.constant 0 : i32
    %c0_i32_2 = arith.constant 0 : i32
    return %arg0, %c0_i32, %c0_i32_0, %c0_i32_1 : i32, i32, i32, i32
  }
  func.func @transform_1(%arg0: i32) -> (i32, i32) {
    %c0_i32 = arith.constant 0 : i32
    %c0_i32_0 = arith.constant 0 : i32
    %c0_i32_1 = arith.constant 0 : i32
    return %c0_i32, %c0_i32_0 : i32, i32
  }
  func.func @transform_2(%arg0: i32) -> (i32, i32) {
    %c0_i32 = arith.constant 0 : i32
    %c0_i32_0 = arith.constant 0 : i32
    %c0_i32_1 = arith.constant 0 : i32
    return %c0_i32, %c0_i32_0 : i32, i32
  }
  func.func @transform_3(%arg0: i32) -> (i32, i32) {
    %c0_i32 = arith.constant 0 : i32
    %c0_i32_0 = arith.constant 0 : i32
    %c0_i32_1 = arith.constant 0 : i32
    return %c0_i32, %c0_i32_0 : i32, i32
  }
  func.func @transform_4(%arg0: i32) -> (i32, i32, i32, i32) {
    %c0_i32 = arith.constant 0 : i32
    %c0_i32_0 = arith.constant 0 : i32
    %c0_i32_1 = arith.constant 0 : i32
    %c0_i32_2 = arith.constant 0 : i32
    return %arg0, %c0_i32, %c0_i32_0, %c0_i32_1 : i32, i32, i32, i32
  }
}

</mosaic_0001>

<bundles_post_ra>
// kernel: tpu_custom_call.1
= control target key start
LH: loop header
LB: loop body
LE: loop exit
PB: predicated region body
PF: predicated region fallthrough
CT: control target
= control target key end

     0   :  { %9 = vsyncpa [#allocation3], 0  ;;  %s7829_s0 = inlined_call_operand.hbm [shape: f32[2,16,8,32], index: 0, kind: input, shape index: {}, may-alias: {0,4}]   ;;  %s7830_s1 = inlined_call_operand.vmem [shape: bf16[32,160], index: 1, kind: input, shape index: {}]   ;;  %s7831_s2 = inlined_call_operand.vmem [shape: bf16[32,32], index: 2, kind: input, shape index: {}]   ;;  %s7832_s3 = inlined_call_operand.vmem [shape: f32[8,32], index: 3, kind: input, shape index: {}]   ;;  %s7833_s4 = inlined_call_operand.hbm [shape: f32[2,16,8,32], index: 4, kind: output, shape index: {}, may-alias: {0,4}]  }
   0x1   :  { %11 = vsyncpa [#allocation3 + $0x1], 0 }
   0x2   :  { %12 = vsyncpa [#allocation4], 0 }
   0x3   :  { %14 = vsyncpa [#allocation4 + $0x1], 0  ;;  %s5403_s15 = smov 0   ;;  %s5405_s16 = smov 0  }
   0x4   :  { %s5407_s17 = smov 0   ;;  %s5409_s18 = smov 0  }
   0x5 LB: > { %s5424_s19 = sadd.s32 4294967295, %s5363_s18   ;;  %s4322_s20 = sadd.s32 4294967294, %s5363_s18   ;;  %s5363_s18 = sphi %s5409_s18, %s8134_s18   ;;  %s5359_s17 = sphi %s5407_s17, %s8133_s17   ;;  %s5355_s16 = sphi %s5405_s16, %s8132_s16   ;;  %s5351_s15 = sphi %s5403_s15, %s8131_s15  }
   0x6   : > { %s5428_s21 = sadd.s32 1, %s5363_s18   ;;  %s27_s22 = sadd.s32 1, %s5359_s17 }
   0x7   : > { %s24_s23 = ssub.s32 %s5363_s18, %s5428_s21  ;;  %p34_p0 = scmp.ne.s32.totalorder %s5359_s17, %s5355_s16 }
   0x8   : > { %p25_p1 = scmp.eq.s32.totalorder %s24_s23, 0  ;;  %p35_p2 = scmp.eq.s32.totalorder %s5363_s18, 0 }
   0x9   : > { %p40_p3 = scmp.ne.s32.totalorder %s5355_s16, %s5351_s15  ;;  %p41_p4 = scmp.eq.s32.totalorder %s5424_s19, 0 }
   0xa   : > { %s5440_s24 = scalar_select %p25_p1, %s5359_s17, %s27_s22  }
   0xb   : > { %p5442_p5 = por %p35_p2, %p34_p0  ;;  %p5446_p6 = por %p41_p4, %p40_p3 }
   0xc   : > { %p127_p7 = scmp.eq.s32.totalorder %s5424_s19, 1  ;;  %p133_p8 = scmp.eq.s32.totalorder %s4322_s20, 1 }
   0xd   : > { %p4970_p10 = scmp.lt.s32.totalorder %s5363_s18, 2  ;;  %s162_s29 = sand.u32 1, %s5359_s17  }
   0xe   : > { %p5453_p11 = por %p127_p7, %p34_p0  ;;  %p5457_p12 = por %p133_p8, %p40_p3 }
   0xf   : > { %s4514_s30 = sshll.u32 %s5363_s18, 11  ;;  %s4325_s5 = sshll.u32 %s162_s29, 7 }
  0x10   : > { %s7925_s27 = scalar_select %p5453_p11, 1, 0 }
  0x11   : > { %s7926_s28 = scalar_select %p5457_p12, 1, 0 }
  0x12   : > { %s5466_s8 = scalar_lea.hbm %s7829_s0, %s4514_s30  ;;  %s166_s9 = scalar_lea.vmem [#allocation2], %s4325_s5 }
  0x13   : > { %s173_s10 = sshll.u32 %s166_s9, 4  ;;  %p5470_p13 = pnand %p4970_p10, %p5442_p5  ;;  %s5474_s10 = int_to_ptr.vmem [resolvable:$true] %s173_s10 }
  0x14   : > { %s5476_s12 = scalar_lea.sflag [#allocation3], %s162_s29  ;;  %s5267_s13 = scalar_lea.hbm %s5466_s8, 2048 }
  0x15   : > { %p5268_p0 = scmp.ne.s32.totalorder %s5466_s8, %s5267_s13  ;;  %p5269_p1 = pneg %p5470_p13 }
  0x16   : > { %s5272_s22 = scalar_lea.hbm %s7829_s0, 4096  ;;  %p5273_p4 = scmp.lt.u32.totalorder %s5466_s8, %s7829_s0 }
  0x17   : > { %p5270_p2 = pnand %p5269_p1, %p5268_p0  ;;  %p5274_p5 = scmp.lt.u32.totalorder %s5272_s22, %s5267_s13 }
  0x18   : > { %p5276_p8 = scmp.lt.u32.totalorder %s5267_s13, %s5466_s8 }
  0x19   : > { %p5271_p3 = pneg %p5270_p2  ;;  %p5275_p7 = por %p5274_p5, %p5273_p4 }
  0x1b   : > { %p5277_p10 = por %p5276_p8, %p5275_p7 }
  0x1d   : > { %p5278_p9 = pnand %p5277_p10, %p5271_p3 }
  0x1f   : > { %5281 = shalt.err (!%p5278_p9)
}
  0x20   : > { %s5282_s29 = scalar_lea.vmem %s5474_s10, 2048  ;;  %s5365_s30 = smov [#allocation2]  }
  0x21   : > { %p5283_p0 = scmp.ne.s32.totalorder %s5474_s10, %s5282_s29  ;;  %s5287_s5 = sshll.u32 %s5365_s30, 4  ;;  %s5288_s5 = int_to_ptr.vmem [resolvable:$false] %s5287_s5 }
  0x22   : > { %s5289_s6 = scalar_lea.vmem %s5288_s5, 4096  ;;  %p5290_p11 = scmp.lt.s32.totalorder %s5474_s10, %s5288_s5 }
  0x23   : > { %p5285_p2 = pnand %p5283_p0, %p5269_p1  ;;  %p5291_p4 = scmp.lt.s32.totalorder %s5289_s6, %s5282_s29 }
  0x25   : > { %p5286_p12 = pneg %p5285_p2  ;;  %p5292_p5 = por %p5291_p4, %p5290_p11 }
  0x27   : > { %p5293_p7 = pnand %p5292_p5, %p5286_p12 }
  0x29   : > { %5296 = shalt.err (!%p5293_p7)
}
  0x2a   : > { %s5366_s7 = smov 128   ;;  %s5367_s9 = smov 8  }
  0x2b   : > { %4965 = dma.hbm_to_vmem [thread:$0]  (!%p5470_p13), %s5466_s8, 2048, %s5474_s10, %s5476_s12, %s5366_s7, %s5366_s7, %s5367_s9  }
  0x2c   : > { %p4328_p9 = scmp.ge.s32.totalorder %s5363_s18, 1  ;;  %p181_p1 = scmp.lt.s32.totalorder %s5363_s18, 3 }
  0x2e   : > { %p182_p3 = pnand %p4328_p9, %p181_p1 }
  0x30   : > { %185 = sbr.rel (%p182_p3) target bundleno = 2550 (0x9f6), region = 36 }
  0x37   : > { %s5507_s13 = sand.u32 1, %s5355_s16  }
  0x38   : > { %s4329_s14 = sshll.u32 %s5507_s13, 7  ;;  %s188_s20 = scalar_lea.sflag [#allocation3], %s5507_s13 }
  0x39   : > { %s5513_s22 = scalar_lea.vmem [#allocation2], %s4329_s14 }
  0x3a   : > { %5342 = dma.done.wait (%p5446_p6), %s188_s20, 2048  }
  0x3b   : > { %5344 = vsyncadd (%p5446_p6), %s188_s20, 4294965248  ;;  %v7837_v0 = vlaneseq  ;;  %v7835_v1 = vmov 0   ;;  %v5015_v5 = vld [vmem:[%s7830_s1 + $0x4] ss:$8 sps:$4 sm:$0xff]   ;;  %v5017_v8 = vld [vmem:[%s7830_s1] ss:$8 sps:$4 sm:$0xff]  }
  0x3c   : > { %707 = vmatprep.mubr.bf16.mxu0 %v7835_v1  ;;  %675 = vmatprep.subr.bf16.mxu0 %v5015_v5  ;;  %v5018_v11 = vld [vmem:[%s7830_s1 + $0x14] ss:$8 sps:$4 sm:$0xff]   ;;  %v5020_v12 = vld [vmem:[%s7830_s1 + $0x10] ss:$8 sps:$4 sm:$0xff]   ;;  %v5544_v13 = vld [vmem:[%s7832_s3] sm:$0xff]  ;;  %vm234_vm0 = vcmask 261120  }
  0x3d   : > { %v5521_v2 = vshrl.u32 %v7837_v0, 7  ;;  %676 = vmatpush1.bf16.msra.mxu0 %v5017_v8  ;;  %v217_v16 = vld [vmem:[%s5513_s22] sm:$0xff]  ;;  %v218_v17 = vld [vmem:[%s5513_s22 + $0x8] sm:$0xff]  ;;  %v219_v18 = vld [vmem:[%s5513_s22 + $0x10] sm:$0xff]  ;;  %s5369_s6 = smov 32   ;;  %s5370_s7 = smov 96  }
  0x3e   : > { %677 = vmatprep.subr.bf16.mxu0 %v5018_v11  ;;  %v220_v23 = vld [vmem:[%s5513_s22 + $0x18] sm:$0xff]  ;;  %v235_v24 = vsel %vm234_vm0, %v217_v16, 0.0  ;;  %v236_v25 = vsel %vm234_vm0, %v218_v17, 0.0  ;;  %v238_v26 = vsel %vm234_vm0, %v219_v18, 0.0  ;;  %v221_v27 = vld [vmem:[%s5513_s22 + $0x20] sm:$0xff]  ;;  %v222_v30 = vld [vmem:[%s5513_s22 + $0x28] sm:$0xff] }
  0x3f   : > { %v601_v3 = vsub.s32 2, %v5521_v2  ;;  %v1782_v4 = vsub.s32 3, %v5521_v2  ;;  %v3996_v6 = vsub.s32 4, %v5521_v2  ;;  %v4016_v7 = vsub.s32 5, %v5521_v2  ;;  %v223_v33 = vld [vmem:[%s5513_s22 + $0x30] sm:$0xff]  ;;  %v224_v36 = vld [vmem:[%s5513_s22 + $0x38] sm:$0xff] }
  0x40   : > { %v4048_v9 = vsub.s32 6, %v5521_v2  ;;  %v4185_v10 = vsub.s32 7, %v5521_v2  ;;  %v237_v28 = vadd.f32 %v236_v25, %v235_v24  ;;  %v240_v29 = vsel %vm234_vm0, %v220_v23, 0.0  ;;  %v225_v39 = vld [vmem:[%s5513_s22 + $0x40] sm:$0xff]  ;;  %v226_v42 = vld [vmem:[%s5513_s22 + $0x48] sm:$0xff]  ;;  %v227_v45 = vld [vmem:[%s5513_s22 + $0x50] sm:$0xff] }
  0x41   : > { %v5547_v14 = vrot.slane %v5544_v13, %v601_v3  ;;  %v5550_v15 = vrot.slane %v5544_v13, %v1782_v4  ;;  %v5556_v19 = vrot.slane %v5544_v13, %v3996_v6  ;;  %v5559_v20 = vrot.slane %v5544_v13, %v4016_v7  ;;  %678 = vmatpush1.bf16.msra.mxu0 %v5020_v12  ;;  %v228_v48 = vld [vmem:[%s5513_s22 + $0x58] sm:$0xff]  ;;  %v229_v51 = vld [vmem:[%s5513_s22 + $0x60] sm:$0xff]  ;;  %v230_v54 = vld [vmem:[%s5513_s22 + $0x68] sm:$0xff]  ;;  %s5371_s9 = smov 64   ;;  %s7706_s11 = scalar_lea.vmem [#allocation5], %s4329_s14 }
  0x42   : > { %v5562_v21 = vrot.slane %v5544_v13, %v4048_v9  ;;  %v5565_v22 = vrot.slane %v5544_v13, %v4185_v10  ;;  %v239_v31 = vadd.f32 %v238_v26, %v237_v28  ;;  %v242_v32 = vsel %vm234_vm0, %v221_v27, 0.0  ;;  %v231_v57 = vld [vmem:[%s5513_s22 + $0x70] sm:$0xff]  ;;  %v232_v60 = vld [vmem:[%s5513_s22 + $0x78] sm:$0xff]  ;;  %s4515_s14 = sshll.u32 %s5424_s19, 11  ;;  %s4249_s12 = sshll.u32 %s7706_s11, 4  ;;  %s7778_s12 = int_to_ptr.vmem [resolvable:$true] %s4249_s12 }
  0x43   : > { %7928 = vst [vmem:[#allocation8_spill] sm:$0xff] %v5547_v14  ;;  %7929 = vst [vmem:[#allocation9_spill] sm:$0xff] %v5550_v15  ;;  %v244_v35 = vsel %vm234_vm0, %v222_v30, 0.0  ;;  %v246_v38 = vsel %vm234_vm0, %v223_v33, 0.0  ;;  %v248_v41 = vsel %vm234_vm0, %v224_v36, 0.0  ;;  %v250_v44 = vsel %vm234_vm0, %v225_v39, 0.0  ;;  %s7776_s19 = scalar_lea.hbm %s7833_s4, %s4515_s14 }
  0x44   : > { %7930 = vst [vmem:[#allocation10_spill] sm:$0xff] %v5556_v19  ;;  %7931 = vst [vmem:[#allocation11_spill] sm:$0xff] %v5559_v20  ;;  %v241_v34 = vadd.f32 %v240_v29, %v239_v31  ;;  %v252_v47 = vsel %vm234_vm0, %v226_v42, 0.0  ;;  %v254_v50 = vsel %vm234_vm0, %v227_v45, 0.0  ;;  %v256_v53 = vsel %vm234_vm0, %v228_v48, 0.0  ;;  %s4236_s29 = scalar_lea.sflag [#allocation4], %s5507_s13 }
  0x45   : > { %7932 = vst [vmem:[#allocation12_spill] sm:$0xff] %v5562_v21  ;;  %7933 = vst [vmem:[#allocation13_spill] sm:$0xff] %v5565_v22  ;;  %v258_v56 = vsel %vm234_vm0, %v229_v51, 0.0  ;;  %v260_v59 = vsel %vm234_vm0, %v230_v54, 0.0  ;;  %v262_v62 = vsel %vm234_vm0, %v231_v57, 0.0  ;;  %v264_v3 = vsel %vm234_vm0, %v232_v60, 0.0 }
  0x46   : > { %v243_v37 = vadd.f32 %v242_v32, %v241_v34  ;;  %vm5373_vm1 = vmmov 0   ;;  %s5297_s30 = scalar_lea.vmem %s7778_s12, 2048  ;;  %p8128_p11 = scmp.ne.s32.totalorder %s7925_s27, 0 }
  0x47   : > { %p5298_p6 = scmp.ne.s32.totalorder %s7778_s12, %s5297_s30  ;;  %s5375_s5 = smov [#allocation5]  }
  0x48   : > { %v245_v40 = vadd.f32 %v244_v35, %v243_v37 }
  0x49   : > { %p5299_p12 = pnand %p5298_p6, %p8128_p11 }
  0x4a   : > { %v247_v43 = vadd.f32 %v246_v38, %v245_v40 }
  0x4b   : > { %p5300_p13 = pneg %p5299_p12 }
  0x4c   : > { %v249_v46 = vadd.f32 %v248_v41, %v247_v43 }
  0x4e   : > { %v251_v49 = vadd.f32 %v250_v44, %v249_v46 }
  0x50   : > { %v253_v52 = vadd.f32 %v252_v47, %v251_v49 }
  0x52   : > { %v255_v55 = vadd.f32 %v254_v50, %v253_v52 }
  0x54   : > { %v257_v58 = vadd.f32 %v256_v53, %v255_v55 }
  0x56   : > { %v259_v61 = vadd.f32 %v258_v56, %v257_v58 }
  0x58   : > { %v261_v63 = vadd.f32 %v260_v59, %v259_v61 }
  0x5a   : > { %v263_v4 = vadd.f32 %v262_v62, %v261_v63 }
  0x5c   : > { %v265_v5 = vadd.f32 %v264_v3, %v263_v4 }
  0x5e   : > { %v267_v6 = vmul.f32 0.0625, %v265_v5 }
  0x60   : > { %v5596_v7 = vsub.f32 %v217_v16, %v267_v6  ;;  %v5598_v8 = vsub.f32 %v218_v17, %v267_v6  ;;  %v5600_v9 = vsub.f32 %v219_v18, %v267_v6  ;;  %v5602_v10 = vsub.f32 %v220_v23, %v267_v6 }
  0x61   : > { %v5604_v11 = vsub.f32 %v221_v27, %v267_v6  ;;  %v5612_v26 = vsub.f32 %v222_v30, %v267_v6  ;;  %v5616_v17 = vsub.f32 %v223_v33, %v267_v6  ;;  %v5623_v31 = vsub.f32 %v224_v36, %v267_v6 }
  0x62   : > { %v284_v12 = vmul.f32 %v5596_v7, %v5596_v7  ;;  %v285_v24 = vmul.f32 %v5598_v8, %v5598_v8  ;;  %v286_v25 = vmul.f32 %v5600_v9, %v5600_v9  ;;  %v287_v16 = vmul.f32 %v5602_v10, %v5602_v10 }
  0x63   : > { %v288_v18 = vmul.f32 %v5604_v11, %v5604_v11  ;;  %v289_v30 = vmul.f32 %v5612_v26, %v5612_v26  ;;  %v5628_v33 = vsub.f32 %v225_v39, %v267_v6  ;;  %v290_v35 = vmul.f32 %v5616_v17, %v5616_v17 }
  0x64   : > { %v300_v23 = vsel %vm234_vm0, %v284_v12, 0.0  ;;  %v301_v27 = vsel %vm234_vm0, %v285_v24, 0.0  ;;  %v303_v28 = vsel %vm234_vm0, %v286_v25, 0.0  ;;  %v305_v32 = vsel %vm234_vm0, %v287_v16, 0.0 }
  0x65   : > { %v302_v29 = vadd.f32 %v301_v27, %v300_v23  ;;  %v307_v37 = vsel %vm234_vm0, %v288_v18, 0.0  ;;  %v5633_v40 = vsub.f32 %v226_v42, %v267_v6  ;;  %v291_v36 = vmul.f32 %v5623_v31, %v5623_v31 }
  0x66   : > { %v309_v41 = vsel %vm234_vm0, %v289_v30, 0.0  ;;  %v5638_v44 = vsub.f32 %v227_v45, %v267_v6  ;;  %v292_v39 = vmul.f32 %v5628_v33, %v5628_v33  ;;  %v311_v46 = vsel %vm234_vm0, %v290_v35, 0.0 }
  0x67   : > { %v304_v34 = vadd.f32 %v303_v28, %v302_v29  ;;  %v5643_v49 = vsub.f32 %v228_v48, %v267_v6  ;;  %v293_v42 = vmul.f32 %v5633_v40, %v5633_v40  ;;  %v313_v50 = vsel %vm234_vm0, %v291_v36, 0.0 }
  0x68   : > { %v5648_v53 = vsub.f32 %v229_v51, %v267_v6  ;;  %v294_v45 = vmul.f32 %v5638_v44, %v5638_v44  ;;  %v315_v55 = vsel %vm234_vm0, %v292_v39, 0.0  ;;  %v5653_v58 = vsub.f32 %v230_v54, %v267_v6 }
  0x69   : > { %v306_v38 = vadd.f32 %v305_v32, %v304_v34  ;;  %v295_v48 = vmul.f32 %v5643_v49, %v5643_v49  ;;  %v317_v59 = vsel %vm234_vm0, %v293_v42, 0.0  ;;  %v5658_v62 = vsub.f32 %v231_v57, %v267_v6 }
  0x6a   : > { %v296_v51 = vmul.f32 %v5648_v53, %v5648_v53  ;;  %v319_v63 = vsel %vm234_vm0, %v294_v45, 0.0  ;;  %v5663_v4 = vsub.f32 %v232_v60, %v267_v6  ;;  %v297_v54 = vmul.f32 %v5653_v58, %v5653_v58 }
  0x6b   : > { %v308_v43 = vadd.f32 %v307_v37, %v306_v38  ;;  %v321_v5 = vsel %vm234_vm0, %v295_v48, 0.0  ;;  %v298_v24 = vmul.f32 %v5658_v62, %v5658_v62  ;;  %v352_v34 = vsub.s32 0, %v5521_v2 }
  0x6c   : > { %v323_v57 = vsel %vm234_vm0, %v296_v51, 0.0  ;;  %v299_v16 = vmul.f32 %v5663_v4, %v5663_v4  ;;  %v325_v18 = vsel %vm234_vm0, %v297_v54, 0.0  ;;  %v372_v35 = vsub.s32 1, %v5521_v2 }
  0x6d   : > { %v310_v47 = vadd.f32 %v309_v41, %v308_v43  ;;  %v327_v60 = vsel %vm234_vm0, %v298_v24, 0.0  ;;  %v5679_v37 = vrot.slane %v5544_v13, %v352_v34 }
  0x6e   : > { %v329_v27 = vsel %vm234_vm0, %v299_v16, 0.0  ;;  %v5684_v36 = vrot.slane %v5544_v13, %v372_v35 }
  0x6f   : > { %v312_v52 = vadd.f32 %v311_v46, %v310_v47 }
  0x71   : > { %v314_v56 = vadd.f32 %v313_v50, %v312_v52 }
  0x73   : > { %v316_v61 = vadd.f32 %v315_v55, %v314_v56 }
  0x75   : > { %v318_v3 = vadd.f32 %v317_v59, %v316_v61 }
  0x77   : > { %v320_v12 = vadd.f32 %v319_v63, %v318_v3 }
  0x79   : > { %v322_v25 = vadd.f32 %v321_v5, %v320_v12 }
  0x7b   : > { %v324_v23 = vadd.f32 %v323_v57, %v322_v25 }
  0x7d   : > { %v326_v6 = vadd.f32 %v325_v18, %v324_v23 }
  0x7f   : > { %v328_v28 = vadd.f32 %v327_v60, %v326_v6 }
  0x81   : > { %v330_v29 = vadd.f32 %v329_v27, %v328_v28 }
  0x83   : > { %v331_v30 = vmul.f32 0.0625, %v330_v29 }
  0x85   : > { %v332_v32 = vadd.f32 1e-05, %v331_v30 }
  0x87   : > { %5023 = vrsqrt.f32 %v332_v32 }
  0x91   : > { %v5681_v38 = vpop.eup %5023 }
  0x92   : > { %v334_v41 = vmul.f32 %v5681_v38, %v5596_v7  ;;  %v335_v43 = vmul.f32 %v5681_v38, %v5598_v8  ;;  %v336_v39 = vmul.f32 %v5681_v38, %v5600_v9  ;;  %v337_v2 = vmul.f32 %v5681_v38, %v5602_v10 }
  0x93   : > { %v338_v52 = vmul.f32 %v5681_v38, %v5604_v11  ;;  %v339_v45 = vmul.f32 %v5681_v38, %v5612_v26  ;;  %v340_v63 = vmul.f32 %v5681_v38, %v5616_v17  ;;  %v341_v3 = vmul.f32 %v5681_v38, %v5623_v31 }
  0x94   : > { %v354_v46 = vmul.f32 %v5679_v37, %v334_v41  ;;  %v355_v47 = vmul.f32 %v5679_v37, %v335_v43  ;;  %v356_v7 = vmul.f32 %v5679_v37, %v336_v39  ;;  %v357_v8 = vmul.f32 %v5679_v37, %v337_v2 }
  0x95   : > { %v358_v59 = vmul.f32 %v5679_v37, %v338_v52  ;;  %v359_v61 = vmul.f32 %v5679_v37, %v339_v45  ;;  %v360_v12 = vmul.f32 %v5679_v37, %v340_v63  ;;  %v361_v24 = vmul.f32 %v5679_v37, %v341_v3 }
  0x96   : > { %v5697_v42 = vadd.f32 %v5684_v36, %v354_v46  ;;  %v5700_v13 = vadd.f32 %v5684_v36, %v355_v47  ;;  %v5708_v10 = vadd.f32 %v5684_v36, %v356_v7  ;;  %v5711_v50 = vadd.f32 %v5684_v36, %v357_v8 }
  0x97   : > { %v5730_v26 = vadd.f32 %v5684_v36, %v358_v59  ;;  %v5733_v51 = vadd.f32 %v5684_v36, %v359_v61  ;;  %v5748_v17 = vadd.f32 %v5684_v36, %v360_v12  ;;  %v5751_v31 = vadd.f32 %v5684_v36, %v361_v24 }
  0x98   : > { %v619_v9 = vpack.c.bf16 %v5700_v13, %v5697_v42  ;;  %v393_v55 = vsel %vm234_vm0, %v5700_v13, 0.0  ;;  %v396_v56 = vsel %vm234_vm0, %v5708_v10, 0.0  ;;  %v620_v48 = vpack.c.bf16 %v5711_v50, %v5708_v10 }
  0x99   : > { %394 = vadd.xlane.f32.xlu0 %v393_v55  ;;  %v390_v11 = vsel %vm234_vm0, %v5697_v42, 0.0  ;;  %7934 = vst [vmem:[#allocation14_spill] sm:$0xff] %v5730_v26  ;;  %7935 = vst [vmem:[#allocation15_spill] sm:$0xff] %v5733_v51  ;;  %v399_v54 = vsel %vm234_vm0, %v5711_v50, 0.0  ;;  %v621_v5 = vpack.c.bf16 %v5733_v51, %v5730_v26  ;;  %v342_v57 = vmul.f32 %v5681_v38, %v5628_v33 }
  0x9a   : > { %4335 = vmatmul.mubr.msk.bf16.vlgmr.msra.gmra.mrb[0].mxu0 %vm234_vm0, %v619_v9  ;;  %v343_v25 = vmul.f32 %v5681_v38, %v5633_v40  ;;  %v622_v16 = vpack.c.bf16 %v5751_v31, %v5748_v17  ;;  %v344_v33 = vmul.f32 %v5681_v38, %v5638_v44  ;;  %v345_v40 = vmul.f32 %v5681_v38, %v5643_v49 }
  0x9b   : > { %717 = vmatprep.mubr.bf16.mxu0 %v7835_v1  ;;  %v362_v18 = vmul.f32 %v5679_v37, %v342_v57  ;;  %v346_v44 = vmul.f32 %v5681_v38, %v5648_v53  ;;  %v347_v49 = vmul.f32 %v5681_v38, %v5653_v58 }
  0x9c   : > { %v363_v23 = vmul.f32 %v5679_v37, %v343_v25  ;;  %v364_v28 = vmul.f32 %v5679_v37, %v344_v33  ;;  %v365_v29 = vmul.f32 %v5679_v37, %v345_v40  ;;  %v348_v40 = vmul.f32 %v5681_v38, %v5658_v62 }
  0x9d   : > { %397 = vadd.xlane.f32.xlu0 %v396_v56  ;;  %v5764_v60 = vadd.f32 %v5684_v36, %v362_v18  ;;  %v366_v35 = vmul.f32 %v5679_v37, %v346_v44  ;;  %v367_v41 = vmul.f32 %v5679_v37, %v347_v49 }
  0x9e   : > { %v5767_v6 = vadd.f32 %v5684_v36, %v363_v23  ;;  %v5780_v30 = vadd.f32 %v5684_v36, %v364_v28  ;;  %v5783_v32 = vadd.f32 %v5684_v36, %v365_v29  ;;  %v368_v28 = vmul.f32 %v5679_v37, %v348_v40 }
  0x9f   : > { %7936 = vst [vmem:[#allocation16_spill] sm:$0xff] %v5764_v60  ;;  %v5796_v43 = vadd.f32 %v5684_v36, %v366_v35  ;;  %v5799_v39 = vadd.f32 %v5684_v36, %v367_v41 }
  0xa0   : > { %7937 = vst [vmem:[#allocation17_spill] sm:$0xff] %v5767_v6  ;;  %v623_v27 = vpack.c.bf16 %v5767_v6, %v5764_v60  ;;  %7938 = vst [vmem:[#allocation18_spill] sm:$0xff] %v5783_v32  ;;  %v624_v34 = vpack.c.bf16 %v5783_v32, %v5780_v30  ;;  %v5895_v44 = vadd.f32 %v5684_v36, %v368_v28 }
  0xa1   : > { %391 = vadd.xlane.f32.xlu0 %v390_v11  ;;  %7939 = vst [vmem:[#allocation19_spill] sm:$0xff] %v5796_v43  ;;  %7940 = vst [vmem:[#allocation20_spill] sm:$0xff] %v5799_v39  ;;  %v625_v53 = vpack.c.bf16 %v5799_v39, %v5796_v43 }
  0xa2   : > { %4336 = vmatmul.mubr.msk.bf16.gmra.mrb[4].mxu0 %vm234_vm0, %v620_v48  ;;  %7957 = vst [vmem:[#allocation37_spill] sm:$0xff] %v5895_v44 }
  0xa3   : > { %727 = vmatprep.mubr.bf16.mxu0 %v7835_v1 }
  0xa5   : > { %400 = vadd.xlane.f32.xlu0 %v399_v54 }
  0xaa   : > { %4337 = vmatmul.mubr.msk.bf16.gmra.mrb[8].mxu0 %vm234_vm0, %v621_v5 }
  0xab   : > { %737 = vmatprep.mubr.bf16.mxu0 %v7835_v1 }
  0xb2   : > { %4338 = vmatmul.mubr.msk.bf16.gmra.mrb[12].mxu0 %vm234_vm0, %v622_v16 }
  0xb3   : > { %747 = vmatprep.mubr.bf16.mxu0 %v7835_v1 }
  0xba   : > { %4339 = vmatmul.mubr.msk.bf16.gmra.mrb[16].mxu0 %vm234_vm0, %v623_v27  ;;  %v349_v27 = vmul.f32 %v5681_v38, %v5663_v4 }
  0xbb   : > { %757 = vmatprep.mubr.bf16.mxu0 %v7835_v1 }
  0xbc   : > { %v369_v29 = vmul.f32 %v5679_v37, %v349_v27 }
  0xbe   : > { %v5898_v49 = vadd.f32 %v5684_v36, %v369_v29 }
  0xc0   : > { %7958 = vst [vmem:[#allocation38_spill] sm:$0xff] %v5898_v49 }
  0xc2   : > { %4340 = vmatmul.mubr.msk.bf16.gmra.mrb[20].mxu0 %vm234_vm0, %v624_v34  ;;  %v626_v34 = vpack.c.bf16 %v5898_v49, %v5895_v44 }
  0xc3   : > { %767 = vmatprep.mubr.bf16.mxu0 %v7835_v1 }
  0xca   : > { %4341 = vmatmul.mubr.msk.bf16.gmra.mrb[24].mxu0 %vm234_vm0, %v625_v53 }
  0xcb   : > { %777 = vmatprep.mubr.bf16.mxu0 %v7835_v1 }
  0xd2   : > { %4342 = vmatmul.mubr.msk.bf16.gmra.mrb[28].mxu0 %vm234_vm0, %v626_v34 }
 0x126   : > { %v5927_v4 = vpop.xlane.xlu0 %394 }
 0x12a   : > { %v5931_v37 = vpop.xlane.xlu0 %397 }
 0x12e   : > { %v5933_v38 = vpop.xlane.xlu0 %391 }
 0x132   : > { %v5935_v36 = vpop.xlane.xlu0 %400 }
 0x16d   : > { %v5806_v58 = vpop.f32.mrb[0].mxu0 }
 0x16e   : > { %900 = vrot.lane.b32.xlu1 %v5806_v58, %s5369_s6  ;;  %v5810_v2 = vpop.f32.mrb[1].mxu0  ;;  %804 = vrot.lane.b32.xlu0 %v5806_v58, %s5370_s7  ;;  %v948_v24 = vsel %vm234_vm0, %v5806_v58, 0.0 }
 0x16f   : > { %7941 = vst [vmem:[#allocation21_spill] sm:$0xff] %v5810_v2  ;;  %v5814_v46 = vpop.f32.mrb[2].mxu0 }
 0x170   : > { %v5816_v47 = vpop.f32.mrb[3].mxu0  ;;  %v960_v18 = vsel %vm234_vm0, %v5814_v46, 0.0 }
 0x171   : > { %7942 = vst [vmem:[#allocation22_spill] sm:$0xff] %v5816_v47 }
 0x172   : > { %852 = vrot.lane.b32.xlu0 %v5806_v58, %s5371_s9 }
 0x175   : > { %v5820_v7 = vpop.f32.mrb[4].mxu0 }
 0x176   : > { %806 = vrot.lane.b32.xlu0 %v5814_v46, %s5370_s7  ;;  %v5824_v8 = vpop.f32.mrb[5].mxu0  ;;  %v972_v62 = vsel %vm234_vm0, %v5820_v7, 0.0 }
 0x177   : > { %7943 = vst [vmem:[#allocation23_spill] sm:$0xff] %v5824_v8  ;;  %v5826_v9 = vpop.f32.mrb[6].mxu0 }
 0x178   : > { %v5828_v52 = vpop.f32.mrb[7].mxu0  ;;  %v984_v35 = vsel %vm234_vm0, %v5826_v9, 0.0 }
 0x179   : > { %7944 = vst [vmem:[#allocation24_spill] sm:$0xff] %v5828_v52 }
 0x17a   : > { %854 = vrot.lane.b32.xlu0 %v5814_v46, %s5371_s9 }
 0x17d   : > { %v5832_v45 = vpop.f32.mrb[8].mxu0 }
 0x17e   : > { %v5834_v55 = vpop.f32.mrb[9].mxu0 }
 0x17f   : > { %7945 = vst [vmem:[#allocation25_spill] sm:$0xff] %v5834_v55  ;;  %v5836_v56 = vpop.f32.mrb[10].mxu0 }
 0x180   : > { %7946 = vst [vmem:[#allocation26_spill] sm:$0xff] %v5836_v56  ;;  %v5838_v48 = vpop.f32.mrb[11].mxu0 }
 0x181   : > { %7947 = vst [vmem:[#allocation27_spill] sm:$0xff] %v5838_v48 }
 0x185   : > { %v5840_v59 = vpop.f32.mrb[12].mxu0 }
 0x186   : > { %7948 = vst [vmem:[#allocation28_spill] sm:$0xff] %v5840_v59  ;;  %v5842_v61 = vpop.f32.mrb[13].mxu0 }
 0x187   : > { %7949 = vst [vmem:[#allocation29_spill] sm:$0xff] %v5842_v61  ;;  %v5844_v11 = vpop.f32.mrb[14].mxu0 }
 0x188   : > { %7950 = vst [vmem:[#allocation30_spill] sm:$0xff] %v5844_v11  ;;  %v5846_v63 = vpop.f32.mrb[15].mxu0 }
 0x189   : > { %7951 = vst [vmem:[#allocation31_spill] sm:$0xff] %v5846_v63 }
 0x18d   : > { %v5848_v3 = vpop.f32.mrb[16].mxu0 }
 0x18e   : > { %v5850_v54 = vpop.f32.mrb[17].mxu0 }
 0x18f   : > { %7952 = vst [vmem:[#allocation32_spill] sm:$0xff] %v5850_v54  ;;  %v5852_v5 = vpop.f32.mrb[18].mxu0 }
 0x190   : > { %v5854_v12 = vpop.f32.mrb[19].mxu0 }
 0x191   : > { %7953 = vst [vmem:[#allocation33_spill] sm:$0xff] %v5854_v12 }
 0x192   : > { %949 = vadd.xlane.f32.xlu1 %v948_v24 }
 0x195   : > { %v5858_v57 = vpop.f32.mrb[20].mxu0 }
 0x196   : > { %7954 = vst [vmem:[#allocation34_spill] sm:$0xff] %v5858_v57  ;;  %v5860_v25 = vpop.f32.mrb[21].mxu0 }
 0x197   : > { %7955 = vst [vmem:[#allocation35_spill] sm:$0xff] %v5860_v25  ;;  %v5862_v16 = vpop.f32.mrb[22].mxu0 }
 0x198   : > { %v5866_v23 = vpop.f32.mrb[23].mxu0 }
 0x199   : > { %7956 = vst [vmem:[#allocation36_spill] sm:$0xff] %v5866_v23  ;;  %961 = vadd.xlane.f32.xlu0 %v960_v18 }
 0x19d   : > { %v5868_v33 = vpop.f32.mrb[24].mxu0 }
 0x19e   : > { %v5979_v20 = vpop.f32.mrb[25].mxu0 }
 0x19f   : > { %7960 = vst [vmem:[#allocation40_spill] sm:$0xff] %v5979_v20  ;;  %v5981_v19 = vpop.f32.mrb[26].mxu0  ;;  %v1008_v20 = vsel %vm234_vm0, %v5836_v56, 0.0 }
 0x1a0   : > { %7961 = vst [vmem:[#allocation41_spill] sm:$0xff] %v5981_v19  ;;  %v5983_v25 = vpop.f32.mrb[27].mxu0 }
 0x1a1   : > { %7962 = vst [vmem:[#allocation42_spill] sm:$0xff] %v5983_v25 }
 0x1a3   : > { %902 = vrot.lane.b32.xlu1 %v5814_v46, %s5369_s6 }
 0x1a5   : > { %v6027_v8 = vpop.f32.mrb[28].mxu0 }
 0x1a6   : > { %7966 = vst [vmem:[#allocation46_spill] sm:$0xff] %v6027_v8 }
 0x1a7   : > { %808 = vrot.lane.b32.xlu1 %v5820_v7, %s5370_s7 }
 0x1ab   : > { %904 = vrot.lane.b32.xlu1 %v5820_v7, %s5369_s6 }
 0x1af   : > { %810 = vrot.lane.b32.xlu1 %v5826_v9, %s5370_s7  ;;  %856 = vrot.lane.b32.xlu0 %v5820_v7, %s5371_s9 }
 0x1b3   : > { %906 = vrot.lane.b32.xlu1 %v5826_v9, %s5369_s6 }
 0x1b7   : > { %908 = vrot.lane.b32.xlu1 %v5832_v45, %s5369_s6 }
 0x1bb   : > { %814 = vrot.lane.b32.xlu1 %v5836_v56, %s5370_s7 }
 0x1bf   : > { %910 = vrot.lane.b32.xlu1 %v5836_v56, %s5369_s6 }
 0x1c3   : > { %912 = vrot.lane.b32.xlu1 %v5840_v59, %s5369_s6 }
 0x1c7   : > { %818 = vrot.lane.b32.xlu1 %v5844_v11, %s5370_s7 }
 0x1cb   : > { %914 = vrot.lane.b32.xlu1 %v5844_v11, %s5369_s6 }
 0x1ce   : > { %973 = vadd.xlane.f32.xlu0 %v972_v62 }
 0x1cf   : > { %916 = vrot.lane.b32.xlu1 %v5848_v3, %s5369_s6 }
 0x1d3   : > { %822 = vrot.lane.b32.xlu1 %v5852_v5, %s5370_s7 }
 0x1d7   : > { %870 = vrot.lane.b32.xlu1 %v5852_v5, %s5371_s9 }
 0x1db   : > { %824 = vrot.lane.b32.xlu1 %v5858_v57, %s5370_s7 }
 0x1df   : > { %872 = vrot.lane.b32.xlu1 %v5858_v57, %s5371_s9 }
 0x1e0   : > { %v5939_v41 = vpop.permute.xlu0 %804  ;;  %v5951_v27 = vpop.permute.xlu1 %900 }
 0x1e1   : > { %7959 = vst [vmem:[#allocation39_spill] sm:$0xff] %v5951_v27 }
 0x1e3   : > { %874 = vrot.lane.b32.xlu1 %v5862_v16, %s5371_s9 }
 0x1e4   : > { %858 = vrot.lane.b32.xlu0 %v5826_v9, %s5371_s9  ;;  %v5941_v53 = vpop.permute.xlu0 %852 }
 0x1e5   : > { %v954_v24 = vsel %vm234_vm0, %v5941_v53, 0.0 }
 0x1e7   : > { %922 = vrot.lane.b32.xlu1 %v5862_v16, %s5369_s6 }
 0x1e8   : > { %v5945_v18 = vpop.permute.xlu0 %806 }
 0x1e9   : > { %v963_v40 = vsel %vm234_vm0, %v5945_v18, 0.0 }
 0x1eb   : > { %828 = vrot.lane.b32.xlu1 %v5868_v33, %s5370_s7 }
 0x1ec   : > { %v5957_v29 = vpop.permute.xlu0 %854 }
 0x203   : > { %985 = vadd.xlane.f32.xlu0 %v984_v35 }
 0x20f   : > { %955 = vadd.xlane.f32.xlu1 %v954_v24 }
 0x213   : > { %964 = vadd.xlane.f32.xlu1 %v963_v40 }
 0x219   : > { %812 = vrot.lane.b32.xlu0 %v5832_v45, %s5370_s7 }
 0x21d   : > { %860 = vrot.lane.b32.xlu0 %v5832_v45, %s5371_s9 }
 0x21f   : > { %v5955_v28 = vpop.xlane.xlu1 %949 }
 0x223   : > { %v5959_v34 = vpop.permute.xlu1 %902 }
 0x224   : > { %v969_v62 = vsel %vm234_vm0, %v5959_v34, 0.0 }
 0x225   : > { %970 = vadd.xlane.f32.xlu1 %v969_v62 }
 0x226   : > { %v5963_v35 = vpop.xlane.xlu0 %961 }
 0x227   : > { %v5965_v24 = vpop.permute.xlu1 %808 }
 0x228   : > { %v975_v40 = vsel %vm234_vm0, %v5965_v24, 0.0 }
 0x229   : > { %976 = vadd.xlane.f32.xlu1 %v975_v40  ;;  %v996_v40 = vsel %vm234_vm0, %v5832_v45, 0.0 }
 0x22a   : > { %v5969_v1 = vpop.permute.xlu0 %856 }
 0x22b   : > { %v5971_v0 = vpop.permute.xlu1 %904  ;;  %v978_v22 = vsel %vm234_vm0, %v5969_v1, 0.0 }
 0x22c   : > { %v981_v52 = vsel %vm234_vm0, %v5971_v0, 0.0 }
 0x22d   : > { %979 = vadd.xlane.f32.xlu1 %v978_v22 }
 0x22f   : > { %v5975_v21 = vpop.permute.xlu1 %810 }
 0x230   : > { %v987_v62 = vsel %vm234_vm0, %v5975_v21, 0.0 }
 0x231   : > { %988 = vadd.xlane.f32.xlu1 %v987_v62 }
 0x23c   : > { %997 = vadd.xlane.f32.xlu0 %v996_v40  ;;  %v6001_v40 = vpop.permute.xlu1 %906 }
 0x23d   : > { %7963 = vst [vmem:[#allocation43_spill] sm:$0xff] %v6001_v40 }
 0x240   : > { %v6007_v54 = vpop.permute.xlu1 %908 }
 0x241   : > { %7964 = vst [vmem:[#allocation44_spill] sm:$0xff] %v6007_v54 }
 0x244   : > { %v6017_v12 = vpop.permute.xlu1 %814 }
 0x245   : > { %v1011_v61 = vsel %vm234_vm0, %v6017_v12, 0.0 }
 0x252   : > { %862 = vrot.lane.b32.xlu0 %v5836_v56, %s5371_s9 }
 0x25b   : > { %v5989_v22 = vpop.xlane.xlu0 %973 }
 0x25f   : > { %v5991_v23 = vpop.permute.xlu0 %858 }
 0x260   : > { %v990_v62 = vsel %vm234_vm0, %v5991_v23, 0.0 }
 0x261   : > { %991 = vadd.xlane.f32.xlu1 %v990_v62 }
 0x271   : > { %1009 = vadd.xlane.f32.xlu0 %v1008_v20 }
 0x287   : > { %816 = vrot.lane.b32.xlu0 %v5840_v59, %s5370_s7 }
 0x28b   : > { %864 = vrot.lane.b32.xlu0 %v5840_v59, %s5371_s9 }
 0x28f   : > { %866 = vrot.lane.b32.xlu0 %v5844_v11, %s5371_s9 }
 0x290   : > { %v6005_v25 = vpop.xlane.xlu0 %985 }
 0x293   : > { %820 = vrot.lane.b32.xlu0 %v5848_v3, %s5370_s7 }
 0x294   : > { %v6011_v62 = vpop.permute.xlu0 %812 }
 0x295   : > { %7965 = vst [vmem:[#allocation45_spill] sm:$0xff] %v6011_v62  ;;  %v999_v20 = vsel %vm234_vm0, %v6011_v62, 0.0 }
 0x296   : > { %1000 = vadd.xlane.f32.xlu1 %v999_v20  ;;  %v951_v20 = vsel %vm234_vm0, %v5939_v41, 0.0 }
 0x297   : > { %868 = vrot.lane.b32.xlu0 %v5848_v3, %s5371_s9 }
 0x298   : > { %v6021_v63 = vpop.permute.xlu0 %860 }
 0x299   : > { %v1002_v55 = vsel %vm234_vm0, %v6021_v63, 0.0 }
 0x29a   : > { %1012 = vadd.xlane.f32.xlu1 %v1011_v61  ;;  %v957_v61 = vsel %vm234_vm0, %v5951_v27, 0.0 }
 0x29b   : > { %918 = vrot.lane.b32.xlu0 %v5852_v5, %s5369_s6 }
 0x29e   : > { %1003 = vadd.xlane.f32.xlu1 %v1002_v55  ;;  %v966_v55 = vsel %vm234_vm0, %v5957_v29, 0.0 }
 0x29f   : > { %920 = vrot.lane.b32.xlu0 %v5858_v57, %s5369_s6 }
 0x2a3   : > { %826 = vrot.lane.b32.xlu0 %v5862_v16, %s5370_s7 }
 0x2c2   : > { %952 = vadd.xlane.f32.xlu0 %v951_v20  ;;  %v993_v20 = vsel %vm234_vm0, %v6001_v40, 0.0 }
 0x2c6   : > { %958 = vadd.xlane.f32.xlu0 %v957_v61  ;;  %v6049_v61 = vpop.f32.mrb[29].mxu0 }
 0x2c7   : > { %7967 = vst [vmem:[#allocation47_spill] sm:$0xff] %v6049_v61  ;;  %v6051_v14 = vpop.f32.mrb[30].mxu0 }
 0x2c8   : > { %7968 = vst [vmem:[#allocation48_spill] sm:$0xff] %v6051_v14  ;;  %v6053_v15 = vpop.f32.mrb[31].mxu0 }
 0x2c9   : > { %v6037_v48 = vpop.xlane.xlu0 %997  ;;  %7969 = vst [vmem:[#allocation49_spill] sm:$0xff] %v6053_v15 }
 0x2ca   : > { %967 = vadd.xlane.f32.xlu0 %v966_v55  ;;  %v1005_v55 = vsel %vm234_vm0, %v6007_v54, 0.0 }
 0x2cd   : > { %v6041_v47 = vpop.permute.xlu0 %862 }
 0x2ce   : > { %982 = vadd.xlane.f32.xlu0 %v981_v52  ;;  %v1014_v2 = vsel %vm234_vm0, %v6041_v47, 0.0 }
 0x2cf   : > { %1015 = vadd.xlane.f32.xlu1 %v1014_v2  ;;  %v6063_v2 = vpop.permute.xlu1 %910 }
 0x2d0   : > { %7970 = vst [vmem:[#allocation50_spill] sm:$0xff] %v6063_v2  ;;  %v1017_v15 = vsel %vm234_vm0, %v6063_v2, 0.0 }
 0x2d2   : > { %994 = vadd.xlane.f32.xlu0 %v993_v20 }
 0x2d3   : > { %v6069_v20 = vpop.permute.xlu1 %912 }
 0x2d4   : > { %v1029_v40 = vsel %vm234_vm0, %v6069_v20, 0.0 }
 0x2d7   : > { %v6077_v43 = vpop.permute.xlu1 %818 }
 0x2d8   : > { %7973 = vst [vmem:[#allocation53_spill] sm:$0xff] %v6077_v43  ;;  %v1035_v56 = vsel %vm234_vm0, %v6077_v43, 0.0 }
 0x2e0   : > { %876 = vrot.lane.b32.xlu1 %v5868_v33, %s5371_s9 }
 0x2e4   : > { %878 = vrot.lane.b32.xlu1 %v5981_v19, %s5371_s9 }
 0x2e8   : > { %830 = vrot.lane.b32.xlu0 %v5981_v19, %s5370_s7  ;;  %926 = vrot.lane.b32.xlu1 %v5981_v19, %s5369_s6  ;;  %v408_v19 = vsel %vm234_vm0, %v5748_v17, 0.0 }
 0x2fe   : > { %v6065_v52 = vpop.xlane.xlu0 %1009 }
 0x2ff   : > { %7971 = vst [vmem:[#allocation51_spill] sm:$0xff] %v6065_v52 }
 0x302   : > { %v6071_v61 = vpop.permute.xlu0 %816 }
 0x303   : > { %7972 = vst [vmem:[#allocation52_spill] sm:$0xff] %v6071_v61  ;;  %v1023_v39 = vsel %vm234_vm0, %v6071_v61, 0.0  ;;  %v1032_v61 = vsel %vm234_vm0, %v5844_v11, 0.0 }
 0x307   : > { %1006 = vadd.xlane.f32.xlu0 %v1005_v55  ;;  %v6085_v55 = vpop.permute.xlu0 %864 }
 0x308   : > { %7974 = vst [vmem:[#allocation54_spill] sm:$0xff] %v6085_v55  ;;  %v1026_v43 = vsel %vm234_vm0, %v6085_v55, 0.0 }
 0x30b   : > { %1018 = vadd.xlane.f32.xlu0 %v1017_v15  ;;  %v1020_v15 = vsel %vm234_vm0, %v5840_v59, 0.0 }
 0x30c   : > { %1024 = vadd.xlane.f32.xlu1 %v1023_v39  ;;  %v402_v39 = vsel %vm234_vm0, %v5730_v26, 0.0 }
 0x310   : > { %1036 = vadd.xlane.f32.xlu1 %v1035_v56  ;;  %v6093_v56 = vpop.permute.xlu0 %866 }
 0x311   : > { %7975 = vst [vmem:[#allocation55_spill] sm:$0xff] %v6093_v56  ;;  %v1038_v2 = vsel %vm234_vm0, %v6093_v56, 0.0 }
 0x314   : > { %v6105_v26 = vpop.permute.xlu0 %820 }
 0x315   : > { %7977 = vst [vmem:[#allocation57_spill] sm:$0xff] %v6105_v26  ;;  %v1047_v11 = vsel %vm234_vm0, %v6105_v26, 0.0 }
 0x321   : > { %924 = vrot.lane.b32.xlu0 %v5868_v33, %s5369_s6  ;;  %832 = vrot.lane.b32.xlu1 %v6027_v8, %s5370_s7 }
 0x340   : > { %1021 = vadd.xlane.f32.xlu0 %v1020_v15  ;;  %v405_v15 = vsel %vm234_vm0, %v5733_v51, 0.0 }
 0x344   : > { %403 = vadd.xlane.f32.xlu0 %v402_v39  ;;  %v6103_v39 = vpop.permute.xlu1 %914 }
 0x345   : > { %1027 = vadd.xlane.f32.xlu1 %v1026_v43  ;;  %7976 = vst [vmem:[#allocation56_spill] sm:$0xff] %v6103_v39  ;;  %v1041_v44 = vsel %vm234_vm0, %v6103_v39, 0.0 }
 0x348   : > { %1033 = vadd.xlane.f32.xlu0 %v1032_v61  ;;  %v6109_v43 = vpop.permute.xlu1 %916  ;;  %v6115_v61 = vpop.permute.xlu0 %868 }
 0x349   : > { %1039 = vadd.xlane.f32.xlu1 %v1038_v2  ;;  %7978 = vst [vmem:[#allocation58_spill] sm:$0xff] %v6115_v61  ;;  %v1050_v26 = vsel %vm234_vm0, %v6115_v61, 0.0 }
 0x34c   : > { %406 = vadd.xlane.f32.xlu0 %v405_v15  ;;  %v6117_v2 = vpop.permute.xlu1 %822  ;;  %v6119_v15 = vpop.permute.xlu0 %918 }
 0x350   : > { %v6121_v51 = vpop.permute.xlu1 %870  ;;  %v6123_v54 = vpop.permute.xlu0 %920 }
 0x351   : > { %7979 = vst [vmem:[#allocation59_spill] sm:$0xff] %v6121_v51 }
 0x354   : > { %v6125_v52 = vpop.permute.xlu1 %824  ;;  %v6127_v56 = vpop.permute.xlu0 %826 }
 0x358   : > { %v6129_v62 = vpop.permute.xlu1 %872  ;;  %v953_v49 = vpop.xlane.xlu0 %952 }
 0x35a   : > { %880 = vrot.lane.b32.xlu1 %v6027_v8, %s5371_s9 }
 0x35c   : > { %v6131_v55 = vpop.permute.xlu1 %874 }
 0x35e   : > { %882 = vrot.lane.b32.xlu1 %v6051_v14, %s5371_s9 }
 0x360   : > { %v6141_v32 = vpop.permute.xlu1 %922 }
 0x362   : > { %834 = vrot.lane.b32.xlu0 %v6051_v14, %s5370_s7  ;;  %930 = vrot.lane.b32.xlu1 %v6051_v14, %s5369_s6  ;;  %v6133_v14 = vpop.xlane.xlu0 %958 }
 0x363   : > { %7980 = vst [vmem:[#allocation60_spill] sm:$0xff] %v6133_v14 }
 0x364   : > { %v6145_v14 = vpop.permute.xlu1 %828 }
 0x366   : > { %v968_v27 = vpop.xlane.xlu0 %967 }
 0x367   : > { %v1146_v59 = vmul.f32 0.03125, %v968_v27 }
 0x368   : > { %v6156_v39 = vpop.xlane.xlu1 %955 }
 0x381   : > { %1030 = vadd.xlane.f32.xlu0 %v1029_v40  ;;  %v6148_v40 = vsub.f32 %v5957_v29, %v1146_v59  ;;  %v965_v59 = vpop.xlane.xlu1 %964 }
 0x383   : > { %7981 = vst [vmem:[#allocation61_spill] sm:$0xff] %v6148_v40 }
 0x385   : > { %1042 = vadd.xlane.f32.xlu0 %v1041_v44  ;;  %v1059_v44 = vsel %vm234_vm0, %v6117_v2, 0.0 }
 0x386   : > { %1048 = vadd.xlane.f32.xlu1 %v1047_v11  ;;  %v1274_v11 = vmul.f32 %v6148_v40, %v6148_v40  ;;  %v971_v40 = vpop.xlane.xlu1 %970 }
 0x388   : > { %v1350_v27 = vsel %vm234_vm0, %v1274_v11, 0.0 }
 0x38a   : > { %409 = vadd.xlane.f32.xlu1 %v408_v19  ;;  %v1148_v19 = vmul.f32 0.03125, %v5989_v22 }
 0x38c   : > { %v6161_v29 = vsub.f32 %v5820_v7, %v1148_v19  ;;  %v414_v7 = vsel %vm234_vm0, %v5764_v60, 0.0  ;;  %v983_v19 = vpop.xlane.xlu0 %982  ;;  %v1141_v60 = vmul.f32 0.03125, %v953_v49  ;;  %v1044_v49 = vsel %vm234_vm0, %v5848_v3, 0.0 }
 0x38e   : > { %1060 = vadd.xlane.f32.xlu1 %v1059_v44  ;;  %7982 = vst [vmem:[#allocation62_spill] sm:$0xff] %v6161_v29  ;;  %v1062_v44 = vsel %vm234_vm0, %v6121_v51, 0.0  ;;  %v1276_v22 = vmul.f32 %v6161_v29, %v6161_v29  ;;  %v1151_v51 = vmul.f32 0.03125, %v983_v19 }
 0x390   : > { %v1356_v11 = vsel %vm234_vm0, %v1276_v22, 0.0  ;;  %v6183_v22 = vsub.f32 %v5971_v0, %v1151_v51  ;;  %v6194_v0 = vsub.f32 %v5939_v41, %v1141_v60  ;;  %v441_v41 = vmul.f32 0.03125, %v5931_v37 }
 0x392   : > { %1051 = vadd.xlane.f32.xlu1 %v1050_v26  ;;  %v1068_v26 = vsel %vm234_vm0, %v5858_v57, 0.0  ;;  %v1080_v57 = vsel %vm234_vm0, %v5862_v16, 0.0  ;;  %v1279_v19 = vmul.f32 %v6183_v22, %v6183_v22  ;;  %7983 = vst [vmem:[#allocation63_spill] sm:$0xff] %v6194_v0  ;;  %v1269_v60 = vmul.f32 %v6194_v0, %v6194_v0 }
 0x394   : > { %v1365_v51 = vsel %vm234_vm0, %v1279_v19, 0.0 }
 0x396   : > { %1351 = vadd.xlane.f32.xlu1 %v1350_v27  ;;  %v6172_v27 = vpop.xlane.xlu1 %976 }
 0x39a   : > { %1063 = vadd.xlane.f32.xlu1 %v1062_v44  ;;  %v6176_v44 = vpop.xlane.xlu1 %979 }
 0x39b   : > { %928 = vrot.lane.b32.xlu0 %v6027_v8, %s5369_s6  ;;  %s5301_s6 = sshll.u32 %s5375_s5, 4  ;;  %s5302_s6 = int_to_ptr.vmem [resolvable:$false] %s5301_s6 }
 0x39c   : > { %s5303_s7 = scalar_lea.vmem %s5302_s6, 4096  ;;  %p5304_p8 = scmp.lt.s32.totalorder %s7778_s12, %s5302_s6 }
 0x39d   : > { %p5305_p10 = scmp.lt.s32.totalorder %s5303_s7, %s5297_s30 }
 0x39e   : > { %1069 = vadd.xlane.f32.xlu1 %v1068_v26  ;;  %v417_v26 = vsel %vm234_vm0, %v5767_v6, 0.0  ;;  %v989_v29 = vpop.xlane.xlu1 %988  ;;  %v1145_v6 = vmul.f32 0.03125, %v965_v59  ;;  %v1089_v59 = vsel %vm234_vm0, %v6141_v32, 0.0 }
 0x39f   : > { %p5306_p0 = por %p5305_p10, %p5304_p8 }
 0x3a1   : > { %p5307_p2 = pnand %p5306_p0, %p5300_p13 }
 0x3a2   : > { %1357 = vadd.xlane.f32.xlu1 %v1356_v11  ;;  %v1144_v11 = vmul.f32 0.03125, %v5963_v35  ;;  %v992_v61 = vpop.xlane.xlu1 %991 }
 0x3a6   : > { %415 = vadd.xlane.f32.xlu1 %v414_v7  ;;  %v1077_v7 = vsel %vm234_vm0, %v6123_v54, 0.0 }
 0x3aa   : > { %1081 = vadd.xlane.f32.xlu1 %v1080_v57  ;;  %v6191_v57 = vsub.f32 %v5814_v46, %v1144_v11  ;;  %v1153_v46 = vmul.f32 0.03125, %v989_v29  ;;  %v6221_v29 = vsub.f32 %v5708_v10, %v441_v41  ;;  %v1142_v10 = vmul.f32 0.03125, %v6156_v39 }
 0x3ab   : > { %v1056_v41 = vsel %vm234_vm0, %v5852_v5, 0.0 }
 0x3ac   : > { %v1272_v35 = vmul.f32 %v6191_v57, %v6191_v57  ;;  %v6214_v19 = vsub.f32 %v5975_v21, %v1153_v46  ;;  %7985 = vst [vmem:[#allocation65_spill] sm:$0xff] %v6221_v29  ;;  %v1095_v21 = vsel %vm234_vm0, %v6145_v14, 0.0 }
 0x3ae   : > { %418 = vadd.xlane.f32.xlu1 %v417_v26  ;;  %v6197_v26 = vpop.xlane.xlu1 %1000  ;;  %7984 = vst [vmem:[#allocation64_spill] sm:$0xff] %v6214_v19 }
 0x3b2   : > { %1078 = vadd.xlane.f32.xlu1 %v1077_v7  ;;  %v6204_v7 = vsub.f32 %v5945_v18, %v1145_v6  ;;  %v6211_v11 = vpop.xlane.xlu1 %1012  ;;  %v1335_v6 = vsel %vm234_vm0, %v1269_v60, 0.0  ;;  %v1147_v60 = vmul.f32 0.03125, %v971_v40 }
 0x3b4   : > { %v1273_v18 = vmul.f32 %v6204_v7, %v6204_v7  ;;  %v6248_v39 = vsub.f32 %v5959_v34, %v1147_v60 }
 0x3b6   : > { %1366 = vadd.xlane.f32.xlu1 %v1365_v51  ;;  %v1344_v51 = vsel %vm234_vm0, %v1272_v35, 0.0  ;;  %v1347_v37 = vsel %vm234_vm0, %v1273_v18, 0.0  ;;  %v1281_v35 = vmul.f32 %v6214_v19, %v6214_v19  ;;  %v6230_v46 = vpop.xlane.xlu1 %1003 }
 0x3ba   : > { %1045 = vadd.xlane.f32.xlu0 %v1044_v49  ;;  %1090 = vadd.xlane.f32.xlu1 %v1089_v59  ;;  %v6223_v49 = vpop.xlane.xlu0 %994  ;;  %v473_v59 = vmul.f32 %v6221_v29, %v6221_v29  ;;  %v440_v29 = vmul.f32 0.03125, %v5927_v4 }
 0x3bc   : > { %v493_v40 = vsel %vm234_vm0, %v473_v59, 0.0  ;;  %v1149_v59 = vmul.f32 0.03125, %v6172_v27  ;;  %v1156_v27 = vmul.f32 0.03125, %v6037_v48  ;;  %v6287_v4 = vsub.f32 %v5700_v13, %v440_v29 }
 0x3be   : > { %1345 = vadd.xlane.f32.xlu0 %v1344_v51  ;;  %1336 = vadd.xlane.f32.xlu1 %v1335_v6  ;;  %v1371_v51 = vsel %vm234_vm0, %v1281_v35, 0.0  ;;  %v6238_v6 = vpop.xlane.xlu1 %1015  ;;  %v6240_v18 = vpop.permute.xlu0 %830  ;;  %v6293_v48 = vsub.f32 %v5832_v45, %v1156_v27  ;;  %v472_v27 = vmul.f32 %v6287_v4, %v6287_v4 }
 0x3bf   : > { %v1107_v0 = vsel %vm234_vm0, %v6240_v18, 0.0 }
 0x3c0   : > { %7989 = vst [vmem:[#allocation69_spill] sm:$0xff] %v6293_v48 }
 0x3c2   : > { %1348 = vadd.xlane.f32.xlu0 %v1347_v37  ;;  %1096 = vadd.xlane.f32.xlu1 %v1095_v21  ;;  %v411_v37 = vsel %vm234_vm0, %v5751_v31, 0.0  ;;  %v6245_v21 = vsub.f32 %v5941_v53, %v1142_v10  ;;  %v6251_v19 = vpop.xlane.xlu0 %1006  ;;  %v6253_v35 = vpop.permute.xlu1 %876  ;;  %v1275_v53 = vmul.f32 %v6248_v39, %v6248_v39 }
 0x3c4   : > { %7986 = vst [vmem:[#allocation66_spill] sm:$0xff] %v6245_v21  ;;  %v1270_v34 = vmul.f32 %v6245_v21, %v6245_v21  ;;  %v8036_v21 = vld [vmem:[#allocation15_spill] sm:$0xff] }
 0x3c6   : > { %1057 = vadd.xlane.f32.xlu0 %v1056_v41  ;;  %1372 = vadd.xlane.f32.xlu1 %v1371_v51  ;;  %v1053_v41 = vsel %vm234_vm0, %v6109_v43, 0.0  ;;  %v1154_v51 = vmul.f32 0.03125, %v992_v61  ;;  %v6264_v10 = vpop.xlane.xlu0 %1018  ;;  %v1353_v61 = vsel %vm234_vm0, %v1275_v53, 0.0 }
 0x3c8   : > { %v6267_v60 = vsub.f32 %v5991_v23, %v1154_v51  ;;  %v1098_v23 = vsel %vm234_vm0, %v6253_v35, 0.0 }
 0x3ca   : > { %412 = vadd.xlane.f32.xlu0 %v411_v37  ;;  %494 = vadd.xlane.f32.xlu1 %v493_v40  ;;  %7987 = vst [vmem:[#allocation67_spill] sm:$0xff] %v6267_v60  ;;  %v1338_v37 = vsel %vm234_vm0, %v1270_v34, 0.0  ;;  %v6271_v40 = vpop.permute.xlu1 %878  ;;  %v1282_v51 = vmul.f32 %v6267_v60, %v6267_v60  ;;  %v6284_v53 = vpop.permute.xlu0 %924 }
 0x3cb   : > { %v1110_v29 = vsel %vm234_vm0, %v6271_v40, 0.0 }
 0x3ce   : > { %1054 = vadd.xlane.f32.xlu0 %v1053_v41  ;;  %1108 = vadd.xlane.f32.xlu1 %v1107_v0  ;;  %v6275_v41 = vsub.f32 %v5965_v24, %v1149_v59  ;;  %v1065_v0 = vsel %vm234_vm0, %v6119_v15, 0.0  ;;  %v439_v24 = vmul.f32 0.03125, %v5933_v38  ;;  %v6290_v34 = vpop.permute.xlu1 %926  ;;  %v1071_v59 = vsel %vm234_vm0, %v6125_v52, 0.0 }
 0x3cf   : > { %7988 = vst [vmem:[#allocation68_spill] sm:$0xff] %v6290_v34 }
 0x3d0   : > { %v6303_v13 = vsub.f32 %v5697_v42, %v439_v24  ;;  %v1150_v24 = vmul.f32 0.03125, %v6176_v44  ;;  %v1083_v44 = vsel %vm234_vm0, %v6127_v56, 0.0 }
 0x3d2   : > { %1354 = vadd.xlane.f32.xlu0 %v1353_v61  ;;  %1339 = vadd.xlane.f32.xlu1 %v1338_v37  ;;  %v1374_v61 = vsel %vm234_vm0, %v1282_v51, 0.0  ;;  %v1277_v37 = vmul.f32 %v6275_v41, %v6275_v41  ;;  %7990 = vst [vmem:[#allocation70_spill] sm:$0xff] %v6303_v13  ;;  %v6305_v38 = vpop.xlane.xlu1 %1024  ;;  %v471_v42 = vmul.f32 %v6303_v13, %v6303_v13 }
 0x3d4   : > { %v1359_v45 = vsel %vm234_vm0, %v1277_v37, 0.0 }
 0x3d6   : > { %1066 = vadd.xlane.f32.xlu0 %v1065_v0  ;;  %1099 = vadd.xlane.f32.xlu1 %v1098_v23  ;;  %v6300_v0 = vpop.xlane.xlu0 %1021  ;;  %v1284_v23 = vmul.f32 %v6293_v48, %v6293_v48  ;;  %v6322_v60 = vpop.xlane.xlu1 %1036  ;;  %v6327_v48 = vsub.f32 %v5969_v1, %v1150_v24  ;;  %v1140_v1 = vmul.f32 0.03125, %v5955_v28  ;;  %v1158_v28 = vmul.f32 0.03125, %v6230_v46 }
 0x3d7   : > { %v1086_v46 = vsel %vm234_vm0, %v6131_v55, 0.0 }
 0x3d8   : > { %v1380_v37 = vsel %vm234_vm0, %v1284_v23, 0.0  ;;  %v7887_v23 = vmov 0.0   ;;  %v1278_v24 = vmul.f32 %v6327_v48, %v6327_v48 }
 0x3d9   : > { %4650 = vmatprep.subr.bf16.mxu1 %v7887_v23  ;;  %4642 = vmatprep.subr.bf16.mxu0 %v7887_v23  ;;  %v7999_v23 = vld [vmem:[#allocation28_spill] sm:$0xff] }
 0x3da   : > { %1072 = vadd.xlane.f32.xlu0 %v1071_v59  ;;  %1375 = vadd.xlane.f32.xlu1 %v1374_v61  ;;  %v6314_v51 = vpop.xlane.xlu0 %403  ;;  %v1161_v59 = vmul.f32 0.03125, %v6211_v11  ;;  %v490_v61 = vsel %vm234_vm0, %v472_v27, 0.0  ;;  %v6334_v11 = vpop.permute.xlu1 %832 }
 0x3db   : > { %7992 = vst [vmem:[#allocation72_spill] sm:$0xff] %v6334_v11 }
 0x3dc   : > { %v6330_v13 = vsub.f32 %v6017_v12, %v1161_v59  ;;  %v1074_v12 = vsel %vm234_vm0, %v6129_v62, 0.0 }
 0x3de   : > { %1360 = vadd.xlane.f32.xlu0 %v1359_v45  ;;  %1111 = vadd.xlane.f32.xlu1 %v1110_v29  ;;  %v442_v45 = vmul.f32 0.03125, %v5935_v36  ;;  %v487_v29 = vsel %vm234_vm0, %v471_v42, 0.0  ;;  %7991 = vst [vmem:[#allocation71_spill] sm:$0xff] %v6330_v13  ;;  %v1034_v27 = vpop.xlane.xlu0 %1033  ;;  %v1119_v42 = vsel %vm234_vm0, %v6334_v11, 0.0  ;;  %v1289_v59 = vmul.f32 %v6330_v13, %v6330_v13  ;;  %v8033_v11 = vld [vmem:[#allocation14_spill] sm:$0xff] }
 0x3e0   : > { %v6339_v36 = vsub.f32 %v5711_v50, %v442_v45  ;;  %v1395_v45 = vsel %vm234_vm0, %v1289_v59, 0.0 }
 0x3e2   : > { %491 = vadd.xlane.f32.xlu0 %v490_v61  ;;  %1381 = vadd.xlane.f32.xlu1 %v1380_v37  ;;  %7993 = vst [vmem:[#allocation73_spill] sm:$0xff] %v6339_v36  ;;  %v6351_v61 = vsub.f32 %v5806_v58, %v1140_v1  ;;  %v6353_v50 = vpop.xlane.xlu0 %406  ;;  %v1362_v37 = vsel %vm234_vm0, %v1278_v24, 0.0  ;;  %v1152_v58 = vmul.f32 0.03125, %v6005_v25  ;;  %v6364_v1 = vsub.f32 %v6021_v63, %v1158_v28 }
 0x3e3   : > { %v1162_v25 = vmul.f32 0.03125, %v6238_v6 }
 0x3e4   : > { %7994 = vst [vmem:[#allocation74_spill] sm:$0xff] %v6364_v1  ;;  %v1286_v28 = vmul.f32 %v6364_v1, %v6364_v1 }
 0x3e6   : > { %1084 = vadd.xlane.f32.xlu0 %v1083_v44  ;;  %488 = vadd.xlane.f32.xlu1 %v487_v29  ;;  %v474_v29 = vmul.f32 %v6339_v36, %v6339_v36  ;;  %v1028_v44 = vpop.xlane.xlu1 %1027  ;;  %v6369_v24 = vpop.permute.xlu0 %834 }
 0x3e7   : > { %7995 = vst [vmem:[#allocation75_spill] sm:$0xff] %v6369_v24  ;;  %v1131_v63 = vsel %vm234_vm0, %v6369_v24, 0.0 }
 0x3ea   : > { %1075 = vadd.xlane.f32.xlu0 %v1074_v12  ;;  %1120 = vadd.xlane.f32.xlu1 %v1119_v42  ;;  %v1268_v12 = vmul.f32 %v6351_v61, %v6351_v61  ;;  %v496_v42 = vsel %vm234_vm0, %v474_v29, 0.0  ;;  %v1040_v59 = vpop.xlane.xlu1 %1039  ;;  %v6381_v29 = vsub.f32 %v6041_v47, %v1162_v25  ;;  %v420_v25 = vsel %vm234_vm0, %v5780_v30, 0.0 }
 0x3ec   : > { %7996 = vst [vmem:[#allocation76_spill] sm:$0xff] %v6381_v29 }
 0x3ee   : > { %1363 = vadd.xlane.f32.xlu0 %v1362_v37  ;;  %1396 = vadd.xlane.f32.xlu1 %v1395_v45  ;;  %v1332_v37 = vsel %vm234_vm0, %v1268_v12, 0.0  ;;  %v6373_v45 = vsub.f32 %v5826_v9, %v1152_v58  ;;  %v1386_v12 = vsel %vm234_vm0, %v1286_v28, 0.0  ;;  %v6388_v6 = vpop.permute.xlu1 %880  ;;  %v1164_v58 = vmul.f32 0.03125, %v6300_v0 }
 0x3ef   : > { %7997 = vst [vmem:[#allocation77_spill] sm:$0xff] %v6388_v6  ;;  %v1122_v47 = vsel %vm234_vm0, %v6388_v6, 0.0  ;;  %v1166_v6 = vmul.f32 0.03125, %v1028_v44  ;;  %v1101_v44 = vsel %vm234_vm0, %v6284_v53, 0.0 }
 0x3f0   : > { %v1280_v9 = vmul.f32 %v6373_v45, %v6373_v45 }
 0x3f2   : > { %1087 = vadd.xlane.f32.xlu0 %v1086_v46  ;;  %497 = vadd.xlane.f32.xlu1 %v496_v42  ;;  %v1092_v46 = vsel %vm234_vm0, %v5868_v33, 0.0  ;;  %v1368_v42 = vsel %vm234_vm0, %v1280_v9, 0.0  ;;  %v8002_v9 = vld [vmem:[#allocation41_spill] sm:$0xff] }
 0x3f3   : > { %v1104_v1 = vsel %vm234_vm0, %v8002_v9, 0.0 }
 0x3f6   : > { %1333 = vadd.xlane.f32.xlu0 %v1332_v37  ;;  %1132 = vadd.xlane.f32.xlu1 %v1131_v63  ;;  %v1290_v37 = vmul.f32 %v6381_v29, %v6381_v29  ;;  %v7998_v63 = vld [vmem:[#allocation60_spill] sm:$0xff]  ;;  %v8003_v29 = vld [vmem:[#allocation39_spill] sm:$0xff] }
 0x3f7   : > { %v1143_v28 = vmul.f32 0.03125, %v7998_v63 }
 0x3f8   : > { %v1398_v0 = vsel %vm234_vm0, %v1290_v37, 0.0  ;;  %v8006_v37 = vld [vmem:[#allocation18_spill] sm:$0xff] }
 0x3fa   : > { %1093 = vadd.xlane.f32.xlu0 %v1092_v46  ;;  %1387 = vadd.xlane.f32.xlu1 %v1386_v12  ;;  %v6400_v46 = vsub.f32 %v7999_v23, %v1164_v58  ;;  %v6403_v12 = vpop.permute.xlu1 %882  ;;  %v8005_v58 = vmov 0.0  }
 0x3fb   : > { %8001 = vst [vmem:[#allocation28_spill] sm:$0xff] %v6403_v12  ;;  %v1134_v13 = vsel %vm234_vm0, %v6403_v12, 0.0  ;;  %4654 = vmatprep.mubr.msk.bf16.mxu1 %vm5373_vm1, %v8005_v58  ;;  %4646 = vmatprep.mubr.msk.bf16.mxu0 %vm5373_vm1, %v8005_v58 }
 0x3fc   : > { %8000 = vst [vmem:[#allocation60_spill] sm:$0xff] %v6400_v46  ;;  %v1292_v23 = vmul.f32 %v6400_v46, %v6400_v46  ;;  %v8009_v46 = vld [vmem:[#allocation37_spill] sm:$0xff] }
 0x3fd   : > { %v432_v12 = vsel %vm234_vm0, %v8009_v46, 0.0  ;;  %v8018_v46 = vld [vmem:[#allocation55_spill] sm:$0xff] }
 0x3fe   : > { %1369 = vadd.xlane.f32.xlu0 %v1368_v42  ;;  %1123 = vadd.xlane.f32.xlu1 %v1122_v47  ;;  %v6408_v42 = vsub.f32 %v8003_v29, %v1143_v28  ;;  %v1168_v47 = vmul.f32 0.03125, %v1034_v27  ;;  %v423_v29 = vsel %vm234_vm0, %v8006_v37, 0.0  ;;  %v1155_v27 = vmul.f32 0.03125, %v6223_v49 }
 0x3ff   : > { %v1404_v28 = vsel %vm234_vm0, %v1292_v23, 0.0  ;;  %v1157_v23 = vmul.f32 0.03125, %v6197_v26  ;;  %v8016_v26 = vld [vmem:[#allocation45_spill] sm:$0xff] }
 0x400   : > { %8004 = vst [vmem:[#allocation41_spill] sm:$0xff] %v6408_v42 }
 0x402   : > { %421 = vadd.xlane.f32.xlu0 %v420_v25  ;;  %1399 = vadd.xlane.f32.xlu1 %v1398_v0  ;;  %v8007_v25 = vld [vmem:[#allocation30_spill] sm:$0xff]  ;;  %v1271_v0 = vmul.f32 %v6408_v42, %v6408_v42 }
 0x403   : > { %v6422_v63 = vsub.f32 %v8007_v25, %v1168_v47  ;;  %v6435_v47 = vpop.permute.xlu1 %930  ;;  %v8013_v25 = vld [vmem:[#allocation54_spill] sm:$0xff] }
 0x404   : > { %v1341_v24 = vsel %vm234_vm0, %v1271_v0, 0.0  ;;  %8012 = vst [vmem:[#allocation30_spill] sm:$0xff] %v6435_v47 }
 0x405   : > { %8008 = vst [vmem:[#allocation39_spill] sm:$0xff] %v6422_v63  ;;  %v1296_v49 = vmul.f32 %v6422_v63, %v6422_v63  ;;  %v6451_v63 = vsub.f32 %v8016_v26, %v1157_v23 }
 0x406   : > { %1105 = vadd.xlane.f32.xlu0 %v1104_v1  ;;  %1135 = vadd.xlane.f32.xlu1 %v1134_v13  ;;  %v8010_v1 = vld [vmem:[#allocation43_spill] sm:$0xff] }
 0x407   : > { %v6430_v13 = vsub.f32 %v8010_v1, %v1155_v27  ;;  %v1170_v27 = vmul.f32 0.03125, %v1040_v59  ;;  %v1416_v0 = vsel %vm234_vm0, %v1296_v49, 0.0  ;;  %8017 = vst [vmem:[#allocation54_spill] sm:$0xff] %v6451_v63  ;;  %v1285_v23 = vmul.f32 %v6451_v63, %v6451_v63 }
 0x409   : > { %8011 = vst [vmem:[#allocation18_spill] sm:$0xff] %v6430_v13  ;;  %v6454_v36 = vsub.f32 %v8018_v46, %v1170_v27  ;;  %v8021_v27 = vld [vmem:[#allocation26_spill] sm:$0xff]  ;;  %v1383_v26 = vsel %vm234_vm0, %v1285_v23, 0.0  ;;  %v8023_v23 = vld [vmem:[#allocation19_spill] sm:$0xff] }
 0x40a   : > { %424 = vadd.xlane.f32.xlu0 %v423_v29  ;;  %1405 = vadd.xlane.f32.xlu1 %v1404_v28  ;;  %v1283_v29 = vmul.f32 %v6430_v13, %v6430_v13  ;;  %v6441_v28 = vsub.f32 %v8013_v25, %v1166_v6  ;;  %v8020_v25 = vld [vmem:[#allocation51_spill] sm:$0xff] }
 0x40b   : > { %8019 = vst [vmem:[#allocation45_spill] sm:$0xff] %v6454_v36  ;;  %v1298_v46 = vmul.f32 %v6454_v36, %v6454_v36 }
 0x40c   : > { %8014 = vst [vmem:[#allocation43_spill] sm:$0xff] %v6441_v28  ;;  %v1377_v59 = vsel %vm234_vm0, %v1283_v29, 0.0  ;;  %v1294_v6 = vmul.f32 %v6441_v28, %v6441_v28  ;;  %v8024_v28 = vld [vmem:[#allocation44_spill] sm:$0xff] }
 0x40e   : > { %1342 = vadd.xlane.f32.xlu0 %v1341_v24  ;;  %433 = vadd.xlane.f32.xlu1 %v432_v12  ;;  %v8015_v12 = vld [vmem:[#allocation38_spill] sm:$0xff] }
 0x40f   : > { %v435_v1 = vsel %vm234_vm0, %v8015_v12, 0.0  ;;  %v1410_v12 = vsel %vm234_vm0, %v1294_v6, 0.0 }
 0x412   : > { %1102 = vadd.xlane.f32.xlu0 %v1101_v44  ;;  %1417 = vadd.xlane.f32.xlu1 %v1416_v0  ;;  %v1160_v44 = vmul.f32 0.03125, %v8020_v25  ;;  %v1113_v0 = vsel %vm234_vm0, %v6290_v34, 0.0  ;;  %v1116_v25 = vsel %vm234_vm0, %v6027_v8, 0.0 }
 0x413   : > { %v6446_v24 = vpop.xlane.xlu1 %1048 }
 0x416   : > { %1378 = vadd.xlane.f32.xlu0 %v1377_v59  ;;  %436 = vadd.xlane.f32.xlu1 %v435_v1  ;;  %v6470_v1 = vsub.f32 %v8021_v27, %v1160_v44  ;;  %v1422_v59 = vsel %vm234_vm0, %v1298_v46, 0.0  ;;  %v426_v46 = vsel %vm234_vm0, %v8023_v23, 0.0  ;;  %v1163_v23 = vmul.f32 0.03125, %v6264_v10 }
 0x417   : > { %v410_v49 = vpop.xlane.xlu1 %409 }
 0x418   : > { %8022 = vst [vmem:[#allocation55_spill] sm:$0xff] %v6470_v1 }
 0x41a   : > { %1114 = vadd.xlane.f32.xlu0 %v1113_v0  ;;  %1411 = vadd.xlane.f32.xlu1 %v1410_v12  ;;  %v1288_v0 = vmul.f32 %v6470_v1, %v6470_v1 }
 0x41b   : > { %v6467_v29 = vpop.xlane.xlu1 %1060 }
 0x41c   : > { %v1392_v44 = vsel %vm234_vm0, %v1288_v0, 0.0 }
 0x41e   : > { %1384 = vadd.xlane.f32.xlu0 %v1383_v26  ;;  %1423 = vadd.xlane.f32.xlu1 %v1422_v59  ;;  %v1159_v26 = vmul.f32 0.03125, %v6251_v19  ;;  %v1031_v59 = vpop.xlane.xlu0 %1030 }
 0x41f   : > { %v6474_v6 = vpop.xlane.xlu1 %1051 }
 0x420   : > { %v6491_v63 = vsub.f32 %v8024_v28, %v1159_v26  ;;  %v8028_v28 = vld [vmem:[#allocation50_spill] sm:$0xff] }
 0x421   : > { %v6505_v26 = vsub.f32 %v8028_v28, %v1163_v23  ;;  %v8031_v23 = vld [vmem:[#allocation52_spill] sm:$0xff] }
 0x422   : > { %1117 = vadd.xlane.f32.xlu0 %v1116_v25  ;;  %8025 = vst [vmem:[#allocation51_spill] sm:$0xff] %v6491_v63  ;;  %v8026_v25 = vld [vmem:[#allocation48_spill] sm:$0xff]  ;;  %v1043_v8 = vpop.xlane.xlu0 %1042  ;;  %v1287_v19 = vmul.f32 %v6491_v63, %v6491_v63 }
 0x423   : > { %v6480_v12 = vpop.xlane.xlu1 %1351  ;;  %v1128_v1 = vsel %vm234_vm0, %v8026_v25, 0.0  ;;  %8029 = vst [vmem:[#allocation26_spill] sm:$0xff] %v6505_v26 }
 0x424   : > { %v1389_v25 = vsel %vm234_vm0, %v1287_v19, 0.0  ;;  %v443_v19 = vmul.f32 0.03125, %v6314_v51  ;;  %v444_v51 = vmul.f32 0.03125, %v6353_v50 }
 0x426   : > { %1393 = vadd.xlane.f32.xlu0 %v1392_v44  ;;  %v8027_v44 = vld [vmem:[#allocation20_spill] sm:$0xff] }
 0x427   : > { %v6483_v27 = vpop.xlane.xlu1 %1063  ;;  %v429_v13 = vsel %vm234_vm0, %v8027_v44, 0.0  ;;  %v1165_v44 = vmul.f32 0.03125, %v6305_v38  ;;  %v1169_v38 = vmul.f32 0.03125, %v6322_v60 }
 0x429   : > { %v6520_v28 = vsub.f32 %v8031_v23, %v1165_v44  ;;  %v8035_v23 = vld [vmem:[#allocation53_spill] sm:$0xff] }
 0x42a   : > { %427 = vadd.xlane.f32.xlu0 %v426_v46 }
 0x42b   : > { %v6488_v36 = vpop.xlane.xlu1 %1069  ;;  %8032 = vst [vmem:[#allocation50_spill] sm:$0xff] %v6520_v28 }
 0x42e   : > { %1129 = vadd.xlane.f32.xlu0 %v1128_v1  ;;  %v6508_v1 = vpop.permute.xlu0 %928 }
 0x42f   : > { %v6495_v0 = vpop.xlane.xlu1 %1357  ;;  %8030 = vst [vmem:[#allocation44_spill] sm:$0xff] %v6508_v1  ;;  %v1125_v10 = vsel %vm234_vm0, %v6508_v1, 0.0  ;;  %v6528_v1 = vsub.f32 %v8033_v11, %v443_v19 }
 0x431   : > { %8034 = vst [vmem:[#allocation52_spill] sm:$0xff] %v6528_v1  ;;  %v475_v11 = vmul.f32 %v6528_v1, %v6528_v1 }
 0x432   : > { %430 = vadd.xlane.f32.xlu0 %v429_v13  ;;  %v1291_v13 = vmul.f32 %v6505_v26, %v6505_v26  ;;  %v1293_v26 = vmul.f32 %v6520_v28, %v6520_v28  ;;  %v6546_v28 = vsub.f32 %v8036_v21, %v444_v51 }
 0x433   : > { %v6502_v46 = vpop.xlane.xlu1 %415 }
 0x434   : > { %v1407_v60 = vsel %vm234_vm0, %v1293_v26, 0.0  ;;  %8037 = vst [vmem:[#allocation14_spill] sm:$0xff] %v6546_v28 }
 0x436   : > { %1390 = vadd.xlane.f32.xlu0 %v1389_v25  ;;  %v1401_v25 = vsel %vm234_vm0, %v1291_v13, 0.0  ;;  %v445_v13 = vmul.f32 0.03125, %v410_v49  ;;  %v1167_v49 = vmul.f32 0.03125, %v1031_v59 }
 0x437   : > { %v6510_v42 = vpop.xlane.xlu1 %1081 }
 0x43a   : > { %1126 = vadd.xlane.f32.xlu0 %v1125_v10  ;;  %v1137_v10 = vsel %vm234_vm0, %v6435_v47, 0.0 }
 0x43b   : > { %v6517_v63 = vpop.xlane.xlu1 %418 }
 0x43e   : > { %1402 = vadd.xlane.f32.xlu0 %v1401_v25  ;;  %v6538_v25 = vsub.f32 %v8035_v23, %v1169_v38  ;;  %v499_v38 = vsel %vm234_vm0, %v475_v11, 0.0  ;;  %v1177_v23 = vmul.f32 0.03125, %v6467_v29  ;;  %v1171_v29 = vmul.f32 0.03125, %v1043_v8 }
 0x43f   : > { %v6524_v34 = vpop.xlane.xlu1 %1078 }
 0x440   : > { %v1297_v26 = vmul.f32 %v6538_v25, %v6538_v25  ;;  %v6571_v11 = vsub.f32 %v6117_v2, %v1177_v23  ;;  %v1173_v2 = vmul.f32 0.03125, %v6446_v24  ;;  %v8041_v23 = vld [vmem:[#allocation58_spill] sm:$0xff] }
 0x442   : > { %1138 = vadd.xlane.f32.xlu0 %v1137_v10  ;;  %v6549_v10 = vsub.f32 %v5748_v17, %v445_v13  ;;  %v6567_v13 = vsub.f32 %v6069_v20, %v1167_v49  ;;  %v8040_v49 = vld [vmem:[#allocation56_spill] sm:$0xff] }
 0x443   : > { %v6534_v44 = vpop.xlane.xlu1 %1366 }
 0x444   : > { %8038 = vst [vmem:[#allocation53_spill] sm:$0xff] %v6549_v10  ;;  %v477_v59 = vmul.f32 %v6549_v10, %v6549_v10 }
 0x446   : > { %1408 = vadd.xlane.f32.xlu0 %v1407_v60  ;;  %v505_v8 = vsel %vm234_vm0, %v477_v59, 0.0 }
 0x447   : > { %v6543_v19 = vpop.xlane.xlu1 %1090  ;;  %v1046_v47 = vpop.xlane.xlu0 %1045 }
 0x448   : > { %v1172_v50 = vmul.f32 0.03125, %v1046_v47  ;;  %v476_v47 = vmul.f32 %v6546_v28, %v6546_v28 }
 0x44a   : > { %v6556_v60 = vsub.f32 %v5848_v3, %v1172_v50  ;;  %500 = vadd.xlane.f32.xlu0 %v499_v38  ;;  %v1419_v3 = vsel %vm234_vm0, %v1297_v26, 0.0  ;;  %v1174_v50 = vmul.f32 0.03125, %v6474_v6  ;;  %v502_v20 = vsel %vm234_vm0, %v476_v47, 0.0 }
 0x44b   : > { %v6558_v1 = vpop.xlane.xlu1 %1336  ;;  %v1346_v21 = vpop.xlane.xlu0 %1345  ;;  %v6580_v26 = vsub.f32 %v8040_v49, %v1171_v29  ;;  %v1295_v6 = vmul.f32 %v6567_v13, %v6567_v13  ;;  %v8043_v29 = vld [vmem:[#allocation57_spill] sm:$0xff] }
 0x44c   : > { %8039 = vst [vmem:[#allocation15_spill] sm:$0xff] %v6556_v60  ;;  %v1528_v51 = vmul.f32 0.03125, %v1346_v21  ;;  %v1300_v17 = vmul.f32 %v6556_v60, %v6556_v60 }
 0x44e   : > { %v1592_v38 = vadd.f32 1e-05, %v1528_v51  ;;  %1420 = vadd.xlane.f32.xlu0 %v1419_v3  ;;  %v1428_v21 = vsel %vm234_vm0, %v1300_v17, 0.0  ;;  %v6586_v51 = vsub.f32 %v8041_v23, %v1174_v50  ;;  %v1178_v17 = vmul.f32 0.03125, %v6483_v27  ;;  %v8044_v27 = vld [vmem:[#allocation59_spill] sm:$0xff] }
 0x44f   : > { %v6575_v60 = vpop.xlane.xlu1 %1096  ;;  %1429 = vadd.xlane.f32.xlu1 %v1428_v21  ;;  %v1349_v28 = vpop.xlane.xlu0 %1348  ;;  %v1413_v21 = vsel %vm234_vm0, %v1295_v6, 0.0  ;;  %v1299_v50 = vmul.f32 %v6580_v26, %v6580_v26  ;;  %v447_v6 = vmul.f32 0.03125, %v6502_v46 }
 0x450   : > { %v1529_v10 = vmul.f32 0.03125, %v1349_v28  ;;  %5025 = vrsqrt.f32 %v1592_v38  ;;  %8042 = vst [vmem:[#allocation56_spill] sm:$0xff] %v6586_v51  ;;  %v1305_v28 = vmul.f32 %v6571_v11, %v6571_v11  ;;  %v6594_v38 = vsub.f32 %v8043_v29, %v1173_v2  ;;  %v8046_v29 = vld [vmem:[#allocation34_spill] sm:$0xff] }
 0x451   : > { %v1530_v2 = vmul.f32 0.03125, %v6480_v12 }
 0x452   : > { %v1593_v3 = vadd.f32 1e-05, %v1529_v10  ;;  %503 = vadd.xlane.f32.xlu0 %v502_v20  ;;  %v6600_v10 = vsub.f32 %v8044_v27, %v1178_v17  ;;  %v1180_v20 = vmul.f32 0.03125, %v6488_v36  ;;  %v1443_v49 = vsel %vm234_vm0, %v1305_v28, 0.0 }
 0x453   : > { %v6591_v47 = vpop.xlane.xlu1 %1372  ;;  %506 = vadd.xlane.f32.xlu1 %v505_v8  ;;  %v1058_v59 = vpop.xlane.xlu0 %1057  ;;  %v1302_v8 = vmul.f32 %v6586_v51, %v6586_v51  ;;  %v1425_v36 = vsel %vm234_vm0, %v1299_v50, 0.0  ;;  %v1301_v28 = vmul.f32 %v6594_v38, %v6594_v38 }
 0x454   : > { %5027 = vrsqrt.f32 %v1593_v3  ;;  %v1176_v24 = vmul.f32 0.03125, %v1058_v59  ;;  %8045 = vst [vmem:[#allocation58_spill] sm:$0xff] %v6600_v10  ;;  %v1306_v12 = vmul.f32 %v6600_v10, %v6600_v10 }
 0x455   : > { %v1434_v27 = vsel %vm234_vm0, %v1302_v8, 0.0 }
 0x456   : > { %1414 = vadd.xlane.f32.xlu0 %v1413_v21  ;;  %v6609_v3 = vsub.f32 %v5852_v5, %v1176_v24  ;;  %v6617_v21 = vsub.f32 %v8046_v29, %v1180_v20  ;;  %v1594_v24 = vadd.f32 1e-05, %v1530_v2 }
 0x457   : > { %1444 = vadd.xlane.f32.xlu1 %v1443_v49  ;;  %v413_v23 = vpop.xlane.xlu0 %412  ;;  %v6611_v59 = vpop.xlane.xlu1 %494  ;;  %v8048_v49 = vld [vmem:[#allocation16_spill] sm:$0xff] }
 0x458   : > { %v446_v17 = vmul.f32 0.03125, %v413_v23  ;;  %8047 = vst [vmem:[#allocation57_spill] sm:$0xff] %v6617_v21  ;;  %v6623_v23 = vsub.f32 %v8048_v49, %v447_v6  ;;  %v1304_v50 = vmul.f32 %v6609_v3, %v6609_v3  ;;  %v1308_v2 = vmul.f32 %v6617_v21, %v6617_v21 }
 0x459   : > { %5029 = vrsqrt.f32 %v1594_v24 }
 0x45a   : > { %1426 = vadd.xlane.f32.xlu0 %v1425_v36  ;;  %v5026_v46 = vpop.eup %5025  ;;  %v6628_v51 = vsub.f32 %v5751_v31, %v446_v17  ;;  %v1431_v36 = vsel %vm234_vm0, %v1301_v28, 0.0  ;;  %v1440_v17 = vsel %vm234_vm0, %v1304_v50, 0.0 }
 0x45b   : > { %1435 = vadd.xlane.f32.xlu1 %v1434_v27  ;;  %v1055_v5 = vpop.xlane.xlu0 %1054  ;;  %v1720_v8 = vmul.f32 %v5026_v46, %v6191_v57  ;;  %v1446_v27 = vsel %vm234_vm0, %v1306_v12, 0.0  ;;  %v6635_v6 = vpop.xlane.xlu1 %1108  ;;  %v479_v57 = vmul.f32 %v6623_v23, %v6623_v23  ;;  %v8049_v12 = vld [vmem:[#allocation9_spill] sm:$0xff] }
 0x45c   : > { %v1175_v20 = vmul.f32 0.03125, %v1055_v5 }
 0x45d   : > { %v1788_v46 = vmul.f32 %v8049_v12, %v1720_v8 }
 0x45e   : > { %v5028_v29 = vpop.eup %5027  ;;  %1432 = vadd.xlane.f32.xlu0 %v1431_v36  ;;  %v6642_v28 = vsub.f32 %v6109_v43, %v1175_v20  ;;  %v478_v36 = vmul.f32 %v6628_v51, %v6628_v51 }
 0x45f   : > { %1447 = vadd.xlane.f32.xlu1 %v1446_v27  ;;  %v1355_v49 = vpop.xlane.xlu0 %1354  ;;  %v1721_v10 = vmul.f32 %v5028_v29, %v6204_v7  ;;  %v1452_v7 = vsel %vm234_vm0, %v1308_v2, 0.0  ;;  %v6650_v21 = vpop.xlane.xlu1 %1339  ;;  %v1532_v2 = vmul.f32 0.03125, %v6495_v0 }
 0x460   : > { %v1531_v31 = vmul.f32 0.03125, %v1355_v49  ;;  %v511_v49 = vsel %vm234_vm0, %v479_v57, 0.0  ;;  %v1303_v20 = vmul.f32 %v6642_v28, %v6642_v28 }
 0x461   : > { %v1789_v5 = vmul.f32 %v8049_v12, %v1721_v10  ;;  %v508_v10 = vsel %vm234_vm0, %v478_v36, 0.0 }
 0x462   : > { %v1595_v27 = vadd.f32 1e-05, %v1531_v31  ;;  %1441 = vadd.xlane.f32.xlu0 %v1440_v17  ;;  %v1184_v17 = vmul.f32 0.03125, %v6510_v42  ;;  %v448_v42 = vmul.f32 0.03125, %v6517_v63  ;;  %v8051_v63 = vld [vmem:[#allocation17_spill] sm:$0xff] }
 0x463   : > { %1453 = vadd.xlane.f32.xlu1 %v1452_v7  ;;  %v1067_v24 = vpop.xlane.xlu0 %1066  ;;  %v1866_v50 = vpack.c.bf16 %v1789_v5, %v1788_v46  ;;  %v1437_v46 = vsel %vm234_vm0, %v1303_v20, 0.0  ;;  %v5030_v36 = vpop.eup %5029 }
 0x464   : > { %v1179_v29 = vmul.f32 0.03125, %v1067_v24  ;;  %5031 = vrsqrt.f32 %v1595_v27  ;;  %v1596_v27 = vadd.f32 1e-05, %v1532_v2  ;;  %v6668_v7 = vpop.xlane.xlu1 %1099  ;;  %v6671_v24 = vsub.f32 %v5862_v16, %v1184_v17 }
 0x465   : > { %v1949_v43 = vsel %vm234_vm0, %v1866_v50, 0 }
 0x466   : > { %v6657_v8 = vsub.f32 %v6119_v15, %v1179_v29  ;;  %4651 = vmatpush3.bf16.xpose.msra.mxu1 %v1949_v43  ;;  %509 = vadd.xlane.f32.xlu0 %v508_v10  ;;  %5033 = vrsqrt.f32 %v1596_v27  ;;  %v1312_v17 = vmul.f32 %v6671_v24, %v6671_v24 }
 0x467   : > { %512 = vadd.xlane.f32.xlu1 %v511_v49  ;;  %v1073_v31 = vpop.xlane.xlu0 %1072  ;;  %4652 = vmatprep.subr.bf16.mxu1 %v8005_v58 }
 0x468   : > { %v1181_v57 = vmul.f32 0.03125, %v1073_v31  ;;  %v1307_v5 = vmul.f32 %v6657_v8, %v6657_v8 }
 0x46a   : > { %v6666_v15 = vsub.f32 %v6125_v52, %v1181_v57  ;;  %1438 = vadd.xlane.f32.xlu0 %v1437_v46  ;;  %v1449_v29 = vsel %vm234_vm0, %v1307_v5, 0.0  ;;  %v8050_v52 = vld [vmem:[#allocation61_spill] sm:$0xff]  ;;  %v6682_v57 = vsub.f32 %v8051_v63, %v448_v42  ;;  %v1183_v46 = vmul.f32 0.03125, %v6524_v34  ;;  %v6685_v5 = vpop.xlane.xlu1 %1375 }
 0x46b   : > { %v1361_v0 = vpop.xlane.xlu0 %1360  ;;  %v1722_v10 = vmul.f32 %v5030_v36, %v8050_v52  ;;  %v1464_v52 = vsel %vm234_vm0, %v1312_v17, 0.0  ;;  %v1187_v34 = vmul.f32 0.03125, %v6543_v19 }
 0x46c   : > { %v1533_v50 = vmul.f32 0.03125, %v1361_v0  ;;  %v1309_v49 = vmul.f32 %v6666_v15, %v6666_v15  ;;  %v6692_v42 = vsub.f32 %v6123_v54, %v1183_v46 }
 0x46d   : > { %v1790_v27 = vmul.f32 %v8049_v12, %v1722_v10  ;;  %v6708_v63 = vsub.f32 %v6141_v32, %v1187_v34  ;;  %v8052_v34 = vld [vmem:[#allocation62_spill] sm:$0xff] }
 0x46e   : > { %v1597_v43 = vadd.f32 1e-05, %v1533_v50  ;;  %1450 = vadd.xlane.f32.xlu0 %v1449_v29  ;;  %v5032_v20 = vpop.eup %5031  ;;  %v1455_v0 = vsel %vm234_vm0, %v1309_v49, 0.0  ;;  %v480_v49 = vmul.f32 %v6682_v57, %v6682_v57  ;;  %v1311_v46 = vmul.f32 %v6692_v42, %v6692_v42 }
 0x46f   : > { %v492_v2 = vpop.xlane.xlu0 %491  ;;  %v1723_v16 = vmul.f32 %v5032_v20, %v6248_v39  ;;  %v1535_v20 = vmul.f32 0.03125, %v6534_v44 }
 0x470   : > { %5035 = vrsqrt.f32 %v1597_v43  ;;  %v536_v31 = vmul.f32 0.03125, %v492_v2  ;;  %v5034_v17 = vpop.eup %5033  ;;  %v514_v44 = vsel %vm234_vm0, %v480_v49, 0.0 }
 0x471   : > { %v1791_v50 = vmul.f32 %v8049_v12, %v1723_v16  ;;  %v1724_v49 = vmul.f32 %v5034_v17, %v8052_v34 }
 0x472   : > { %v552_v36 = vadd.f32 1e-05, %v536_v31  ;;  %1456 = vadd.xlane.f32.xlu0 %v1455_v0  ;;  %v6702_v31 = vpop.xlane.xlu1 %1111 }
 0x473   : > { %v1085_v29 = vpop.xlane.xlu0 %1084  ;;  %v1867_v43 = vpack.c.bf16 %v1791_v50, %v1790_v27 }
 0x474   : > { %v1185_v39 = vmul.f32 0.03125, %v1085_v29  ;;  %5037 = vrsqrt.f32 %v552_v36  ;;  %v1599_v36 = vadd.f32 1e-05, %v1535_v20  ;;  %v1525_v29 = vmul.f32 0.03125, %v6558_v1 }
 0x475   : > { %v1952_v2 = vsel %vm234_vm0, %v1867_v43, 0  ;;  %v1315_v1 = vmul.f32 %v6708_v63, %v6708_v63 }
 0x476   : > { %v6699_v10 = vsub.f32 %v6127_v56, %v1185_v39  ;;  %1465 = vadd.xlane.f32.xlu0 %v1464_v52  ;;  %4653 = vmatpush3.bf16.xpose.msra.mxu1 %v1952_v2  ;;  %v1189_v56 = vmul.f32 0.03125, %v6575_v60  ;;  %v537_v60 = vmul.f32 0.03125, %v6611_v59  ;;  %v6727_v20 = vpop.xlane.xlu1 %1381  ;;  %v1461_v2 = vsel %vm234_vm0, %v1311_v46, 0.0 }
 0x477   : > { %v1076_v16 = vpop.xlane.xlu0 %1075  ;;  %4658 = vmatprep.subr.bf16.mxu1 %v8005_v58  ;;  %5039 = vrsqrt.f32 %v1599_v36  ;;  %v1792_v46 = vmul.f32 %v8049_v12, %v1724_v49 }
 0x478   : > { %v1182_v54 = vmul.f32 0.03125, %v1076_v16  ;;  %v1313_v19 = vmul.f32 %v6699_v10, %v6699_v10 }
 0x47a   : > { %v5036_v0 = vpop.eup %5035  ;;  %v6715_v27 = vsub.f32 %v6129_v62, %v1182_v54  ;;  %515 = vadd.xlane.f32.xlu0 %v514_v44  ;;  %v1467_v50 = vsel %vm234_vm0, %v1313_v19, 0.0  ;;  %v6725_v62 = vsub.f32 %v6145_v14, %v1189_v56  ;;  %v1589_v19 = vadd.f32 1e-05, %v1525_v29 }
 0x47b   : > { %1468 = vadd.xlane.f32.xlu1 %v1467_v50  ;;  %v1364_v32 = vpop.xlane.xlu0 %1363  ;;  %v1725_v39 = vmul.f32 %v5036_v0, %v6275_v41  ;;  %v553_v14 = vadd.f32 1e-05, %v537_v60  ;;  %v1473_v0 = vsel %vm234_vm0, %v1315_v1, 0.0  ;;  %v6743_v60 = vpop.xlane.xlu1 %488 }
 0x47c   : > { %v1534_v43 = vmul.f32 0.03125, %v1364_v32  ;;  %v1310_v52 = vmul.f32 %v6715_v27, %v6715_v27  ;;  %v1317_v36 = vmul.f32 %v6725_v62, %v6725_v62  ;;  %v8053_v32 = vld [vmem:[#allocation8_spill] sm:$0xff] }
 0x47d   : > { %v1793_v16 = vmul.f32 %v8049_v12, %v1725_v39 }
 0x47e   : > { %v1598_v41 = vadd.f32 1e-05, %v1534_v43  ;;  %1462 = vadd.xlane.f32.xlu0 %v1461_v2  ;;  %v1458_v59 = vsel %vm234_vm0, %v1310_v52, 0.0  ;;  %v5038_v54 = vpop.eup %5037  ;;  %v1479_v49 = vsel %vm234_vm0, %v1317_v36, 0.0 }
 0x47f   : > { %1459 = vadd.xlane.f32.xlu1 %v1458_v59  ;;  %v1088_v17 = vpop.xlane.xlu0 %1087  ;;  %v584_v44 = vmul.f32 %v5038_v54, %v6287_v4  ;;  %v1868_v39 = vpack.c.bf16 %v1793_v16, %v1792_v46  ;;  %v1537_v4 = vmul.f32 0.03125, %v6591_v47  ;;  %v1193_v46 = vmul.f32 0.03125, %v6635_v6 }
 0x480   : > { %v1186_v56 = vmul.f32 0.03125, %v1088_v17  ;;  %5041 = vrsqrt.f32 %v1598_v41 }
 0x481   : > { %v604_v29 = vmul.f32 %v8053_v32, %v584_v44  ;;  %5043 = vrsqrt.f32 %v1589_v19  ;;  %v1998_v1 = vsel %vm234_vm0, %v1868_v39, 0  ;;  %v5040_v47 = vpop.eup %5039  ;;  %v1601_v16 = vadd.f32 1e-05, %v1537_v4  ;;  %v6755_v19 = vpop.xlane.xlu1 %1120 }
 0x482   : > { %v6740_v50 = vsub.f32 %v6131_v55, %v1186_v56  ;;  %1474 = vadd.xlane.f32.xlu0 %v1473_v0  ;;  %5045 = vrsqrt.f32 %v553_v14  ;;  %v1727_v44 = vmul.f32 %v5040_v47, %v6183_v22  ;;  %v6771_v6 = vsub.f32 %v6240_v18, %v1193_v46 }
 0x483   : > { %v1334_v43 = vpop.xlane.xlu0 %1333  ;;  %v1849_v34 = vpack.c.bf16 %v604_v29, %v604_v29  ;;  %v1526_v18 = vmul.f32 0.03125, %v6650_v21 }
 0x484   : > { %v1524_v52 = vmul.f32 0.03125, %v1334_v43  ;;  %v1314_v2 = vmul.f32 %v6740_v50, %v6740_v50 }
 0x485   : > { %4655 = vmatmul.mubr.msk.bf16.vlgmr.msra.gmra.mrb[0].mxu1 %vm234_vm0, %v1849_v34 }
 0x486   : > { %v1588_v55 = vadd.f32 1e-05, %v1524_v52  ;;  %1480 = vadd.xlane.f32.xlu0 %v1479_v49  ;;  %4659 = vmatpush3.bf16.xpose.msra.mxu1 %v1998_v1  ;;  %v1470_v41 = vsel %vm234_vm0, %v1314_v2, 0.0  ;;  %v1795_v49 = vmul.f32 %v8049_v12, %v1727_v44 }
 0x487   : > { %v1094_v59 = vpop.xlane.xlu0 %1093  ;;  %4662 = vmatprep.mubr.msk.bf16.mxu1 %vm5373_vm1, %v8005_v58  ;;  %1471 = vadd.xlane.f32.xlu1 %v1470_v41 }
 0x488   : > { %5047 = vrsqrt.f32 %v1588_v55  ;;  %v1188_v54 = vmul.f32 0.03125, %v1094_v59  ;;  %4660 = vmatprep.subr.bf16.mxu1 %v8005_v58  ;;  %v8054_v55 = vld [vmem:[#allocation65_spill] sm:$0xff]  ;;  %v8055_v59 = vld [vmem:[#allocation63_spill] sm:$0xff] }
 0x489   : > { %5049 = vrsqrt.f32 %v1601_v16 }
 0x48a   : > { %v6758_v17 = vsub.f32 %v5868_v33, %v1188_v54  ;;  %v5042_v14 = vpop.eup %5041  ;;  %v6766_v33 = vpop.xlane.xlu1 %1396 }
 0x48b   : > { %v1370_v56 = vpop.xlane.xlu0 %1369  ;;  %v5044_v29 = vpop.eup %5043  ;;  %v1726_v39 = vmul.f32 %v5042_v14, %v6327_v48  ;;  %v1190_v48 = vmul.f32 0.03125, %v6668_v7  ;;  %v1321_v7 = vmul.f32 %v6771_v6, %v6771_v6 }
 0x48c   : > { %v1536_v0 = vmul.f32 0.03125, %v1370_v56  ;;  %v1316_v36 = vmul.f32 %v6758_v17, %v6758_v17  ;;  %v5046_v43 = vpop.eup %5045  ;;  %v1717_v47 = vmul.f32 %v5044_v29, %v8055_v59 }
 0x48d   : > { %v1794_v22 = vmul.f32 %v8049_v12, %v1726_v39  ;;  %v585_v1 = vmul.f32 %v5046_v43, %v8054_v55  ;;  %v1194_v43 = vmul.f32 0.03125, %v6702_v31 }
 0x48e   : > { %v1600_v4 = vadd.f32 1e-05, %v1536_v0  ;;  %v1476_v52 = vsel %vm234_vm0, %v1316_v36, 0.0  ;;  %v6787_v36 = vsub.f32 %v6253_v35, %v1190_v48 }
 0x48f   : > { %1477 = vadd.xlane.f32.xlu1 %v1476_v52  ;;  %v422_v34 = vpop.xlane.xlu0 %421  ;;  %v1869_v41 = vpack.c.bf16 %v1795_v49, %v1794_v22  ;;  %v605_v29 = vmul.f32 %v8053_v32, %v585_v1  ;;  %v1590_v22 = vadd.f32 1e-05, %v1526_v18 }
 0x490   : > { %5051 = vrsqrt.f32 %v1600_v4  ;;  %v449_v2 = vmul.f32 0.03125, %v422_v34  ;;  %v1318_v31 = vmul.f32 %v6787_v36, %v6787_v36 }
 0x491   : > { %v2001_v14 = vsel %vm234_vm0, %v1869_v41, 0  ;;  %v1850_v1 = vpack.c.bf16 %v605_v29, %v605_v29  ;;  %5053 = vrsqrt.f32 %v1590_v22 }
 0x492   : > { %v5048_v16 = vpop.eup %5047  ;;  %v6777_v54 = vsub.f32 %v5780_v30, %v449_v2  ;;  %4661 = vmatpush3.bf16.xpose.msra.mxu1 %v2001_v14  ;;  %v498_v30 = vpop.xlane.xlu1 %497  ;;  %v1491_v2 = vsel %vm234_vm0, %v1321_v7, 0.0 }
 0x493   : > { %v1106_v56 = vpop.xlane.xlu0 %1105  ;;  %v1716_v44 = vmul.f32 %v5048_v16, %v6351_v61  ;;  %v1785_v61 = vmul.f32 %v8049_v12, %v1717_v47  ;;  %4666 = vmatprep.subr.bf16.mxu1 %v8005_v58  ;;  %v5050_v21 = vpop.eup %5049  ;;  %v6806_v47 = vsub.f32 %v6271_v40, %v1194_v43  ;;  %v535_v16 = vmul.f32 0.03125, %v6743_v60 }
 0x494   : > { %v1192_v46 = vmul.f32 0.03125, %v1106_v56  ;;  %v481_v0 = vmul.f32 %v6777_v54, %v6777_v54  ;;  %v1538_v40 = vmul.f32 0.03125, %v6685_v5  ;;  %v1482_v60 = vsel %vm234_vm0, %v1318_v31, 0.0 }
 0x495   : > { %v1784_v39 = vmul.f32 %v8049_v12, %v1716_v44 }
 0x496   : > { %v6795_v4 = vsub.f32 %v8002_v9, %v1192_v46  ;;  %v517_v52 = vsel %vm234_vm0, %v481_v0, 0.0  ;;  %v8056_v9 = vld [vmem:[#allocation64_spill] sm:$0xff]  ;;  %v6813_v44 = vpop.xlane.xlu1 %1132 }
 0x497   : > { %518 = vadd.xlane.f32.xlu1 %v517_v52  ;;  %v425_v35 = vpop.xlane.xlu0 %424  ;;  %v1864_v34 = vpack.c.bf16 %v1785_v61, %v1784_v39  ;;  %v1729_v41 = vmul.f32 %v5050_v21, %v8056_v9  ;;  %v1322_v61 = vmul.f32 %v6806_v47, %v6806_v47  ;;  %v1602_v52 = vadd.f32 1e-05, %v1538_v40 }
 0x498   : > { %v450_v49 = vmul.f32 0.03125, %v425_v35  ;;  %v1320_v55 = vmul.f32 %v6795_v4, %v6795_v4 }
 0x499   : > { %v1900_v48 = vsel %vm234_vm0, %v1864_v34, 0  ;;  %4663 = vmatmul.mubr.msk.bf16.vlgmr.msra.gmra.mrb[4].mxu1 %vm234_vm0, %v1850_v1  ;;  %v1797_v29 = vmul.f32 %v8049_v12, %v1729_v41 }
 0x49a   : > { %v5052_v59 = vpop.eup %5051  ;;  %v6810_v14 = vsub.f32 %v8006_v37, %v450_v49  ;;  %4643 = vmatpush3.bf16.xpose.msra.mxu0 %v1900_v48  ;;  %v1488_v56 = vsel %vm234_vm0, %v1320_v55, 0.0  ;;  %4670 = vmatprep.mubr.msk.bf16.mxu1 %vm5373_vm1, %v8005_v58  ;;  %v6829_v34 = vpop.xlane.xlu1 %1387  ;;  %v538_v49 = vmul.f32 0.03125, %v498_v30  ;;  %v1494_v55 = vsel %vm234_vm0, %v1322_v61, 0.0 }
 0x49b   : > { %1492 = vadd.xlane.f32.xlu1 %v1491_v2  ;;  %v1343_v18 = vpop.xlane.xlu0 %1342  ;;  %v1728_v46 = vmul.f32 %v5052_v59, %v6373_v45  ;;  %1489 = vadd.xlane.f32.xlu0 %v1488_v56  ;;  %v551_v45 = vadd.f32 1e-05, %v535_v16  ;;  %v1540_v48 = vmul.f32 0.03125, %v6727_v20  ;;  %v5054_v41 = vpop.eup %5053  ;;  %v1197_v30 = vmul.f32 0.03125, %v6755_v19 }
 0x49c   : > { %v1527_v0 = vmul.f32 0.03125, %v1343_v18  ;;  %v482_v37 = vmul.f32 %v6810_v14, %v6810_v14  ;;  %4644 = vmatprep.subr.bf16.mxu0 %v8005_v58  ;;  %v554_v59 = vadd.f32 1e-05, %v538_v49 }
 0x49d   : > { %v1796_v7 = vmul.f32 %v8049_v12, %v1728_v46  ;;  %v1604_v46 = vadd.f32 1e-05, %v1540_v48 }
 0x49e   : > { %v1591_v39 = vadd.f32 1e-05, %v1527_v0  ;;  %v520_v5 = vsel %vm234_vm0, %v482_v37, 0.0  ;;  %v1124_v56 = vpop.xlane.xlu1 %1123  ;;  %v8057_v0 = vld [vmem:[#allocation66_spill] sm:$0xff] }
 0x49f   : > { %1483 = vadd.xlane.f32.xlu1 %v1482_v60  ;;  %v1103_v21 = vpop.xlane.xlu0 %1102  ;;  %v1870_v43 = vpack.c.bf16 %v1797_v29, %v1796_v7  ;;  %521 = vadd.xlane.f32.xlu0 %v520_v5  ;;  %v1718_v37 = vmul.f32 %v5054_v41, %v8057_v0  ;;  %v8058_v60 = vld [vmem:[#allocation72_spill] sm:$0xff]  ;;  %v8063_v0 = vld [vmem:[#allocation46_spill] sm:$0xff] }
 0x4a0   : > { %5055 = vrsqrt.f32 %v1591_v39  ;;  %v1191_v35 = vmul.f32 0.03125, %v1103_v21  ;;  %v6844_v7 = vsub.f32 %v8058_v60, %v1197_v30  ;;  %v8059_v29 = vld [vmem:[#allocation68_spill] sm:$0xff]  ;;  %v8060_v39 = vld [vmem:[#allocation41_spill] sm:$0xff]  ;;  %v1545_v21 = vmul.f32 0.03125, %v6766_v33 }
 0x4a1   : > { %v2047_v22 = vsel %vm234_vm0, %v1870_v43, 0  ;;  %5057 = vrsqrt.f32 %v551_v45 }
 0x4a2   : > { %v6833_v2 = vsub.f32 %v6284_v53, %v1191_v35  ;;  %4667 = vmatpush3.bf16.xpose.msra.mxu1 %v2047_v22  ;;  %5059 = vrsqrt.f32 %v1602_v52  ;;  %v6853_v35 = vpop.xlane.xlu1 %1399  ;;  %v1786_v22 = vmul.f32 %v8049_v12, %v1718_v37 }
 0x4a3   : > { %1495 = vadd.xlane.f32.xlu1 %v1494_v55  ;;  %v1379_v1 = vpop.xlane.xlu0 %1378  ;;  %4668 = vmatprep.subr.bf16.mxu1 %v8005_v58 }
 0x4a4   : > { %v1539_v31 = vmul.f32 0.03125, %v1379_v1  ;;  %v1319_v9 = vmul.f32 %v6833_v2, %v6833_v2 }
 0x4a6   : > { %v1603_v53 = vadd.f32 1e-05, %v1539_v31  ;;  %v1485_v16 = vsel %vm234_vm0, %v1319_v9, 0.0  ;;  %v1325_v31 = vmul.f32 %v6844_v7, %v6844_v7  ;;  %v8061_v9 = vld [vmem:[#allocation70_spill] sm:$0xff] }
 0x4a7   : > { %1486 = vadd.xlane.f32.xlu0 %v1485_v16  ;;  %v1115_v18 = vpop.xlane.xlu0 %1114 }
 0x4a8   : > { %5061 = vrsqrt.f32 %v1603_v53  ;;  %v1195_v40 = vmul.f32 0.03125, %v1115_v18  ;;  %v8062_v18 = vld [vmem:[#allocation67_spill] sm:$0xff] }
 0x4a9   : > { %5063 = vrsqrt.f32 %v554_v59  ;;  %v1609_v59 = vadd.f32 1e-05, %v1545_v21 }
 0x4aa   : > { %v5056_v20 = vpop.eup %5055  ;;  %v6847_v45 = vsub.f32 %v8059_v29, %v1195_v40  ;;  %5065 = vrsqrt.f32 %v1604_v46  ;;  %v1136_v29 = vpop.xlane.xlu1 %1135 }
 0x4ab   : > { %v1385_v19 = vpop.xlane.xlu0 %1384  ;;  %v1719_v5 = vmul.f32 %v5056_v20, %v8060_v39  ;;  %v5058_v61 = vpop.eup %5057  ;;  %v1503_v20 = vsel %vm234_vm0, %v1325_v31, 0.0  ;;  %v8064_v39 = vld [vmem:[#allocation18_spill] sm:$0xff] }
 0x4ac   : > { %v1541_v43 = vmul.f32 0.03125, %v1385_v19  ;;  %v1323_v52 = vmul.f32 %v6847_v45, %v6847_v45  ;;  %v5060_v55 = vpop.eup %5059  ;;  %v583_v41 = vmul.f32 %v5058_v61, %v8061_v9  ;;  %v8065_v9 = vld [vmem:[#allocation73_spill] sm:$0xff] }
 0x4ad   : > { %v1787_v49 = vmul.f32 %v8049_v12, %v1719_v5  ;;  %v1730_v46 = vmul.f32 %v5060_v55, %v8062_v18 }
 0x4ae   : > { %v1605_v1 = vadd.f32 1e-05, %v1541_v43  ;;  %v1497_v48 = vsel %vm234_vm0, %v1323_v52, 0.0  ;;  %v603_v60 = vmul.f32 %v8053_v32, %v583_v41  ;;  %v1201_v52 = vmul.f32 0.03125, %v6813_v44  ;;  %v6880_v18 = vpop.xlane.xlu1 %1405 }
 0x4af   : > { %1498 = vadd.xlane.f32.xlu0 %v1497_v48  ;;  %v1118_v33 = vpop.xlane.xlu0 %1117  ;;  %v1865_v30 = vpack.c.bf16 %v1787_v49, %v1786_v22  ;;  %v1798_v22 = vmul.f32 %v8049_v12, %v1730_v46  ;;  %v1198_v44 = vmul.f32 0.03125, %v1124_v56 }
 0x4b0   : > { %v1196_v53 = vmul.f32 0.03125, %v1118_v33  ;;  %5067 = vrsqrt.f32 %v1605_v1  ;;  %v1848_v31 = vpack.c.bf16 %v603_v60, %v603_v60 }
 0x4b1   : > { %v1903_v16 = vsel %vm234_vm0, %v1865_v30, 0  ;;  %5069 = vrsqrt.f32 %v1609_v59 }
 0x4b2   : > { %v5062_v40 = vpop.eup %5061  ;;  %v6864_v37 = vsub.f32 %v8063_v0, %v1196_v53  ;;  %4645 = vmatpush3.bf16.xpose.msra.mxu0 %v1903_v16  ;;  %v8066_v53 = vld [vmem:[#allocation75_spill] sm:$0xff] }
 0x4b3   : > { %1504 = vadd.xlane.f32.xlu0 %v1503_v20  ;;  %v1394_v19 = vpop.xlane.xlu0 %1393  ;;  %v1731_v5 = vmul.f32 %v5062_v40, %v8064_v39  ;;  %4674 = vmatprep.subr.bf16.mxu0 %v8005_v58  ;;  %v5064_v61 = vpop.eup %5063  ;;  %v6878_v16 = vsub.f32 %v8066_v53, %v1201_v52  ;;  %v8067_v40 = vld [vmem:[#allocation69_spill] sm:$0xff]  ;;  %v8068_v20 = vld [vmem:[#allocation19_spill] sm:$0xff]  ;;  %v1542_v39 = vmul.f32 0.03125, %v6829_v34 }
 0x4b4   : > { %v1544_v21 = vmul.f32 0.03125, %v1394_v19  ;;  %v1324_v43 = vmul.f32 %v6864_v37, %v6864_v37  ;;  %v5066_v55 = vpop.eup %5065  ;;  %v586_v41 = vmul.f32 %v5064_v61, %v8065_v9 }
 0x4b5   : > { %v1799_v49 = vmul.f32 %v8049_v12, %v1731_v5  ;;  %v1732_v0 = vmul.f32 %v5066_v55, %v8067_v40 }
 0x4b6   : > { %v1608_v1 = vadd.f32 1e-05, %v1544_v21  ;;  %v1500_v48 = vsel %vm234_vm0, %v1324_v43, 0.0  ;;  %v606_v56 = vmul.f32 %v8053_v32, %v586_v41  ;;  %v8069_v43 = vld [vmem:[#allocation54_spill] sm:$0xff] }
 0x4b7   : > { %1501 = vadd.xlane.f32.xlu1 %v1500_v48  ;;  %v428_v33 = vpop.xlane.xlu0 %427  ;;  %v1871_v30 = vpack.c.bf16 %v1799_v49, %v1798_v22  ;;  %v8070_v22 = vld [vmem:[#allocation77_spill] sm:$0xff]  ;;  %v1800_v55 = vmul.f32 %v8049_v12, %v1732_v0  ;;  %v1202_v48 = vmul.f32 0.03125, %v1136_v29 }
 0x4b8   : > { %5071 = vrsqrt.f32 %v1608_v1  ;;  %v451_v59 = vmul.f32 0.03125, %v428_v33  ;;  %v6897_v49 = vsub.f32 %v8070_v22, %v1198_v44  ;;  %v1329_v1 = vmul.f32 %v6878_v16, %v6878_v16 }
 0x4b9   : > { %4647 = vmatmul.mubr.msk.bf16.vlgmr.msra.gmra.mrb[32].mxu0 %vm234_vm0, %v1848_v31  ;;  %v2050_v46 = vsel %vm234_vm0, %v1871_v30, 0  ;;  %v8071_v31 = vld [vmem:[#allocation48_spill] sm:$0xff]  ;;  %v1606_v30 = vadd.f32 1e-05, %v1542_v39  ;;  %v1851_v44 = vpack.c.bf16 %v606_v56, %v606_v56 }
 0x4ba   : > { %v6886_v60 = vsub.f32 %v8068_v20, %v451_v59  ;;  %4669 = vmatpush3.bf16.xpose.msra.mxu1 %v2050_v46  ;;  %4678 = vmatprep.mubr.msk.bf16.mxu0 %vm5373_vm1, %v8005_v58  ;;  %v5068_v19 = vpop.eup %5067  ;;  %v434_v59 = vpop.xlane.xlu1 %433  ;;  %v1515_v29 = vsel %vm234_vm0, %v1329_v1, 0.0  ;;  %v8075_v56 = vld [vmem:[#allocation20_spill] sm:$0xff]  ;;  %v1546_v1 = vmul.f32 0.03125, %v6853_v35 }
 0x4bb   : > { %v1130_v5 = vpop.xlane.xlu0 %1129  ;;  %4682 = vmatprep.subr.bf16.mxu1 %v8005_v58  ;;  %v1733_v52 = vmul.f32 %v5068_v19, %v8069_v43  ;;  %v5070_v34 = vpop.eup %5069  ;;  %v453_v46 = vmul.f32 0.03125, %v434_v59  ;;  %v1326_v19 = vmul.f32 %v6897_v49, %v6897_v49  ;;  %5073 = vrsqrt.f32 %v1606_v30 }
 0x4bc   : > { %v1200_v61 = vmul.f32 0.03125, %v1130_v5  ;;  %v483_v21 = vmul.f32 %v6886_v60, %v6886_v60  ;;  %v8072_v5 = vld [vmem:[#allocation71_spill] sm:$0xff] }
 0x4bd   : > { %v1801_v33 = vmul.f32 %v8049_v12, %v1733_v52 }
 0x4be   : > { %v6903_v9 = vsub.f32 %v8071_v31, %v1200_v61  ;;  %v523_v41 = vsel %vm234_vm0, %v483_v21, 0.0  ;;  %v1737_v61 = vmul.f32 %v5070_v34, %v8072_v5  ;;  %v8073_v21 = vld [vmem:[#allocation28_spill] sm:$0xff]  ;;  %v8076_v34 = vld [vmem:[#allocation55_spill] sm:$0xff] }
 0x4bf   : > { %524 = vadd.xlane.f32.xlu1 %v523_v41  ;;  %v431_v53 = vpop.xlane.xlu0 %430  ;;  %v1872_v0 = vpack.c.bf16 %v1801_v33, %v1800_v55  ;;  %v6915_v43 = vsub.f32 %v8073_v21, %v1202_v48  ;;  %v8077_v48 = vld [vmem:[#allocation37_spill] sm:$0xff] }
 0x4c0   : > { %v452_v40 = vmul.f32 0.03125, %v431_v53  ;;  %v1328_v20 = vmul.f32 %v6903_v9, %v6903_v9  ;;  %v6927_v33 = vsub.f32 %v8077_v48, %v453_v46  ;;  %v1805_v35 = vmul.f32 %v8049_v12, %v1737_v61 }
 0x4c1   : > { %4671 = vmatmul.mubr.msk.bf16.vlgmr.msra.gmra.mrb[8].mxu1 %vm234_vm0, %v1851_v44  ;;  %8074 = vst [vmem:[#allocation59_spill] sm:$0xff] %v6915_v43  ;;  %v2096_v22 = vsel %vm234_vm0, %v1872_v0, 0  ;;  %v1418_v44 = vpop.xlane.xlu1 %1417  ;;  %v1330_v46 = vmul.f32 %v6915_v43, %v6915_v43 }
 0x4c2   : > { %v5072_v39 = vpop.eup %5071  ;;  %v6918_v52 = vsub.f32 %v8075_v56, %v452_v40  ;;  %v1512_v55 = vsel %vm234_vm0, %v1328_v20, 0.0  ;;  %4686 = vmatprep.mubr.msk.bf16.mxu1 %vm5373_vm1, %v8005_v58  ;;  %4675 = vmatpush3.bf16.xpose.msra.mxu0 %v2096_v22  ;;  %v1506_v20 = vsel %vm234_vm0, %v1326_v19, 0.0  ;;  %v485_v56 = vmul.f32 %v6927_v33, %v6927_v33  ;;  %v8078_v22 = vld [vmem:[#allocation44_spill] sm:$0xff] }
 0x4c3   : > { %1516 = vadd.xlane.f32.xlu1 %v1515_v29  ;;  %v1391_v31 = vpop.xlane.xlu0 %1390  ;;  %v1736_v41 = vmul.f32 %v5072_v39, %v8076_v34  ;;  %1513 = vadd.xlane.f32.xlu0 %v1512_v55  ;;  %v1610_v29 = vadd.f32 1e-05, %v1546_v1  ;;  %v1518_v19 = vsel %vm234_vm0, %v1330_v46, 0.0 }
 0x4c4   : > { %v1543_v59 = vmul.f32 0.03125, %v1391_v31  ;;  %v484_v53 = vmul.f32 %v6918_v52, %v6918_v52  ;;  %4676 = vmatprep.subr.bf16.mxu0 %v8005_v58  ;;  %v529_v48 = vsel %vm234_vm0, %v485_v56, 0.0 }
 0x4c5   : > { %v1804_v40 = vmul.f32 %v8049_v12, %v1736_v41  ;;  %v437_v31 = vpop.xlane.xlu1 %436 }
 0x4c6   : > { %v1607_v0 = vadd.f32 1e-05, %v1543_v59  ;;  %v526_v30 = vsel %vm234_vm0, %v484_v53, 0.0  ;;  %v454_v34 = vmul.f32 0.03125, %v437_v31  ;;  %v1548_v53 = vmul.f32 0.03125, %v6880_v18  ;;  %v8084_v31 = vld [vmem:[#allocation51_spill] sm:$0xff] }
 0x4c7   : > { %1507 = vadd.xlane.f32.xlu1 %v1506_v20  ;;  %v1127_v5 = vpop.xlane.xlu0 %1126  ;;  %v1874_v39 = vpack.c.bf16 %v1805_v35, %v1804_v40  ;;  %527 = vadd.xlane.f32.xlu0 %v526_v30  ;;  %v5074_v40 = vpop.eup %5073  ;;  %v8079_v30 = vld [vmem:[#allocation38_spill] sm:$0xff] }
 0x4c8   : > { %5075 = vrsqrt.f32 %v1607_v0  ;;  %v1199_v21 = vmul.f32 0.03125, %v1127_v5  ;;  %v6952_v46 = vsub.f32 %v8079_v30, %v454_v34  ;;  %v1612_v5 = vadd.f32 1e-05, %v1548_v53 }
 0x4c9   : > { %v2145_v61 = vsel %vm234_vm0, %v1874_v39, 0  ;;  %5077 = vrsqrt.f32 %v1610_v29  ;;  %v8081_v39 = vld [vmem:[#allocation74_spill] sm:$0xff] }
 0x4ca   : > { %v6942_v55 = vsub.f32 %v8078_v22, %v1199_v21  ;;  %4683 = vmatpush3.bf16.xpose.msra.mxu1 %v2145_v61  ;;  %8080 = vst [vmem:[#allocation34_spill] sm:$0xff] %v6952_v46  ;;  %v1734_v21 = vmul.f32 %v5074_v40, %v8081_v39  ;;  %v1412_v61 = vpop.xlane.xlu1 %1411  ;;  %v8082_v22 = vld [vmem:[#allocation30_spill] sm:$0xff]  ;;  %v486_v34 = vmul.f32 %v6952_v46, %v6952_v46 }
 0x4cb   : > { %1519 = vadd.xlane.f32.xlu1 %v1518_v19  ;;  %v1403_v1 = vpop.xlane.xlu0 %1402  ;;  %4684 = vmatprep.subr.bf16.mxu1 %v8005_v58 }
 0x4cc   : > { %v1547_v41 = vmul.f32 0.03125, %v1403_v1  ;;  %v1327_v59 = vmul.f32 %v6942_v55, %v6942_v55  ;;  %v1802_v53 = vmul.f32 %v8049_v12, %v1734_v21 }
 0x4ce   : > { %v1611_v35 = vadd.f32 1e-05, %v1547_v41  ;;  %v1509_v0 = vsel %vm234_vm0, %v1327_v59, 0.0  ;;  %v1424_v39 = vpop.xlane.xlu1 %1423 }
 0x4cf   : > { %530 = vadd.xlane.f32.xlu1 %v529_v48  ;;  %1510 = vadd.xlane.f32.xlu0 %v1509_v0  ;;  %v1139_v20 = vpop.xlane.xlu0 %1138 }
 0x4d0   : > { %5079 = vrsqrt.f32 %v1611_v35  ;;  %v1203_v29 = vmul.f32 0.03125, %v1139_v20  ;;  %v1552_v35 = vmul.f32 0.03125, %v1418_v44  ;;  %v1550_v44 = vmul.f32 0.03125, %v1412_v61 }
 0x4d1   : > { %5081 = vrsqrt.f32 %v1612_v5 }
 0x4d2   : > { %v5076_v56 = vpop.eup %5075  ;;  %v6956_v19 = vsub.f32 %v8082_v22, %v1203_v29  ;;  %v532_v22 = vsel %vm234_vm0, %v486_v34, 0.0  ;;  %v1616_v21 = vadd.f32 1e-05, %v1552_v35  ;;  %v1614_v35 = vadd.f32 1e-05, %v1550_v44 }
 0x4d3   : > { %v1409_v18 = vpop.xlane.xlu0 %1408  ;;  %v1735_v1 = vmul.f32 %v5076_v56, %v8084_v31  ;;  %v5078_v59 = vpop.eup %5077  ;;  %v8085_v31 = vld [vmem:[#allocation76_spill] sm:$0xff] }
 0x4d4   : > { %8083 = vst [vmem:[#allocation16_spill] sm:$0xff] %v6956_v19  ;;  %v1549_v41 = vmul.f32 0.03125, %v1409_v18  ;;  %v1331_v48 = vmul.f32 %v6956_v19, %v6956_v19  ;;  %v1738_v5 = vmul.f32 %v5078_v59, %v8085_v31 }
 0x4d5   : > { %v1803_v40 = vmul.f32 %v8049_v12, %v1735_v1 }
 0x4d6   : > { %v1613_v0 = vadd.f32 1e-05, %v1549_v41  ;;  %v1521_v20 = vsel %vm234_vm0, %v1331_v48, 0.0  ;;  %v8086_v41 = vld [vmem:[#allocation26_spill] sm:$0xff]  ;;  %v1806_v34 = vmul.f32 %v8049_v12, %v1738_v5 }
 0x4d7   : > { %1522 = vadd.xlane.f32.xlu0 %v1521_v20  ;;  %v501_v30 = vpop.xlane.xlu0 %500  ;;  %v1873_v29 = vpack.c.bf16 %v1803_v40, %v1802_v53 }
 0x4d8   : > { %5083 = vrsqrt.f32 %v1613_v0  ;;  %v539_v56 = vmul.f32 0.03125, %v501_v30  ;;  %v1554_v30 = vmul.f32 0.03125, %v1424_v39 }
 0x4d9   : > { %v2099_v18 = vsel %vm234_vm0, %v1873_v29, 0 }
 0x4da   : > { %v5080_v46 = vpop.eup %5079  ;;  %v555_v19 = vadd.f32 1e-05, %v539_v56  ;;  %4677 = vmatpush3.bf16.xpose.msra.mxu0 %v2099_v18 }
 0x4db   : > { %533 = vadd.xlane.f32.xlu0 %v532_v22  ;;  %v1421_v1 = vpop.xlane.xlu0 %1420  ;;  %v1739_v48 = vmul.f32 %v5080_v46, %v8086_v41  ;;  %4690 = vmatprep.subr.bf16.mxu0 %v8005_v58  ;;  %v5082_v20 = vpop.eup %5081  ;;  %v1618_v41 = vadd.f32 1e-05, %v1554_v30 }
 0x4dc   : > { %5085 = vrsqrt.f32 %v555_v19  ;;  %v1553_v53 = vmul.f32 0.03125, %v1421_v1  ;;  %v1430_v40 = vpop.xlane.xlu1 %1429  ;;  %v8087_v1 = vld [vmem:[#allocation60_spill] sm:$0xff] }
 0x4dd   : > { %v1807_v0 = vmul.f32 %v8049_v12, %v1739_v48  ;;  %5087 = vrsqrt.f32 %v1616_v21  ;;  %v1740_v5 = vmul.f32 %v5082_v20, %v8087_v1  ;;  %v1556_v21 = vmul.f32 0.03125, %v1430_v40 }
 0x4de   : > { %v1617_v59 = vadd.f32 1e-05, %v1553_v53  ;;  %v8088_v53 = vld [vmem:[#allocation50_spill] sm:$0xff] }
 0x4df   : > { %v504_v29 = vpop.xlane.xlu0 %503  ;;  %v1875_v61 = vpack.c.bf16 %v1807_v0, %v1806_v34  ;;  %v1620_v20 = vadd.f32 1e-05, %v1556_v21  ;;  %v1808_v40 = vmul.f32 %v8049_v12, %v1740_v5 }
 0x4e0   : > { %5089 = vrsqrt.f32 %v1617_v59  ;;  %v540_v56 = vmul.f32 0.03125, %v504_v29  ;;  %v507_v22 = vpop.xlane.xlu1 %506 }
 0x4e1   : > { %v541_v46 = vmul.f32 0.03125, %v507_v22  ;;  %v2148_v18 = vsel %vm234_vm0, %v1875_v61, 0  ;;  %5091 = vrsqrt.f32 %v1614_v35 }
 0x4e2   : > { %v5084_v19 = vpop.eup %5083  ;;  %v556_v31 = vadd.f32 1e-05, %v540_v56  ;;  %4685 = vmatpush3.bf16.xpose.msra.mxu1 %v2148_v18  ;;  %v8089_v56 = vld [vmem:[#allocation52_spill] sm:$0xff] }
 0x4e3   : > { %v1415_v48 = vpop.xlane.xlu0 %1414  ;;  %v1741_v44 = vmul.f32 %v5084_v19, %v8088_v53  ;;  %4698 = vmatprep.subr.bf16.mxu1 %v8005_v58  ;;  %v557_v0 = vadd.f32 1e-05, %v541_v46 }
 0x4e4   : > { %5093 = vrsqrt.f32 %v556_v31  ;;  %v1551_v39 = vmul.f32 0.03125, %v1415_v48  ;;  %v1445_v34 = vpop.xlane.xlu1 %1444 }
 0x4e5   : > { %v1809_v59 = vmul.f32 %v8049_v12, %v1741_v44  ;;  %5095 = vrsqrt.f32 %v1618_v41  ;;  %v1561_v48 = vmul.f32 0.03125, %v1445_v34 }
 0x4e6   : > { %v5086_v29 = vpop.eup %5085  ;;  %v1615_v61 = vadd.f32 1e-05, %v1551_v39  ;;  %v8090_v39 = vld [vmem:[#allocation39_spill] sm:$0xff] }
 0x4e7   : > { %v587_v22 = vmul.f32 %v5086_v29, %v8089_v56  ;;  %v1427_v35 = vpop.xlane.xlu0 %1426  ;;  %v5088_v30 = vpop.eup %5087  ;;  %v1876_v1 = vpack.c.bf16 %v1809_v59, %v1808_v40  ;;  %v1625_v34 = vadd.f32 1e-05, %v1561_v48  ;;  %v8091_v40 = vld [vmem:[#allocation14_spill] sm:$0xff] }
 0x4e8   : > { %5097 = vrsqrt.f32 %v1615_v61  ;;  %v1555_v18 = vmul.f32 0.03125, %v1427_v35  ;;  %v1436_v19 = vpop.xlane.xlu1 %1435  ;;  %v1744_v29 = vmul.f32 %v5088_v30, %v8090_v39 }
 0x4e9   : > { %5099 = vrsqrt.f32 %v557_v0  ;;  %v607_v31 = vmul.f32 %v8053_v32, %v587_v22  ;;  %v2194_v0 = vsel %vm234_vm0, %v1876_v1, 0  ;;  %v1558_v35 = vmul.f32 0.03125, %v1436_v19  ;;  %v8092_v19 = vld [vmem:[#allocation43_spill] sm:$0xff] }
 0x4ea   : > { %v5090_v46 = vpop.eup %5089  ;;  %v1619_v53 = vadd.f32 1e-05, %v1555_v18  ;;  %5101 = vrsqrt.f32 %v1620_v20  ;;  %v1812_v18 = vmul.f32 %v8049_v12, %v1744_v29 }
 0x4eb   : > { %v1433_v44 = vpop.xlane.xlu0 %1432  ;;  %v1852_v41 = vpack.c.bf16 %v607_v31, %v607_v31  ;;  %v1745_v21 = vmul.f32 %v5090_v46, %v6538_v25  ;;  %v5092_v61 = vpop.eup %5091  ;;  %v1622_v39 = vadd.f32 1e-05, %v1558_v35  ;;  %v8093_v35 = vld [vmem:[#allocation45_spill] sm:$0xff] }
 0x4ec   : > { %5103 = vrsqrt.f32 %v1619_v53  ;;  %v1557_v5 = vmul.f32 0.03125, %v1433_v44  ;;  %v1448_v56 = vpop.xlane.xlu1 %1447  ;;  %v1742_v44 = vmul.f32 %v5092_v61, %v8092_v19 }
 0x4ed   : > { %4679 = vmatmul.mubr.msk.bf16.vlgmr.msra.gmra.mrb[36].mxu0 %vm234_vm0, %v1852_v41  ;;  %v1813_v59 = vmul.f32 %v8049_v12, %v1745_v21 }
 0x4ee   : > { %v5094_v22 = vpop.eup %5093  ;;  %v1621_v20 = vadd.f32 1e-05, %v1557_v5  ;;  %4691 = vmatpush3.bf16.xpose.msra.mxu0 %v2194_v0  ;;  %4694 = vmatprep.mubr.msk.bf16.mxu0 %vm5373_vm1, %v8005_v58  ;;  %v1562_v0 = vmul.f32 0.03125, %v1448_v56  ;;  %v1810_v61 = vmul.f32 %v8049_v12, %v1742_v44  ;;  %v8094_v56 = vld [vmem:[#allocation53_spill] sm:$0xff] }
 0x4ef   : > { %v588_v25 = vmul.f32 %v5094_v22, %v8091_v40  ;;  %v1442_v30 = vpop.xlane.xlu0 %1441  ;;  %4692 = vmatprep.subr.bf16.mxu0 %v8005_v58  ;;  %v5096_v46 = vpop.eup %5095  ;;  %v1878_v48 = vpack.c.bf16 %v1813_v59, %v1812_v18 }
 0x4f0   : > { %5105 = vrsqrt.f32 %v1621_v20  ;;  %v1560_v31 = vmul.f32 0.03125, %v1442_v30  ;;  %v1454_v1 = vpop.xlane.xlu1 %1453  ;;  %v1626_v19 = vadd.f32 1e-05, %v1562_v0 }
 0x4f1   : > { %v608_v53 = vmul.f32 %v8053_v32, %v588_v25  ;;  %5107 = vrsqrt.f32 %v1625_v34  ;;  %v2243_v59 = vsel %vm234_vm0, %v1878_v48, 0  ;;  %v1746_v25 = vmul.f32 %v5096_v46, %v8093_v35 }
 0x4f2   : > { %v5098_v41 = vpop.eup %5097  ;;  %v1624_v21 = vadd.f32 1e-05, %v1560_v31 }
 0x4f3   : > { %v5100_v5 = vpop.eup %5099  ;;  %v510_v22 = vpop.xlane.xlu0 %509  ;;  %v1853_v40 = vpack.c.bf16 %v608_v53, %v608_v53  ;;  %v1743_v29 = vmul.f32 %v5098_v41, %v6567_v13  ;;  %v1564_v41 = vmul.f32 0.03125, %v1454_v1 }
 0x4f4   : > { %5109 = vrsqrt.f32 %v1624_v21  ;;  %v542_v20 = vmul.f32 0.03125, %v510_v22  ;;  %v513_v30 = vpop.xlane.xlu1 %512  ;;  %v5102_v43 = vpop.eup %5101  ;;  %v589_v31 = vmul.f32 %v5100_v5, %v8094_v56 }
 0x4f5   : > { %4687 = vmatmul.mubr.msk.bf16.vlgmr.msra.gmra.mrb[12].mxu1 %vm234_vm0, %v1853_v40  ;;  %v1811_v34 = vmul.f32 %v8049_v12, %v1743_v29  ;;  %5111 = vrsqrt.f32 %v1622_v39  ;;  %v543_v13 = vmul.f32 0.03125, %v513_v30  ;;  %v1814_v39 = vmul.f32 %v8049_v12, %v1746_v25  ;;  %v8095_v40 = vld [vmem:[#allocation15_spill] sm:$0xff] }
 0x4f6   : > { %v5104_v18 = vpop.eup %5103  ;;  %v558_v53 = vadd.f32 1e-05, %v542_v20  ;;  %4699 = vmatpush3.bf16.xpose.msra.mxu1 %v2243_v59  ;;  %4702 = vmatprep.mubr.msk.bf16.mxu1 %vm5373_vm1, %v8005_v58  ;;  %v1748_v29 = vmul.f32 %v5102_v43, %v8095_v40  ;;  %v609_v1 = vmul.f32 %v8053_v32, %v589_v31  ;;  %v1628_v59 = vadd.f32 1e-05, %v1564_v41 }
 0x4f7   : > { %v1439_v21 = vpop.xlane.xlu0 %1438  ;;  %v1877_v48 = vpack.c.bf16 %v1811_v34, %v1810_v61  ;;  %4700 = vmatprep.subr.bf16.mxu1 %v8005_v58  ;;  %v1747_v44 = vmul.f32 %v5104_v18, %v6580_v26  ;;  %v559_v30 = vadd.f32 1e-05, %v543_v13 }
 0x4f8   : > { %5113 = vrsqrt.f32 %v558_v53  ;;  %v1559_v46 = vmul.f32 0.03125, %v1439_v21  ;;  %v1816_v43 = vmul.f32 %v8049_v12, %v1748_v29  ;;  %v1854_v13 = vpack.c.bf16 %v609_v1, %v609_v1 }
 0x4f9   : > { %v2197_v22 = vsel %vm234_vm0, %v1877_v48, 0  ;;  %v1815_v5 = vmul.f32 %v8049_v12, %v1747_v44  ;;  %5115 = vrsqrt.f32 %v1626_v19 }
 0x4fa   : > { %v5106_v20 = vpop.eup %5105  ;;  %v1623_v0 = vadd.f32 1e-05, %v1559_v46  ;;  %4693 = vmatpush3.bf16.xpose.msra.mxu0 %v2197_v22 }
 0x4fb   : > { %v1451_v61 = vpop.xlane.xlu0 %1450  ;;  %v1879_v26 = vpack.c.bf16 %v1815_v5, %v1814_v39  ;;  %4706 = vmatprep.subr.bf16.mxu0 %v8005_v58  ;;  %v1749_v34 = vmul.f32 %v5106_v20, %v6594_v38  ;;  %v5108_v35 = vpop.eup %5107  ;;  %v8096_v20 = vld [vmem:[#allocation56_spill] sm:$0xff] }
 0x4fc   : > { %5117 = vrsqrt.f32 %v1623_v0  ;;  %v1563_v25 = vmul.f32 0.03125, %v1451_v61  ;;  %v1753_v21 = vmul.f32 %v5108_v35, %v6571_v11 }
 0x4fd   : > { %v2246_v18 = vsel %vm234_vm0, %v1879_v26, 0  ;;  %v1817_v56 = vmul.f32 %v8049_v12, %v1749_v34  ;;  %5119 = vrsqrt.f32 %v559_v30 }
 0x4fe   : > { %v5110_v53 = vpop.eup %5109  ;;  %v1627_v31 = vadd.f32 1e-05, %v1563_v25  ;;  %4701 = vmatpush3.bf16.xpose.msra.mxu1 %v2246_v18  ;;  %5121 = vrsqrt.f32 %v1628_v59  ;;  %v1821_v11 = vmul.f32 %v8049_v12, %v1753_v21 }
 0x4ff   : > { %v1457_v19 = vpop.xlane.xlu0 %1456  ;;  %v1880_v41 = vpack.c.bf16 %v1817_v56, %v1816_v43  ;;  %4714 = vmatprep.subr.bf16.mxu1 %v8005_v58  ;;  %v1752_v38 = vmul.f32 %v5110_v53, %v6609_v3  ;;  %v5112_v48 = vpop.eup %5111  ;;  %v8097_v53 = vld [vmem:[#allocation58_spill] sm:$0xff] }
 0x500   : > { %5123 = vrsqrt.f32 %v1627_v31  ;;  %v1565_v44 = vmul.f32 0.03125, %v1457_v19  ;;  %v1750_v30 = vmul.f32 %v5112_v48, %v8096_v20 }
 0x501   : > { %4695 = vmatmul.mubr.msk.bf16.vlgmr.msra.gmra.mrb[40].mxu0 %vm234_vm0, %v1854_v13  ;;  %v2292_v46 = vsel %vm234_vm0, %v1880_v41, 0  ;;  %v1820_v22 = vmul.f32 %v8049_v12, %v1752_v38 }
 0x502   : > { %v5114_v39 = vpop.eup %5113  ;;  %v1629_v5 = vadd.f32 1e-05, %v1565_v44  ;;  %4707 = vmatpush3.bf16.xpose.msra.mxu0 %v2292_v46  ;;  %4710 = vmatprep.mubr.msk.bf16.mxu0 %vm5373_vm1, %v8005_v58  ;;  %v1818_v56 = vmul.f32 %v8049_v12, %v1750_v30 }
 0x503   : > { %v590_v40 = vmul.f32 %v5114_v39, %v6628_v51  ;;  %v1466_v3 = vpop.xlane.xlu0 %1465  ;;  %4708 = vmatprep.subr.bf16.mxu0 %v8005_v58  ;;  %v5116_v0 = vpop.eup %5115  ;;  %v1882_v59 = vpack.c.bf16 %v1821_v11, %v1820_v22  ;;  %v8098_v11 = vld [vmem:[#allocation57_spill] sm:$0xff] }
 0x504   : > { %5125 = vrsqrt.f32 %v1629_v5  ;;  %v1568_v29 = vmul.f32 0.03125, %v1466_v3  ;;  %v1754_v31 = vmul.f32 %v5116_v0, %v8097_v53 }
 0x505   : > { %v610_v1 = vmul.f32 %v8053_v32, %v590_v40  ;;  %v2341_v41 = vsel %vm234_vm0, %v1882_v59, 0 }
 0x506   : > { %v5118_v61 = vpop.eup %5117  ;;  %v1632_v26 = vadd.f32 1e-05, %v1568_v29  ;;  %v1822_v3 = vmul.f32 %v8049_v12, %v1754_v31 }
 0x507   : > { %v516_v34 = vpop.xlane.xlu0 %515  ;;  %v1855_v35 = vpack.c.bf16 %v610_v1, %v610_v1  ;;  %v1751_v25 = vmul.f32 %v5118_v61, %v6642_v28  ;;  %v5120_v51 = vpop.eup %5119 }
 0x508   : > { %v544_v18 = vmul.f32 0.03125, %v516_v34  ;;  %v1469_v43 = vpop.xlane.xlu1 %1468  ;;  %v5122_v13 = vpop.eup %5121  ;;  %5127 = vrsqrt.f32 %v1632_v26  ;;  %v591_v28 = vmul.f32 %v5120_v51, %v6623_v23 }
 0x509   : > { %v1569_v19 = vmul.f32 0.03125, %v1469_v43  ;;  %4703 = vmatmul.mubr.msk.bf16.vlgmr.msra.gmra.mrb[16].mxu1 %vm234_vm0, %v1855_v35  ;;  %v1819_v38 = vmul.f32 %v8049_v12, %v1751_v25  ;;  %v1756_v29 = vmul.f32 %v5122_v13, %v8098_v11 }
 0x50a   : > { %v5124_v21 = vpop.eup %5123  ;;  %v560_v48 = vadd.f32 1e-05, %v544_v18  ;;  %4715 = vmatpush3.bf16.xpose.msra.mxu1 %v2341_v41  ;;  %4718 = vmatprep.mubr.msk.bf16.mxu1 %vm5373_vm1, %v8005_v58 }
 0x50b   : > { %v1633_v44 = vadd.f32 1e-05, %v1569_v19  ;;  %v1463_v46 = vpop.xlane.xlu0 %1462  ;;  %v1881_v22 = vpack.c.bf16 %v1819_v38, %v1818_v56  ;;  %4716 = vmatprep.subr.bf16.mxu1 %v8005_v58  ;;  %v1755_v39 = vmul.f32 %v5124_v21, %v6657_v8  ;;  %v611_v8 = vmul.f32 %v8053_v32, %v591_v28 }
 0x50c   : > { %5129 = vrsqrt.f32 %v560_v48  ;;  %v1567_v5 = vmul.f32 0.03125, %v1463_v46  ;;  %v1460_v40 = vpop.xlane.xlu1 %1459  ;;  %v1824_v51 = vmul.f32 %v8049_v12, %v1756_v29 }
 0x50d   : > { %5131 = vrsqrt.f32 %v1633_v44  ;;  %v1566_v20 = vmul.f32 0.03125, %v1460_v40  ;;  %v2295_v30 = vsel %vm234_vm0, %v1881_v22, 0  ;;  %v1823_v23 = vmul.f32 %v8049_v12, %v1755_v39 }
 0x50e   : > { %v5126_v0 = vpop.eup %5125  ;;  %v1631_v1 = vadd.f32 1e-05, %v1567_v5  ;;  %4709 = vmatpush3.bf16.xpose.msra.mxu0 %v2295_v30  ;;  %v1856_v53 = vpack.c.bf16 %v611_v8, %v611_v8 }
 0x50f   : > { %v1630_v59 = vadd.f32 1e-05, %v1566_v20  ;;  %v1475_v61 = vpop.xlane.xlu0 %1474  ;;  %v1883_v26 = vpack.c.bf16 %v1823_v23, %v1822_v3  ;;  %4722 = vmatprep.subr.bf16.mxu0 %v8005_v58  ;;  %v1757_v34 = vmul.f32 %v5126_v0, %v6666_v15 }
 0x510   : > { %5133 = vrsqrt.f32 %v1631_v1  ;;  %v1571_v35 = vmul.f32 0.03125, %v1475_v61 }
 0x511   : > { %5135 = vrsqrt.f32 %v1630_v59  ;;  %v2344_v25 = vsel %vm234_vm0, %v1883_v26, 0  ;;  %v1825_v18 = vmul.f32 %v8049_v12, %v1757_v34 }
 0x512   : > { %v1635_v43 = vadd.f32 1e-05, %v1571_v35  ;;  %4717 = vmatpush3.bf16.xpose.msra.mxu1 %v2344_v25  ;;  %v5128_v56 = vpop.eup %5127 }
 0x513   : > { %v1884_v31 = vpack.c.bf16 %v1825_v18, %v1824_v51  ;;  %4730 = vmatprep.subr.bf16.mxu1 %v8005_v58  ;;  %v1760_v38 = vmul.f32 %v5128_v56, %v6671_v24  ;;  %v1481_v28 = vpop.xlane.xlu0 %1480 }
 0x514   : > { %v1472_v13 = vpop.xlane.xlu1 %1471  ;;  %5137 = vrsqrt.f32 %v1635_v43  ;;  %v1573_v3 = vmul.f32 0.03125, %v1481_v28 }
 0x515   : > { %4711 = vmatmul.mubr.msk.bf16.vlgmr.msra.gmra.mrb[44].mxu0 %vm234_vm0, %v1856_v53  ;;  %v2390_v15 = vsel %vm234_vm0, %v1884_v31, 0  ;;  %v1570_v41 = vmul.f32 0.03125, %v1472_v13  ;;  %v1828_v5 = vmul.f32 %v8049_v12, %v1760_v38 }
 0x516   : > { %v5130_v19 = vpop.eup %5129  ;;  %4723 = vmatpush3.bf16.xpose.msra.mxu0 %v2390_v15  ;;  %4726 = vmatprep.mubr.msk.bf16.mxu0 %vm5373_vm1, %v8005_v58  ;;  %v1637_v59 = vadd.f32 1e-05, %v1573_v3 }
 0x517   : > { %v5132_v21 = vpop.eup %5131  ;;  %v592_v48 = vmul.f32 %v5130_v19, %v6682_v57  ;;  %4724 = vmatprep.subr.bf16.mxu0 %v8005_v58  ;;  %v1634_v44 = vadd.f32 1e-05, %v1570_v41 }
 0x518   : > { %v1761_v46 = vmul.f32 %v5132_v21, %v6699_v10 }
 0x519   : > { %v612_v22 = vmul.f32 %v8053_v32, %v592_v48  ;;  %5139 = vrsqrt.f32 %v1634_v44 }
 0x51a   : > { %v5134_v39 = vpop.eup %5133  ;;  %v1829_v24 = vmul.f32 %v8049_v12, %v1761_v46 }
 0x51b   : > { %v5136_v40 = vpop.eup %5135  ;;  %v1857_v11 = vpack.c.bf16 %v612_v22, %v612_v22  ;;  %v1759_v29 = vmul.f32 %v5134_v39, %v6692_v42 }
 0x51c   : > { %v1478_v57 = vpop.xlane.xlu1 %1477  ;;  %v1886_v20 = vpack.c.bf16 %v1829_v24, %v1828_v5  ;;  %v1758_v30 = vmul.f32 %v5136_v40, %v6715_v27 }
 0x51d   : > { %v1572_v23 = vmul.f32 0.03125, %v1478_v57  ;;  %4719 = vmatmul.mubr.msk.bf16.vlgmr.msra.gmra.mrb[20].mxu1 %vm234_vm0, %v1857_v11  ;;  %v1827_v10 = vmul.f32 %v8049_v12, %v1759_v29 }
 0x51e   : > { %v2439_v0 = vsel %vm234_vm0, %v1886_v20, 0  ;;  %v1826_v1 = vmul.f32 %v8049_v12, %v1758_v30  ;;  %4734 = vmatprep.mubr.msk.bf16.mxu1 %vm5373_vm1, %v8005_v58  ;;  %v5138_v42 = vpop.eup %5137 }
 0x51f   : > { %v1636_v61 = vadd.f32 1e-05, %v1572_v23  ;;  %4731 = vmatpush3.bf16.xpose.msra.mxu1 %v2439_v0  ;;  %v1763_v8 = vmul.f32 %v5138_v42, %v6708_v63 }
 0x520   : > { %v1885_v26 = vpack.c.bf16 %v1827_v10, %v1826_v1  ;;  %4732 = vmatprep.subr.bf16.mxu1 %v8005_v58 }
 0x521   : > { %5141 = vrsqrt.f32 %v1636_v61  ;;  %v1831_v56 = vmul.f32 %v8049_v12, %v1763_v8 }
 0x522   : > { %v2393_v27 = vsel %vm234_vm0, %v1885_v26, 0  ;;  %5143 = vrsqrt.f32 %v1637_v59 }
 0x523   : > { %4725 = vmatpush3.bf16.xpose.msra.mxu0 %v2393_v27  ;;  %v5140_v34 = vpop.eup %5139 }
 0x524   : > { %v519_v35 = vpop.xlane.xlu1 %518  ;;  %4738 = vmatprep.subr.bf16.mxu0 %v8005_v58  ;;  %v1762_v51 = vmul.f32 %v5140_v34, %v6740_v50 }
 0x525   : > { %v545_v25 = vmul.f32 0.03125, %v519_v35 }
 0x526   : > { %v1830_v43 = vmul.f32 %v8049_v12, %v1762_v51 }
 0x527   : > { %v561_v18 = vadd.f32 1e-05, %v545_v25 }
 0x528   : > { %v1493_v53 = vpop.xlane.xlu1 %1492  ;;  %v1490_v13 = vpop.xlane.xlu0 %1489  ;;  %v1887_v15 = vpack.c.bf16 %v1831_v56, %v1830_v43 }
 0x529   : > { %5145 = vrsqrt.f32 %v561_v18  ;;  %v1577_v31 = vmul.f32 0.03125, %v1493_v53  ;;  %v1576_v19 = vmul.f32 0.03125, %v1490_v13 }
 0x52a   : > { %v2442_v38 = vsel %vm234_vm0, %v1887_v15, 0 }
 0x52b   : > { %v5142_v41 = vpop.eup %5141  ;;  %v1641_v63 = vadd.f32 1e-05, %v1577_v31  ;;  %v1640_v21 = vadd.f32 1e-05, %v1576_v19  ;;  %4733 = vmatpush3.bf16.xpose.msra.mxu1 %v2442_v38 }
 0x52c   : > { %v1484_v48 = vpop.xlane.xlu1 %1483  ;;  %v5144_v28 = vpop.eup %5143  ;;  %4746 = vmatprep.subr.bf16.mxu1 %v8005_v58  ;;  %v1764_v22 = vmul.f32 %v5142_v41, %v6758_v17 }
 0x52d   : > { %5147 = vrsqrt.f32 %v1641_v63  ;;  %v1574_v50 = vmul.f32 0.03125, %v1484_v48  ;;  %v522_v44 = vpop.xlane.xlu0 %521  ;;  %v1765_v5 = vmul.f32 %v5144_v28, %v6725_v62 }
 0x52e   : > { %5149 = vrsqrt.f32 %v1640_v21  ;;  %v546_v46 = vmul.f32 0.03125, %v522_v44  ;;  %v1832_v3 = vmul.f32 %v8049_v12, %v1764_v22 }
 0x52f   : > { %v1638_v24 = vadd.f32 1e-05, %v1574_v50  ;;  %v1833_v20 = vmul.f32 %v8049_v12, %v1765_v5 }
 0x530   : > { %v562_v39 = vadd.f32 1e-05, %v546_v46  ;;  %v1496_v40 = vpop.xlane.xlu1 %1495 }
 0x531   : > { %v1578_v30 = vmul.f32 0.03125, %v1496_v40  ;;  %v1888_v17 = vpack.c.bf16 %v1833_v20, %v1832_v3 }
 0x532   : > { %5151 = vrsqrt.f32 %v562_v39 }
 0x533   : > { %v5146_v11 = vpop.eup %5145  ;;  %5153 = vrsqrt.f32 %v1638_v24  ;;  %v1642_v42 = vadd.f32 1e-05, %v1578_v30 }
 0x534   : > { %v593_v29 = vmul.f32 %v5146_v11, %v6777_v54  ;;  %v1487_v57 = vpop.xlane.xlu0 %1486  ;;  %v2488_v54 = vsel %vm234_vm0, %v1888_v17, 0 }
 0x535   : > { %v1575_v23 = vmul.f32 0.03125, %v1487_v57 }
 0x536   : > { %v613_v10 = vmul.f32 %v8053_v32, %v593_v29 }
 0x537   : > { %v5148_v0 = vpop.eup %5147  ;;  %v1639_v1 = vadd.f32 1e-05, %v1575_v23 }
 0x538   : > { %v5150_v62 = vpop.eup %5149  ;;  %v1858_v59 = vpack.c.bf16 %v613_v10, %v613_v10  ;;  %v1769_v61 = vmul.f32 %v5148_v0, %v6771_v6 }
 0x539   : > { %5155 = vrsqrt.f32 %v1639_v1  ;;  %v1768_v26 = vmul.f32 %v5150_v62, %v6795_v4 }
 0x53a   : > { %4727 = vmatmul.mubr.msk.bf16.vlgmr.msra.gmra.mrb[48].mxu0 %vm234_vm0, %v1858_v59  ;;  %v1837_v8 = vmul.f32 %v8049_v12, %v1769_v61  ;;  %5157 = vrsqrt.f32 %v1642_v42 }
 0x53b   : > { %4739 = vmatpush3.bf16.xpose.msra.mxu0 %v2488_v54  ;;  %v1836_v27 = vmul.f32 %v8049_v12, %v1768_v26  ;;  %4742 = vmatprep.mubr.msk.bf16.mxu0 %vm5373_vm1, %v8005_v58 }
 0x53c   : > { %v5152_v34 = vpop.eup %5151  ;;  %v1499_v35 = vpop.xlane.xlu0 %1498  ;;  %4740 = vmatprep.subr.bf16.mxu0 %v8005_v58 }
 0x53d   : > { %v594_v6 = vmul.f32 %v5152_v34, %v6810_v14  ;;  %v1579_v4 = vmul.f32 0.03125, %v1499_v35  ;;  %v5154_v25 = vpop.eup %5153  ;;  %v1890_v43 = vpack.c.bf16 %v1837_v8, %v1836_v27 }
 0x53e   : > { %v1766_v31 = vmul.f32 %v5154_v25, %v6787_v36 }
 0x53f   : > { %v1643_v51 = vadd.f32 1e-05, %v1579_v4  ;;  %v614_v18 = vmul.f32 %v8053_v32, %v594_v6  ;;  %v2537_v19 = vsel %vm234_vm0, %v1890_v43, 0 }
 0x540   : > { %v1505_v56 = vpop.xlane.xlu0 %1504  ;;  %v1834_v38 = vmul.f32 %v8049_v12, %v1766_v31 }
 0x541   : > { %5159 = vrsqrt.f32 %v1643_v51  ;;  %v1859_v53 = vpack.c.bf16 %v614_v18, %v614_v18  ;;  %v1581_v15 = vmul.f32 0.03125, %v1505_v56 }
 0x543   : > { %v5156_v13 = vpop.eup %5155  ;;  %4735 = vmatmul.mubr.msk.bf16.vlgmr.msra.gmra.mrb[24].mxu1 %vm234_vm0, %v1859_v53  ;;  %v1645_v48 = vadd.f32 1e-05, %v1581_v15 }
 0x544   : > { %4747 = vmatpush3.bf16.xpose.msra.mxu1 %v2537_v19  ;;  %v1502_v14 = vpop.xlane.xlu1 %1501  ;;  %v1767_v41 = vmul.f32 %v5156_v13, %v6833_v2  ;;  %4750 = vmatprep.mubr.msk.bf16.mxu1 %vm5373_vm1, %v8005_v58  ;;  %v5158_v21 = vpop.eup %5157 }
 0x545   : > { %v1580_v63 = vmul.f32 0.03125, %v1502_v14  ;;  %4748 = vmatprep.subr.bf16.mxu1 %v8005_v58  ;;  %v1770_v46 = vmul.f32 %v5158_v21, %v6806_v47 }
 0x546   : > { %v1835_v36 = vmul.f32 %v8049_v12, %v1767_v41 }
 0x547   : > { %v1644_v28 = vadd.f32 1e-05, %v1580_v63  ;;  %v1838_v24 = vmul.f32 %v8049_v12, %v1770_v46 }
 0x548   : > { %v1889_v50 = vpack.c.bf16 %v1835_v36, %v1834_v38 }
 0x549   : > { %5161 = vrsqrt.f32 %v1644_v28 }
 0x54a   : > { %v2491_v44 = vsel %vm234_vm0, %v1889_v50, 0  ;;  %5163 = vrsqrt.f32 %v1645_v48 }
 0x54b   : > { %v5160_v2 = vpop.eup %5159  ;;  %4741 = vmatpush3.bf16.xpose.msra.mxu0 %v2491_v44 }
 0x54c   : > { %v525_v22 = vpop.xlane.xlu1 %524  ;;  %v1771_v39 = vmul.f32 %v5160_v2, %v6847_v45  ;;  %4754 = vmatprep.subr.bf16.mxu0 %v8005_v58 }
 0x54d   : > { %v547_v5 = vmul.f32 0.03125, %v525_v22 }
 0x54e   : > { %v1839_v40 = vmul.f32 %v8049_v12, %v1771_v39 }
 0x54f   : > { %v563_v3 = vadd.f32 1e-05, %v547_v5 }
 0x550   : > { %v1517_v11 = vpop.xlane.xlu1 %1516  ;;  %v1891_v29 = vpack.c.bf16 %v1839_v40, %v1838_v24  ;;  %v1514_v20 = vpop.xlane.xlu0 %1513 }
 0x551   : > { %5165 = vrsqrt.f32 %v563_v3  ;;  %v1585_v57 = vmul.f32 0.03125, %v1517_v11  ;;  %v1584_v47 = vmul.f32 0.03125, %v1514_v20 }
 0x552   : > { %v2540_v30 = vsel %vm234_vm0, %v1891_v29, 0  ;;  %v8099_v29 = vlaneseq }
 0x553   : > { %v5162_v23 = vpop.eup %5161  ;;  %v1649_v10 = vadd.f32 1e-05, %v1585_v57  ;;  %4749 = vmatpush3.bf16.xpose.msra.mxu1 %v2540_v30  ;;  %v1648_v45 = vadd.f32 1e-05, %v1584_v47 }
 0x554   : > { %v1508_v17 = vpop.xlane.xlu1 %1507  ;;  %4762 = vmatprep.subr.bf16.mxu1 %v8005_v58  ;;  %v5164_v0 = vpop.eup %5163  ;;  %v1772_v61 = vmul.f32 %v5162_v23, %v6864_v37  ;;  %v2830_v57 = vand.u32 127, %v8099_v29 }
 0x555   : > { %5167 = vrsqrt.f32 %v1649_v10  ;;  %v528_v1 = vpop.xlane.xlu0 %527  ;;  %v1582_v62 = vmul.f32 0.03125, %v1508_v17  ;;  %v1773_v54 = vmul.f32 %v5164_v0, %v6844_v7 }
 0x556   : > { %5169 = vrsqrt.f32 %v1648_v45  ;;  %v548_v59 = vmul.f32 0.03125, %v528_v1  ;;  %v1840_v6 = vmul.f32 %v8049_v12, %v1772_v61  ;;  %vm2831_vm2 = vcmp.ge.s32.totalorder %v2830_v57, 8 }
 0x557   : > { %v1646_v8 = vadd.f32 1e-05, %v1582_v62  ;;  %v1841_v56 = vmul.f32 %v8049_v12, %v1773_v54  ;;  %vm2833_vm3 = vcmp.ge.s32.totalorder %v2830_v57, 16  ;;  %vm2836_vm4 = vcmp.ge.s32.totalorder %v2830_v57, 24 }
 0x558   : > { %v564_v42 = vadd.f32 1e-05, %v548_v59  ;;  %v1520_v26 = vpop.xlane.xlu1 %1519  ;;  %v1988_v27 = vpop.f32.mrb[0].mxu1 }
 0x559   : > { %v7113_v34 = vmul.f32 0.17677669, %v1988_v27  ;;  %v4656_v35 = vpop.f32.mrb[1].mxu1  ;;  %v1586_v7 = vmul.f32 0.03125, %v1520_v26  ;;  %v1892_v19 = vpack.c.bf16 %v1841_v56, %v1840_v6  ;;  %v8100_v26 = vmov 0   ;;  %v8101_v27 = vld [vmem:[#allocation59_spill] sm:$0xff] }
 0x55a   : > { %5171 = vrsqrt.f32 %v564_v42  ;;  %v1991_v25 = vpop.f32.mrb[2].mxu1  ;;  %v2832_v54 = vsel %vm2831_vm2, 1, %v8100_v26 }
 0x55b   : > { %v5166_v4 = vpop.eup %5165  ;;  %v4657_v18 = vpop.f32.mrb[3].mxu1  ;;  %v2699_v37 = vsel %vm234_vm0, %v7113_v34, -inf  ;;  %5173 = vrsqrt.f32 %v1646_v8  ;;  %v1650_v21 = vadd.f32 1e-05, %v1586_v7  ;;  %v2586_v28 = vsel %vm234_vm0, %v1892_v19, 0  ;;  %v8103_v7 = vld [vmem:[#allocation34_spill] sm:$0xff] }
 0x55c   : > { %v595_v51 = vmul.f32 %v5166_v4, %v6886_v60  ;;  %v531_v43 = vpop.xlane.xlu1 %530  ;;  %2700 = vmax.xlane.f32.xlu0 %v2699_v37  ;;  %v1511_v31 = vpop.xlane.xlu0 %1510  ;;  %v8102_v4 = vld [vmem:[#allocation16_spill] sm:$0xff] }
 0x55d   : > { %v549_v53 = vmul.f32 0.03125, %v531_v43  ;;  %v1583_v13 = vmul.f32 0.03125, %v1511_v31 }
 0x55e   : > { %v615_v15 = vmul.f32 %v8053_v32, %v595_v51 }
 0x55f   : > { %v5168_v14 = vpop.eup %5167  ;;  %v565_v63 = vadd.f32 1e-05, %v549_v53  ;;  %v1647_v60 = vadd.f32 1e-05, %v1583_v13 }
 0x560   : > { %v5170_v41 = vpop.eup %5169  ;;  %v1860_v38 = vpack.c.bf16 %v615_v15, %v615_v15  ;;  %v1777_v36 = vmul.f32 %v5168_v14, %v6878_v16 }
 0x561   : > { %v1776_v48 = vmul.f32 %v5170_v41, %v6903_v9  ;;  %5175 = vrsqrt.f32 %v1647_v60 }
 0x562   : > { %4743 = vmatmul.mubr.msk.bf16.vlgmr.msra.gmra.mrb[52].mxu0 %vm234_vm0, %v1860_v38  ;;  %v1845_v44 = vmul.f32 %v8049_v12, %v1777_v36  ;;  %5177 = vrsqrt.f32 %v565_v63  ;;  %v8106_v63 = vld [vmem:[#allocation21_spill] sm:$0xff] }
 0x563   : > { %4755 = vmatpush3.bf16.xpose.msra.mxu0 %v2586_v28  ;;  %v1844_v50 = vmul.f32 %v8049_v12, %v1776_v48  ;;  %4758 = vmatprep.mubr.msk.bf16.mxu0 %vm5373_vm1, %v8005_v58  ;;  %5179 = vrsqrt.f32 %v1650_v21  ;;  %v4388_v60 = vpack.c.bf16 %v8106_v63, %v8106_v63 }
 0x564   : > { %v5172_v46 = vpop.eup %5171  ;;  %v1523_v2 = vpop.xlane.xlu0 %1522  ;;  %4756 = vmatprep.subr.bf16.mxu0 %v8005_v58 }
 0x565   : > { %v596_v16 = vmul.f32 %v5172_v46, %v6918_v52  ;;  %v1587_v9 = vmul.f32 0.03125, %v1523_v2  ;;  %v1894_v5 = vpack.c.bf16 %v1845_v44, %v1844_v50  ;;  %v5174_v24 = vpop.eup %5173 }
 0x566   : > { %v1774_v52 = vmul.f32 %v5174_v24, %v6897_v49  ;;  %v5374_v24 = vmov 1.0|1.0  }
 0x567   : > { %v1651_v22 = vadd.f32 1e-05, %v1587_v9  ;;  %v616_v39 = vmul.f32 %v8053_v32, %v596_v16  ;;  %v2635_v47 = vsel %vm234_vm0, %v1894_v5, 0 }
 0x568   : > { %v534_v40 = vpop.xlane.xlu0 %533  ;;  %v1842_v1 = vmul.f32 %v8049_v12, %v1774_v52 }
 0x569   : > { %5181 = vrsqrt.f32 %v1651_v22  ;;  %v550_v3 = vmul.f32 0.03125, %v534_v40  ;;  %v1861_v11 = vpack.c.bf16 %v616_v39, %v616_v39 }
 0x56b   : > { %v566_v20 = vadd.f32 1e-05, %v550_v3  ;;  %4751 = vmatmul.mubr.msk.bf16.vlgmr.msra.gmra.mrb[28].mxu1 %vm234_vm0, %v1861_v11  ;;  %v5176_v30 = vpop.eup %5175 }
 0x56c   : > { %4763 = vmatpush3.bf16.xpose.msra.mxu1 %v2635_v47  ;;  %4766 = vmatprep.mubr.msk.bf16.mxu1 %vm5373_vm1, %v8005_v58  ;;  %v1775_v23 = vmul.f32 %v5176_v30, %v6942_v55  ;;  %v5178_v10 = vpop.eup %5177  ;;  %v2037_v45 = vpop.f32.mrb[4].mxu1  ;;  %v2834_v55 = vsel %vm2833_vm3, 1, %v8100_v26 }
 0x56d   : > { %5183 = vrsqrt.f32 %v566_v20  ;;  %4764 = vmatprep.subr.bf16.mxu1 %v8005_v58  ;;  %v5180_v17 = vpop.eup %5179  ;;  %v4664_v0 = vpop.f32.mrb[5].mxu1  ;;  %v597_v59 = vmul.f32 %v5178_v10, %v6927_v33  ;;  %v2835_v51 = vadd.s32 %v2834_v55, %v2832_v54  ;;  %v2837_v33 = vsel %vm2836_vm4, 1, %v8100_v26 }
 0x56e   : > { %v1843_v49 = vmul.f32 %v8049_v12, %v1775_v23  ;;  %v2040_v62 = vpop.f32.mrb[6].mxu1  ;;  %v1778_v8 = vmul.f32 %v5180_v17, %v8101_v27  ;;  %v7178_v28 = vmul.f32 0.17677669, %v2037_v45 }
 0x56f   : > { %v4665_v61 = vpop.f32.mrb[7].mxu1  ;;  %v617_v18 = vmul.f32 %v8053_v32, %v597_v59  ;;  %v2838_v13 = vadd.s32 %v2837_v33, %v2835_v51 }
 0x570   : > { %v1893_v42 = vpack.c.bf16 %v1843_v49, %v1842_v1  ;;  %v1846_v43 = vmul.f32 %v8049_v12, %v1778_v8  ;;  %v2702_v46 = vsel %vm234_vm0, %v7178_v28, -inf }
 0x571   : > { %v1862_v15 = vpack.c.bf16 %v617_v18, %v617_v18  ;;  %vm4359_vm5 = vcmp.eq.s32.totalorder %v2838_v13, 0  ;;  %vm4360_vm6 = vcmp.eq.s32.totalorder %v2838_v13, 1  ;;  %vm4361_vm8 = vcmp.eq.s32.totalorder %v2838_v13, 2 }
 0x572   : > { %v2589_v6 = vsel %vm234_vm0, %v1893_v42, 0  ;;  %vm7157_vm7 = vmpackc.low %vm4360_vm6, %vm4359_vm5  ;;  %vm4362_vm9 = vcmp.eq.s32.totalorder %v2838_v13, 3 }
 0x573   : > { %v5182_v35 = vpop.eup %5181  ;;  %4757 = vmatpush3.bf16.xpose.msra.mxu0 %v2589_v6  ;;  %vm7168_vm10 = vmpackc.low %vm4362_vm9, %vm4361_vm8 }
 0x574   : > { %v1779_v25 = vmul.f32 %v5182_v35, %v8102_v4  ;;  %4951 = vmatprep.subr.msk.bf16.mxu0 %vm7157_vm7, %v5374_v24 }
 0x576   : > { %v1847_v37 = vmul.f32 %v8049_v12, %v1779_v25 }
 0x577   : > { %v5184_v56 = vpop.eup %5183 }
 0x578   : > { %v598_v53 = vmul.f32 %v5184_v56, %v8103_v7  ;;  %v1895_v31 = vpack.c.bf16 %v1847_v37, %v1846_v43 }
 0x57a   : > { %v2638_v19 = vsel %vm234_vm0, %v1895_v31, 0  ;;  %4759 = vmatmul.mubr.msk.bf16.vlgmr.msra.gmra.mrb[56].mxu0 %vm234_vm0, %v1862_v15  ;;  %v618_v14 = vmul.f32 %v8053_v32, %v598_v53 }
 0x57b   : > { %4765 = vmatpush3.bf16.xpose.msra.mxu1 %v2638_v19  ;;  %4953 = vmatpush3.bf16.msk.msra.mxu0 %vm7157_vm7, %v5374_v24 }
 0x57c   : > { %4802 = vmatprep.subr.bf16.mxu1 %v8005_v58  ;;  %v1863_v12 = vpack.c.bf16 %v618_v14, %v618_v14  ;;  %4955 = vmatprep.subr.msk.bf16.mxu0 %vm7168_vm10, %v5374_v24 }
 0x57f   : > { %4957 = vmatpush3.bf16.msk.msra.mxu0 %vm7168_vm10, %v5374_v24 }
 0x580   : > { %4826 = vmatprep.subr.bf16.mxu0 %v8005_v58 }
 0x582   : > { %4767 = vmatmul.mubr.msk.bf16.vlgmr.msra.gmra.mrb[32].mxu1 %vm234_vm0, %v1863_v12 }
 0x583   : > { %4803 = vmatpush3.bf16.msk.msra.mxu1 %vm7157_vm7, %v4388_v60  ;;  %4806 = vmatprep.mubr.msk.bf16.mxu1 %vm5373_vm1, %v8005_v58 }
 0x584   : > { %4804 = vmatprep.subr.bf16.mxu1 %v8005_v58 }
 0x587   : > { %4805 = vmatpush3.bf16.msk.msra.mxu1 %vm7168_vm10, %v4388_v60 }
 0x588   : > { %4810 = vmatprep.subr.bf16.mxu1 %v8005_v58 }
 0x58c   : > { %v1939_v38 = vpop.f32.mrb[32].mxu0 }
 0x58d   : > { %v7176_v36 = vmul.f32 0.17677669, %v1939_v38  ;;  %v4648_v21 = vpop.f32.mrb[33].mxu0 }
 0x58e   : > { %v1942_v48 = vpop.f32.mrb[34].mxu0 }
 0x58f   : > { %v4649_v50 = vpop.f32.mrb[35].mxu0  ;;  %v2696_v44 = vsel %vm234_vm0, %v7176_v36, -inf }
 0x590   : > { %2697 = vmax.xlane.f32.xlu1 %v2696_v44 }
 0x594   : > { %v2086_v2 = vpop.f32.mrb[8].mxu1  ;;  %2703 = vmax.xlane.f32.xlu1 %v2702_v46 }
 0x595   : > { %v7184_v16 = vmul.f32 0.17677669, %v2086_v2  ;;  %v4672_v9 = vpop.f32.mrb[9].mxu1 }
 0x596   : > { %v2089_v22 = vpop.f32.mrb[10].mxu1 }
 0x597   : > { %v4673_v39 = vpop.f32.mrb[11].mxu1  ;;  %v2705_v5 = vsel %vm234_vm0, %v7184_v16, -inf }
 0x598   : > { %2706 = vmax.xlane.f32.xlu0 %v2705_v5 }
 0x5c0   : > { %v2135_v40 = vpop.f32.mrb[36].mxu0 }
 0x5c1   : > { %v7197_v3 = vmul.f32 0.17677669, %v2135_v40  ;;  %v4680_v11 = vpop.f32.mrb[37].mxu0 }
 0x5c2   : > { %v2138_v29 = vpop.f32.mrb[38].mxu0 }
 0x5c3   : > { %v4681_v57 = vpop.f32.mrb[39].mxu0  ;;  %v2708_v20 = vsel %vm234_vm0, %v7197_v3, -inf }
 0x5c4   : > { %2709 = vmax.xlane.f32.xlu1 %v2708_v20  ;;  %v8109_v20 = vld [vmem:[#allocation24_spill] sm:$0xff] }
 0x5c8   : > { %v2184_v47 = vpop.f32.mrb[12].mxu1 }
 0x5c9   : > { %v7201_v52 = vmul.f32 0.17677669, %v2184_v47  ;;  %v4688_v30 = vpop.f32.mrb[13].mxu1 }
 0x5ca   : > { %v2187_v23 = vpop.f32.mrb[14].mxu1 }
 0x5cb   : > { %v4689_v10 = vpop.f32.mrb[15].mxu1  ;;  %v2711_v45 = vsel %vm234_vm0, %v7201_v52, -inf }
 0x5cc   : > { %2712 = vmax.xlane.f32.xlu0 %v2711_v45 }
 0x5d4   : > { %v2233_v17 = vpop.f32.mrb[40].mxu0 }
 0x5d5   : > { %v7205_v0 = vmul.f32 0.17677669, %v2233_v17  ;;  %v4696_v1 = vpop.f32.mrb[41].mxu0 }
 0x5d6   : > { %v2236_v49 = vpop.f32.mrb[42].mxu0 }
 0x5d7   : > { %v4697_v62 = vpop.f32.mrb[43].mxu0  ;;  %v2714_v59 = vsel %vm234_vm0, %v7205_v0, -inf }
 0x5d8   : > { %2715 = vmax.xlane.f32.xlu1 %v2714_v59 }
 0x5dc   : > { %v2282_v61 = vpop.f32.mrb[16].mxu1 }
 0x5dd   : > { %v7209_v42 = vmul.f32 0.17677669, %v2282_v61  ;;  %v4704_v26 = vpop.f32.mrb[17].mxu1 }
 0x5de   : > { %v2285_v54 = vpop.f32.mrb[18].mxu1 }
 0x5df   : > { %v4705_v55 = vpop.f32.mrb[19].mxu1  ;;  %v2717_v27 = vsel %vm234_vm0, %v7209_v42, -inf }
 0x5e0   : > { %2718 = vmax.xlane.f32.xlu0 %v2717_v27 }
 0x5e8   : > { %v2331_v8 = vpop.f32.mrb[44].mxu0 }
 0x5e9   : > { %v7213_v35 = vmul.f32 0.17677669, %v2331_v8  ;;  %v4712_v6 = vpop.f32.mrb[45].mxu0  ;;  %v2701_v38 = vpop.xlane.xlu0 %2700 }
 0x5ea   : > { %v2334_v4 = vpop.f32.mrb[46].mxu0  ;;  %v2745_v44 = vsub.f32 %v7113_v34, %v2701_v38 }
 0x5eb   : > { %v4713_v25 = vpop.f32.mrb[47].mxu0  ;;  %v2720_v51 = vsel %vm234_vm0, %v7213_v35, -inf }
 0x5ec   : > { %2721 = vmax.xlane.f32.xlu1 %v2720_v51  ;;  %v2762_v9 = vmul.f32 1.442695, %v2745_v44 }
 0x5f0   : > { %v2380_v18 = vpop.f32.mrb[20].mxu1 }
 0x5f1   : > { %v7217_v33 = vmul.f32 0.17677669, %v2380_v18  ;;  %v4720_v43 = vpop.f32.mrb[21].mxu1 }
 0x5f2   : > { %v2383_v37 = vpop.f32.mrb[22].mxu1 }
 0x5f3   : > { %v4721_v56 = vpop.f32.mrb[23].mxu1  ;;  %v2723_v7 = vsel %vm234_vm0, %v7217_v33, -inf }
 0x5f4   : > { %2724 = vmax.xlane.f32.xlu0 %v2723_v7 }
 0x60d   : > { %v2429_v53 = vpop.f32.mrb[48].mxu0 }
 0x60e   : > { %v7221_v31 = vmul.f32 0.17677669, %v2429_v53  ;;  %v4728_v13 = vpop.f32.mrb[49].mxu0 }
 0x60f   : > { %v2432_v15 = vpop.f32.mrb[50].mxu0 }
 0x610   : > { %v4729_v19 = vpop.f32.mrb[51].mxu0  ;;  %v2726_v14 = vsel %vm234_vm0, %v7221_v31, -inf }
 0x611   : > { %2727 = vmax.xlane.f32.xlu1 %v2726_v14 }
 0x616   : > { %v2478_v12 = vpop.f32.mrb[24].mxu1 }
 0x617   : > { %v7225_v63 = vmul.f32 0.17677669, %v2478_v12  ;;  %v4736_v60 = vpop.f32.mrb[25].mxu1 }
 0x618   : > { %v2481_v21 = vpop.f32.mrb[26].mxu1 }
 0x619   : > { %v4737_v48 = vpop.f32.mrb[27].mxu1  ;;  %v2729_v50 = vsel %vm234_vm0, %v7225_v63, -inf }
 0x61a   : > { %2730 = vmax.xlane.f32.xlu0 %v2729_v50 }
 0x61d   : > { %v2698_v46 = vpop.xlane.xlu1 %2697 }
 0x61e   : > { %v2744_v2 = vsub.f32 %v7176_v36, %v2698_v46  ;;  %v4409_v36 = vpack.c.bf16 %v8109_v20, %v8109_v20 }
 0x620   : > { %v2760_v22 = vmul.f32 1.442695, %v2744_v2 }
 0x621   : > { %v2704_v39 = vpop.xlane.xlu1 %2703 }
 0x622   : > { %5185 = vpow2.f32 %v2760_v22  ;;  %v2746_v5 = vsub.f32 %v7178_v28, %v2704_v39 }
 0x623   : > { %5187 = vpow2.f32 %v2762_v9 }
 0x624   : > { %v2764_v24 = vmul.f32 1.442695, %v2746_v5 }
 0x625   : > { %v2707_v40 = vpop.xlane.xlu0 %2706 }
 0x626   : > { %5189 = vpow2.f32 %v2764_v24  ;;  %v2747_v11 = vsub.f32 %v7184_v16, %v2707_v40 }
 0x628   : > { %v2766_v29 = vmul.f32 1.442695, %v2747_v11 }
 0x62a   : > { %5191 = vpow2.f32 %v2766_v29 }
 0x62c   : > { %v7233_v57 = vpop.eup %5185 }
 0x62d   : > { %v7235_v34 = vpop.eup %5187  ;;  %4778 = vmatprep.mubr.msk.f32.mxu0 %vm234_vm0, %v7233_v57 }
 0x62e   : > { %4779 = vmatmul.mubr.msk.f32.vlgmr.msra.gmra.mrb[60].mxu0 %vm234_vm0, %v7235_v34 }
 0x62f   : > { %4827 = vmatpush3.bf16.msk.msra.mxu0 %vm7157_vm7, %v4409_v36 }
 0x630   : > { %v7245_v28 = vpop.eup %5189  ;;  %4828 = vmatprep.subr.bf16.mxu0 %v8005_v58 }
 0x631   : > { %4781 = vmatprep.mubr.msk.f32.mxu0 %vm234_vm0, %v7245_v28 }
 0x633   : > { %4829 = vmatpush3.bf16.msk.msra.mxu0 %vm7168_vm10, %v4409_v36 }
 0x634   : > { %v7252_v16 = vpop.eup %5191  ;;  %4842 = vmatprep.subr.bf16.mxu0 %v8005_v58 }
 0x635   : > { %v2527_v47 = vpop.f32.mrb[52].mxu0  ;;  %4782 = vmatmul.mubr.msk.f32.gmra.mrb[62].mxu0 %vm234_vm0, %v7252_v16 }
 0x636   : > { %v7257_v30 = vmul.f32 0.17677669, %v2527_v47  ;;  %v4744_v23 = vpop.f32.mrb[53].mxu0 }
 0x637   : > { %v2530_v10 = vpop.f32.mrb[54].mxu0 }
 0x638   : > { %v4745_v45 = vpop.f32.mrb[55].mxu0  ;;  %v2732_v17 = vsel %vm234_vm0, %v7257_v30, -inf }
 0x639   : > { %2733 = vmax.xlane.f32.xlu1 %v2732_v17 }
 0x63e   : > { %v2576_v1 = vpop.f32.mrb[28].mxu1 }
 0x63f   : > { %v7261_v49 = vmul.f32 0.17677669, %v2576_v1  ;;  %v4752_v62 = vpop.f32.mrb[29].mxu1 }
 0x640   : > { %v2579_v59 = vpop.f32.mrb[30].mxu1 }
 0x641   : > { %v4753_v61 = vpop.f32.mrb[31].mxu1  ;;  %v2735_v26 = vsel %vm234_vm0, %v7261_v49, -inf }
 0x642   : > { %2736 = vmax.xlane.f32.xlu0 %v2735_v26 }
 0x64d   : > { %v2625_v54 = vpop.f32.mrb[56].mxu0 }
 0x64e   : > { %v7265_v55 = vmul.f32 0.17677669, %v2625_v54  ;;  %v4760_v27 = vpop.f32.mrb[57].mxu0 }
 0x64f   : > { %v2628_v8 = vpop.f32.mrb[58].mxu0 }
 0x650   : > { %v4761_v6 = vpop.f32.mrb[59].mxu0  ;;  %v2738_v25 = vsel %vm234_vm0, %v7265_v55, -inf }
 0x651   : > { %v2710_v4 = vpop.xlane.xlu1 %2709  ;;  %2739 = vmax.xlane.f32.xlu1 %v2738_v25 }
 0x652   : > { %v2748_v51 = vsub.f32 %v7197_v3, %v2710_v4 }
 0x654   : > { %v2768_v18 = vmul.f32 1.442695, %v2748_v51 }
 0x655   : > { %v2674_v43 = vpop.f32.mrb[32].mxu1 }
 0x656   : > { %5193 = vpow2.f32 %v2768_v18  ;;  %v7270_v37 = vmul.f32 0.17677669, %v2674_v43  ;;  %v4768_v56 = vpop.f32.mrb[33].mxu1 }
 0x657   : > { %v2677_v7 = vpop.f32.mrb[34].mxu1  ;;  %v8110_v56 = vld [vmem:[#allocation22_spill] sm:$0xff] }
 0x658   : > { %v4769_v53 = vpop.f32.mrb[35].mxu1  ;;  %v2741_v13 = vsel %vm234_vm0, %v7270_v37, -inf  ;;  %v4395_v7 = vpack.c.bf16 %v8110_v56, %v8110_v56 }
 0x659   : > { %2742 = vmax.xlane.f32.xlu0 %v2741_v13  ;;  %v2713_v15 = vpop.xlane.xlu0 %2712 }
 0x65a   : > { %v2749_v19 = vsub.f32 %v7201_v52, %v2713_v15 }
 0x65c   : > { %v2770_v14 = vmul.f32 1.442695, %v2749_v19  ;;  %v8111_v19 = vld [vmem:[#allocation27_spill] sm:$0xff] }
 0x65e   : > { %5195 = vpow2.f32 %v2770_v14  ;;  %v4423_v14 = vpack.c.bf16 %v8111_v19, %v8111_v19 }
 0x660   : > { %v7275_v12 = vpop.eup %5193 }
 0x661   : > { %4784 = vmatprep.mubr.msk.f32.mxu0 %vm234_vm0, %v7275_v12 }
 0x665   : > { %v2716_v3 = vpop.xlane.xlu1 %2715 }
 0x666   : > { %v2750_v60 = vsub.f32 %v7205_v0, %v2716_v3 }
 0x668   : > { %v7280_v38 = vpop.eup %5195  ;;  %v2772_v21 = vmul.f32 1.442695, %v2750_v60 }
 0x669   : > { %4785 = vmatmul.mubr.msk.f32.gmra.mrb[64].mxu0 %vm234_vm0, %v7280_v38 }
 0x66a   : > { %5197 = vpow2.f32 %v2772_v21  ;;  %v8112_v21 = vld [vmem:[#allocation23_spill] sm:$0xff] }
 0x66d   : > { %v2719_v48 = vpop.xlane.xlu0 %2718 }
 0x66e   : > { %v2751_v52 = vsub.f32 %v7209_v42, %v2719_v48 }
 0x670   : > { %v2774_v50 = vmul.f32 1.442695, %v2751_v52  ;;  %v8113_v52 = vld [vmem:[#allocation25_spill] sm:$0xff] }
 0x672   : > { %5199 = vpow2.f32 %v2774_v50  ;;  %v4416_v50 = vpack.c.bf16 %v8113_v52, %v8113_v52  ;;  %v8122_v52 = vld [vmem:[#allocation49_spill] sm:$0xff] }
 0x674   : > { %v7285_v44 = vpop.eup %5197 }
 0x675   : > { %4787 = vmatprep.mubr.msk.f32.mxu0 %vm234_vm0, %v7285_v44 }
 0x679   : > { %v2722_v46 = vpop.xlane.xlu1 %2721 }
 0x67a   : > { %v2752_v0 = vsub.f32 %v7213_v35, %v2722_v46 }
 0x67c   : > { %v7290_v2 = vpop.eup %5199  ;;  %v2776_v9 = vmul.f32 1.442695, %v2752_v0 }
 0x67d   : > { %4788 = vmatmul.mubr.msk.f32.gmra.mrb[66].mxu0 %vm234_vm0, %v7290_v2 }
 0x67e   : > { %5201 = vpow2.f32 %v2776_v9 }
 0x681   : > { %v2725_v22 = vpop.xlane.xlu0 %2724 }
 0x682   : > { %v2753_v42 = vsub.f32 %v7217_v33, %v2725_v22 }
 0x684   : > { %v2778_v39 = vmul.f32 1.442695, %v2753_v42 }
 0x686   : > { %5203 = vpow2.f32 %v2778_v39 }
 0x688   : > { %v7295_v5 = vpop.eup %5201 }
 0x689   : > { %4790 = vmatprep.mubr.msk.f32.mxu0 %vm234_vm0, %v7295_v5 }
 0x690   : > { %v7299_v24 = vpop.eup %5203 }
 0x691   : > { %4791 = vmatmul.mubr.msk.f32.gmra.mrb[68].mxu0 %vm234_vm0, %v7299_v24 }
 0x69e   : > { %v2728_v35 = vpop.xlane.xlu1 %2727 }
 0x69f   : > { %v2754_v40 = vsub.f32 %v7221_v31, %v2728_v35  ;;  %v8114_v35 = vld [vmem:[#allocation31_spill] sm:$0xff] }
 0x6a1   : > { %v2780_v11 = vmul.f32 1.442695, %v2754_v40  ;;  %v4437_v40 = vpack.c.bf16 %v8114_v35, %v8114_v35 }
 0x6a3   : > { %5205 = vpow2.f32 %v2780_v11 }
 0x6a7   : > { %v2731_v29 = vpop.xlane.xlu0 %2730 }
 0x6a8   : > { %v2755_v33 = vsub.f32 %v7225_v63, %v2731_v29  ;;  %v8115_v29 = vld [vmem:[#allocation29_spill] sm:$0xff] }
 0x6aa   : > { %v2782_v20 = vmul.f32 1.442695, %v2755_v33  ;;  %v4430_v33 = vpack.c.bf16 %v8115_v29, %v8115_v29 }
 0x6ac   : > { %5207 = vpow2.f32 %v2782_v20 }
 0x6ad   : > { %v7305_v36 = vpop.eup %5205 }
 0x6ae   : > { %4793 = vmatprep.mubr.msk.f32.mxu0 %vm234_vm0, %v7305_v36 }
 0x6b6   : > { %v7309_v47 = vpop.eup %5207 }
 0x6b7   : > { %4794 = vmatmul.mubr.msk.f32.gmra.mrb[70].mxu0 %vm234_vm0, %v7309_v47 }
 0x6c6   : > { %v2734_v23 = vpop.xlane.xlu1 %2733 }
 0x6c7   : > { %v2756_v31 = vsub.f32 %v7257_v30, %v2734_v23 }
 0x6c9   : > { %v2784_v10 = vmul.f32 1.442695, %v2756_v31 }
 0x6cb   : > { %5209 = vpow2.f32 %v2784_v10 }
 0x6cf   : > { %v2737_v45 = vpop.xlane.xlu0 %2736 }
 0x6d0   : > { %v2757_v63 = vsub.f32 %v7261_v49, %v2737_v45 }
 0x6d2   : > { %v2786_v17 = vmul.f32 1.442695, %v2757_v63  ;;  %v8116_v63 = vld [vmem:[#allocation33_spill] sm:$0xff] }
 0x6d4   : > { %5211 = vpow2.f32 %v2786_v17  ;;  %v4451_v17 = vpack.c.bf16 %v8116_v63, %v8116_v63 }
 0x6d5   : > { %v7315_v1 = vpop.eup %5209 }
 0x6d6   : > { %4796 = vmatprep.mubr.msk.f32.mxu0 %vm234_vm0, %v7315_v1 }
 0x6de   : > { %v7319_v62 = vpop.eup %5211  ;;  %v2740_v59 = vpop.xlane.xlu1 %2739 }
 0x6df   : > { %4797 = vmatmul.mubr.msk.f32.gmra.mrb[72].mxu0 %vm234_vm0, %v7319_v62  ;;  %v2758_v30 = vsub.f32 %v7265_v55, %v2740_v59 }
 0x6e1   : > { %v2788_v61 = vmul.f32 1.442695, %v2758_v30  ;;  %v8117_v30 = vld [vmem:[#allocation32_spill] sm:$0xff] }
 0x6e3   : > { %5213 = vpow2.f32 %v2788_v61  ;;  %v4444_v61 = vpack.c.bf16 %v8117_v30, %v8117_v30 }
 0x6e6   : > { %v2743_v26 = vpop.xlane.xlu0 %2742 }
 0x6e7   : > { %v2759_v49 = vsub.f32 %v7270_v37, %v2743_v26 }
 0x6e9   : > { %v2790_v54 = vmul.f32 1.442695, %v2759_v49 }
 0x6eb   : > { %5215 = vpow2.f32 %v2790_v54 }
 0x6ed   : > { %v7325_v27 = vpop.eup %5213 }
 0x6ee   : > { %4799 = vmatprep.mubr.msk.f32.mxu0 %vm234_vm0, %v7325_v27 }
 0x6f5   : > { %v7329_v8 = vpop.eup %5215 }
 0x6f6   : > { %4800 = vmatmul.mubr.msk.f32.gmra.mrb[74].mxu0 %vm234_vm0, %v7329_v8 }
 0x6f7   : > { %4830 = vmatprep.mubr.msk.bf16.mxu0 %vm5373_vm1, %v8005_v58 }
 0x701   : > { %v4780_v55 = vpop.f32.mrb[60].mxu0 }
 0x702   : > { %v2965_v6 = vpop.f32.mrb[61].mxu0 }
 0x703   : > { %5217 = vrcp.f32 %v2965_v6 }
 0x704   : > { %5219 = vrcp.f32 %v4780_v55 }
 0x708   : > { %v4783_v4 = vpop.f32.mrb[62].mxu0 }
 0x709   : > { %5221 = vrcp.f32 %v4783_v4  ;;  %v2975_v25 = vpop.f32.mrb[63].mxu0  ;;  %v8118_v4 = vld [vmem:[#allocation36_spill] sm:$0xff] }
 0x70a   : > { %5223 = vrcp.f32 %v2975_v25  ;;  %v4465_v25 = vpack.c.bf16 %v8118_v4, %v8118_v4 }
 0x70d   : > { %v5218_v51 = vpop.eup %5217 }
 0x70e   : > { %v3060_v18 = vmul.f32 %v5218_v51, %v7233_v57  ;;  %v5220_v37 = vpop.eup %5219 }
 0x70f   : > { %v3061_v13 = vmul.f32 %v5220_v37, %v7235_v34  ;;  %v4402_v34 = vpack.c.bf16 %v8112_v21, %v8112_v21 }
 0x710   : > { %v3176_v43 = vpack.c.bf16 %v3060_v18, %v3060_v18  ;;  %v8119_v18 = vld [vmem:[#allocation35_spill] sm:$0xff] }
 0x711   : > { %v3177_v3 = vpack.c.bf16 %v3061_v13, %v3061_v13 }
 0x712   : > { %4807 = vmatmul.mubr.msk.bf16.vlgmr.msra.gmra.mrb[36].mxu1 %vm234_vm0, %v3176_v43  ;;  %v4458_v43 = vpack.c.bf16 %v8119_v18, %v8119_v18 }
 0x713   : > { %v5222_v53 = vpop.eup %5221  ;;  %4811 = vmatpush3.bf16.msk.msra.mxu1 %vm7157_vm7, %v4395_v7  ;;  %4814 = vmatprep.mubr.msk.bf16.mxu1 %vm5373_vm1, %v8005_v58 }
 0x714   : > { %v3063_v15 = vmul.f32 %v5222_v53, %v7252_v16  ;;  %4812 = vmatprep.subr.bf16.mxu1 %v8005_v58  ;;  %v5224_v60 = vpop.eup %5223 }
 0x715   : > { %v3062_v16 = vmul.f32 %v5224_v60, %v7245_v28 }
 0x716   : > { %v3179_v57 = vpack.c.bf16 %v3063_v15, %v3063_v15  ;;  %v8120_v15 = vld [vmem:[#allocation42_spill] sm:$0xff] }
 0x717   : > { %4813 = vmatpush3.bf16.msk.msra.mxu1 %vm7168_vm10, %v4395_v7  ;;  %v3178_v48 = vpack.c.bf16 %v3062_v16, %v3062_v16 }
 0x718   : > { %4831 = vmatmul.mubr.msk.bf16.vlgmr.msra.gmra.mrb[76].mxu0 %vm234_vm0, %v3179_v57  ;;  %4818 = vmatprep.subr.bf16.mxu1 %v8005_v58  ;;  %v4479_v57 = vpack.c.bf16 %v8120_v15, %v8120_v15 }
 0x719   : > { %4843 = vmatpush3.bf16.msk.msra.mxu0 %vm7157_vm7, %v4423_v14  ;;  %4846 = vmatprep.mubr.msk.bf16.mxu0 %vm5373_vm1, %v8005_v58 }
 0x71a   : > { %4815 = vmatmul.mubr.msk.bf16.vlgmr.msra.gmra.mrb[40].mxu1 %vm234_vm0, %v3177_v3  ;;  %4844 = vmatprep.subr.bf16.mxu0 %v8005_v58 }
 0x71b   : > { %4819 = vmatpush3.bf16.msk.msra.mxu1 %vm7157_vm7, %v4402_v34  ;;  %4822 = vmatprep.mubr.msk.bf16.mxu1 %vm5373_vm1, %v8005_v58 }
 0x71c   : > { %4820 = vmatprep.subr.bf16.mxu1 %v8005_v58 }
 0x71d   : > { %4845 = vmatpush3.bf16.msk.msra.mxu0 %vm7168_vm10, %v4423_v14  ;;  %v8121_v14 = vld [vmem:[#allocation40_spill] sm:$0xff] }
 0x71e   : > { %4858 = vmatprep.subr.bf16.mxu0 %v8005_v58  ;;  %v4472_v3 = vpack.c.bf16 %v8121_v14, %v8121_v14 }
 0x71f   : > { %4821 = vmatpush3.bf16.msk.msra.mxu1 %vm7168_vm10, %v4402_v34 }
 0x720   : > { %4834 = vmatprep.subr.bf16.mxu1 %v8005_v58 }
 0x722   : > { %4823 = vmatmul.mubr.msk.bf16.vlgmr.msra.gmra.mrb[44].mxu1 %vm234_vm0, %v3178_v48 }
 0x723   : > { %4835 = vmatpush3.bf16.msk.msra.mxu1 %vm7157_vm7, %v4416_v50  ;;  %4838 = vmatprep.mubr.msk.bf16.mxu1 %vm5373_vm1, %v8005_v58 }
 0x724   : > { %4836 = vmatprep.subr.bf16.mxu1 %v8005_v58 }
 0x727   : > { %4837 = vmatpush3.bf16.msk.msra.mxu1 %vm7168_vm10, %v4416_v50  ;;  %v4493_v50 = vpack.c.bf16 %v8122_v52, %v8122_v52 }
 0x728   : > { %4850 = vmatprep.subr.bf16.mxu1 %v8005_v58 }
 0x73c   : > { %v4786_v28 = vpop.f32.mrb[64].mxu0 }
 0x73d   : > { %5225 = vrcp.f32 %v4786_v28  ;;  %v2985_v46 = vpop.f32.mrb[65].mxu0 }
 0x73e   : > { %5227 = vrcp.f32 %v2985_v46  ;;  %v8123_v46 = vld [vmem:[#allocation47_spill] sm:$0xff] }
 0x747   : > { %v5226_v0 = vpop.eup %5225 }
 0x748   : > { %v5228_v9 = vpop.eup %5227  ;;  %v3065_v22 = vmul.f32 %v5226_v0, %v7280_v38  ;;  %v4486_v0 = vpack.c.bf16 %v8123_v46, %v8123_v46 }
 0x749   : > { %v3064_v42 = vmul.f32 %v5228_v9, %v7275_v12 }
 0x74a   : > { %v3181_v39 = vpack.c.bf16 %v3065_v22, %v3065_v22 }
 0x74b   : > { %v3180_v11 = vpack.c.bf16 %v3064_v42, %v3064_v42 }
 0x74c   : > { %4847 = vmatmul.mubr.msk.bf16.vlgmr.msra.gmra.mrb[80].mxu0 %vm234_vm0, %v3181_v39 }
 0x74d   : > { %4859 = vmatpush3.bf16.msk.msra.mxu0 %vm7157_vm7, %v4437_v40  ;;  %4839 = vmatmul.mubr.msk.bf16.vlgmr.msra.gmra.mrb[48].mxu1 %vm234_vm0, %v3180_v11 }
 0x74e   : > { %4851 = vmatpush3.bf16.msk.msra.mxu1 %vm7157_vm7, %v4430_v33  ;;  %4860 = vmatprep.subr.bf16.mxu0 %v8005_v58 }
 0x74f   : > { %4852 = vmatprep.subr.bf16.mxu1 %v8005_v58  ;;  %4862 = vmatprep.mubr.msk.bf16.mxu0 %vm5373_vm1, %v8005_v58 }
 0x750   : > { %v4789_v12 = vpop.f32.mrb[66].mxu0  ;;  %4854 = vmatprep.mubr.msk.bf16.mxu1 %vm5373_vm1, %v8005_v58 }
 0x751   : > { %5229 = vrcp.f32 %v4789_v12  ;;  %4861 = vmatpush3.bf16.msk.msra.mxu0 %vm7168_vm10, %v4437_v40  ;;  %v2995_v38 = vpop.f32.mrb[67].mxu0 }
 0x752   : > { %5231 = vrcp.f32 %v2995_v38  ;;  %4853 = vmatpush3.bf16.msk.msra.mxu1 %vm7168_vm10, %v4430_v33  ;;  %4874 = vmatprep.subr.bf16.mxu0 %v8005_v58 }
 0x753   : > { %4866 = vmatprep.subr.bf16.mxu1 %v8005_v58 }
 0x75b   : > { %v5230_v20 = vpop.eup %5229 }
 0x75c   : > { %v5232_v23 = vpop.eup %5231  ;;  %v3067_v31 = vmul.f32 %v5230_v20, %v7290_v2 }
 0x75d   : > { %v3066_v10 = vmul.f32 %v5232_v23, %v7285_v44 }
 0x75e   : > { %v3183_v45 = vpack.c.bf16 %v3067_v31, %v3067_v31 }
 0x75f   : > { %v3182_v59 = vpack.c.bf16 %v3066_v10, %v3066_v10 }
 0x760   : > { %4863 = vmatmul.mubr.msk.bf16.vlgmr.msra.gmra.mrb[84].mxu0 %vm234_vm0, %v3183_v45 }
 0x761   : > { %4875 = vmatpush3.bf16.msk.msra.mxu0 %vm7157_vm7, %v4451_v17  ;;  %4855 = vmatmul.mubr.msk.bf16.vlgmr.msra.gmra.mrb[52].mxu1 %vm234_vm0, %v3182_v59 }
 0x762   : > { %4867 = vmatpush3.bf16.msk.msra.mxu1 %vm7157_vm7, %v4444_v61  ;;  %4876 = vmatprep.subr.bf16.mxu0 %v8005_v58 }
 0x763   : > { %4868 = vmatprep.subr.bf16.mxu1 %v8005_v58  ;;  %4878 = vmatprep.mubr.msk.bf16.mxu0 %vm5373_vm1, %v8005_v58 }
 0x764   : > { %v4792_v44 = vpop.f32.mrb[68].mxu0  ;;  %4870 = vmatprep.mubr.msk.bf16.mxu1 %vm5373_vm1, %v8005_v58 }
 0x765   : > { %5233 = vrcp.f32 %v4792_v44  ;;  %4877 = vmatpush3.bf16.msk.msra.mxu0 %vm7168_vm10, %v4451_v17  ;;  %v3005_v2 = vpop.f32.mrb[69].mxu0 }
 0x766   : > { %5235 = vrcp.f32 %v3005_v2  ;;  %4869 = vmatpush3.bf16.msk.msra.mxu1 %vm7168_vm10, %v4444_v61  ;;  %4890 = vmatprep.subr.bf16.mxu0 %v8005_v58 }
 0x767   : > { %4882 = vmatprep.subr.bf16.mxu1 %v8005_v58 }
 0x76f   : > { %v5234_v26 = vpop.eup %5233 }
 0x770   : > { %v5236_v49 = vpop.eup %5235  ;;  %v3069_v54 = vmul.f32 %v5234_v26, %v7299_v24 }
 0x771   : > { %v3068_v55 = vmul.f32 %v5236_v49, %v7295_v5 }
 0x772   : > { %v3185_v6 = vpack.c.bf16 %v3069_v54, %v3069_v54 }
 0x773   : > { %v3184_v51 = vpack.c.bf16 %v3068_v55, %v3068_v55 }
 0x774   : > { %4879 = vmatmul.mubr.msk.bf16.vlgmr.msra.gmra.mrb[88].mxu0 %vm234_vm0, %v3185_v6 }
 0x775   : > { %4891 = vmatpush3.bf16.msk.msra.mxu0 %vm7157_vm7, %v4465_v25  ;;  %4871 = vmatmul.mubr.msk.bf16.vlgmr.msra.gmra.mrb[56].mxu1 %vm234_vm0, %v3184_v51 }
 0x776   : > { %4883 = vmatpush3.bf16.msk.msra.mxu1 %vm7157_vm7, %v4458_v43  ;;  %4892 = vmatprep.subr.bf16.mxu0 %v8005_v58 }
 0x777   : > { %4884 = vmatprep.subr.bf16.mxu1 %v8005_v58  ;;  %4894 = vmatprep.mubr.msk.bf16.mxu0 %vm5373_vm1, %v8005_v58 }
 0x778   : > { %4886 = vmatprep.mubr.msk.bf16.mxu1 %vm5373_vm1, %v8005_v58 }
 0x779   : > { %4893 = vmatpush3.bf16.msk.msra.mxu0 %vm7168_vm10, %v4465_v25 }
 0x77a   : > { %4885 = vmatpush3.bf16.msk.msra.mxu1 %vm7168_vm10, %v4458_v43  ;;  %4906 = vmatprep.subr.bf16.mxu0 %v8005_v58 }
 0x77b   : > { %4898 = vmatprep.subr.bf16.mxu1 %v8005_v58 }
 0x78a   : > { %v4795_v5 = vpop.f32.mrb[70].mxu0 }
 0x78b   : > { %5237 = vrcp.f32 %v4795_v5  ;;  %v3015_v24 = vpop.f32.mrb[71].mxu0 }
 0x78c   : > { %5239 = vrcp.f32 %v3015_v24 }
 0x795   : > { %v5238_v37 = vpop.eup %5237 }
 0x796   : > { %v5240_v56 = vpop.eup %5239  ;;  %v3071_v7 = vmul.f32 %v5238_v37, %v7309_v47 }
 0x797   : > { %v3070_v53 = vmul.f32 %v5240_v56, %v7305_v36 }
 0x798   : > { %v3187_v13 = vpack.c.bf16 %v3071_v7, %v3071_v7 }
 0x799   : > { %v3186_v19 = vpack.c.bf16 %v3070_v53, %v3070_v53 }
 0x79a   : > { %4895 = vmatmul.mubr.msk.bf16.vlgmr.msra.gmra.mrb[92].mxu0 %vm234_vm0, %v3187_v13 }
 0x79b   : > { %4907 = vmatpush3.bf16.msk.msra.mxu0 %vm7157_vm7, %v4479_v57  ;;  %4887 = vmatmul.mubr.msk.bf16.vlgmr.msra.gmra.mrb[60].mxu1 %vm234_vm0, %v3186_v19 }
 0x79c   : > { %4899 = vmatpush3.bf16.msk.msra.mxu1 %vm7157_vm7, %v4472_v3  ;;  %4908 = vmatprep.subr.bf16.mxu0 %v8005_v58 }
 0x79d   : > { %4900 = vmatprep.subr.bf16.mxu1 %v8005_v58  ;;  %4910 = vmatprep.mubr.msk.bf16.mxu0 %vm5373_vm1, %v8005_v58 }
 0x79e   : > { %4902 = vmatprep.mubr.msk.bf16.mxu1 %vm5373_vm1, %v8005_v58 }
 0x79f   : > { %4909 = vmatpush3.bf16.msk.msra.mxu0 %vm7168_vm10, %v4479_v57 }
 0x7a0   : > { %4901 = vmatpush3.bf16.msk.msra.mxu1 %vm7168_vm10, %v4472_v3  ;;  %4922 = vmatprep.subr.bf16.mxu0 %v8005_v58 }
 0x7a1   : > { %4914 = vmatprep.subr.bf16.mxu1 %v8005_v58 }
 0x7b2   : > { %v4798_v36 = vpop.f32.mrb[72].mxu0 }
 0x7b3   : > { %5241 = vrcp.f32 %v4798_v36  ;;  %v3025_v47 = vpop.f32.mrb[73].mxu0 }
 0x7b4   : > { %5243 = vrcp.f32 %v3025_v47 }
 0x7bd   : > { %v5242_v60 = vpop.eup %5241 }
 0x7be   : > { %v5244_v21 = vpop.eup %5243  ;;  %v3073_v34 = vmul.f32 %v5242_v60, %v7319_v62 }
 0x7bf   : > { %v3072_v16 = vmul.f32 %v5244_v21, %v7315_v1 }
 0x7c0   : > { %v3189_v48 = vpack.c.bf16 %v3073_v34, %v3073_v34 }
 0x7c1   : > { %v3188_v28 = vpack.c.bf16 %v3072_v16, %v3072_v16 }
 0x7c2   : > { %4911 = vmatmul.mubr.msk.bf16.vlgmr.msra.gmra.mrb[96].mxu0 %vm234_vm0, %v3189_v48 }
 0x7c3   : > { %4923 = vmatpush3.bf16.msk.msra.mxu0 %vm7157_vm7, %v4493_v50  ;;  %4903 = vmatmul.mubr.msk.bf16.vlgmr.msra.gmra.mrb[64].mxu1 %vm234_vm0, %v3188_v28 }
 0x7c4   : > { %4915 = vmatpush3.bf16.msk.msra.mxu1 %vm7157_vm7, %v4486_v0  ;;  %4924 = vmatprep.subr.bf16.mxu0 %v8005_v58 }
 0x7c5   : > { %4916 = vmatprep.subr.bf16.mxu1 %v8005_v58  ;;  %4926 = vmatprep.mubr.msk.bf16.mxu0 %vm5373_vm1, %v8005_v58 }
 0x7c6   : > { %4918 = vmatprep.mubr.msk.bf16.mxu1 %vm5373_vm1, %v8005_v58 }
 0x7c7   : > { %4925 = vmatpush3.bf16.msk.msra.mxu0 %vm7168_vm10, %v4493_v50 }
 0x7c8   : > { %4917 = vmatpush3.bf16.msk.msra.mxu1 %vm7168_vm10, %v4486_v0 }
 0x7c9   : > { %v4801_v1 = vpop.f32.mrb[74].mxu0 }
 0x7ca   : > { %5245 = vrcp.f32 %v4801_v1  ;;  %v3035_v41 = vpop.f32.mrb[75].mxu0 }
 0x7cb   : > { %5247 = vrcp.f32 %v3035_v41 }
 0x7d4   : > { %v5246_v62 = vpop.eup %5245 }
 0x7d5   : > { %v5248_v9 = vpop.eup %5247  ;;  %v3075_v22 = vmul.f32 %v5246_v62, %v7329_v8 }
 0x7d6   : > { %v3074_v42 = vmul.f32 %v5248_v9, %v7325_v27 }
 0x7d7   : > { %v3191_v39 = vpack.c.bf16 %v3075_v22, %v3075_v22 }
 0x7d8   : > { %v3190_v35 = vpack.c.bf16 %v3074_v42, %v3074_v42 }
 0x7d9   : > { %4927 = vmatmul.mubr.msk.bf16.vlgmr.msra.gmra.mrb[100].mxu0 %vm234_vm0, %v3191_v39  ;;  %v5021_v39 = vld [vmem:[%s7831_s2] sm:$0xff]  }
 0x7da   : > { %4919 = vmatmul.mubr.msk.bf16.vlgmr.msra.gmra.mrb[68].mxu1 %vm234_vm0, %v3190_v35  ;;  %4930 = vmatprep.subr.bf16.mxu1 %v5021_v39 }
 0x7db   : > { %4931 = vmatpush3.bf16.msra.mxu1 %v5021_v39 }
 0x7e5   : > { %v7505_v58 = vpop.f32.mrb[36].mxu1 }
 0x7e6   : > { %v4808_v32 = vpop.f32.mrb[37].mxu1  ;;  %v3880_v27 = vsel %vm234_vm0, %v7505_v58, 0.0 }
 0x7e7   : > { %v3232_v40 = vpop.f32.mrb[38].mxu1 }
 0x7e8   : > { %v4809_v11 = vpop.f32.mrb[39].mxu1 }
 0x7e9   : > { %v5022_v11 = vld [vmem:[%s7831_s2 + $0x8] sm:$0xff]  }
 0x7ea   : > { %4932 = vmatprep.subr.bf16.mxu1 %v5022_v11 }
 0x7eb   : > { %v7507_v29 = vpop.f32.mrb[76].mxu0  ;;  %4933 = vmatpush3.bf16.msra.mxu1 %v5022_v11 }
 0x7ec   : > { %v4832_v33 = vpop.f32.mrb[77].mxu0  ;;  %v3885_v44 = vsel %vm234_vm0, %v7507_v29, 0.0 }
 0x7ed   : > { %v7509_v12 = vpop.f32.mrb[40].mxu1  ;;  %v3361_v38 = vpop.f32.mrb[78].mxu0 }
 0x7ee   : > { %v3881_v8 = vsel %vm234_vm0, %v7509_v12, 0.0  ;;  %v4816_v20 = vpop.f32.mrb[41].mxu1  ;;  %v4833_v23 = vpop.f32.mrb[79].mxu0 }
 0x7ef   : > { %v3882_v31 = vadd.f32 %v3881_v8, %v3880_v27  ;;  %v3275_v10 = vpop.f32.mrb[42].mxu1 }
 0x7f0   : > { %v4817_v45 = vpop.f32.mrb[43].mxu1 }
 0x7f5   : > { %v7515_v63 = vpop.f32.mrb[44].mxu1 }
 0x7f6   : > { %v3883_v17 = vsel %vm234_vm0, %v7515_v63, 0.0  ;;  %v4824_v59 = vpop.f32.mrb[45].mxu1 }
 0x7f7   : > { %v3884_v30 = vadd.f32 %v3883_v17, %v3882_v31  ;;  %v3318_v61 = vpop.f32.mrb[46].mxu1 }
 0x7f8   : > { %v4825_v2 = vpop.f32.mrb[47].mxu1 }
 0x7f9   : > { %v3886_v26 = vadd.f32 %v3885_v44, %v3884_v30 }
 0x81f   : > { %v7521_v49 = vpop.f32.mrb[80].mxu0 }
 0x820   : > { %v7523_v54 = vpop.f32.mrb[48].mxu1  ;;  %v4848_v55 = vpop.f32.mrb[81].mxu0  ;;  %v3889_v5 = vsel %vm234_vm0, %v7521_v49, 0.0 }
 0x821   : > { %v3887_v6 = vsel %vm234_vm0, %v7523_v54, 0.0  ;;  %v4840_v4 = vpop.f32.mrb[49].mxu1  ;;  %v3447_v25 = vpop.f32.mrb[82].mxu0 }
 0x822   : > { %v3888_v51 = vadd.f32 %v3887_v6, %v3886_v26  ;;  %v3404_v18 = vpop.f32.mrb[50].mxu1  ;;  %v4849_v43 = vpop.f32.mrb[83].mxu0 }
 0x823   : > { %v4841_v24 = vpop.f32.mrb[51].mxu1 }
 0x824   : > { %v3890_v37 = vadd.f32 %v3889_v5, %v3888_v51 }
 0x833   : > { %v7529_v56 = vpop.f32.mrb[84].mxu0 }
 0x834   : > { %v7531_v7 = vpop.f32.mrb[52].mxu1  ;;  %v4864_v53 = vpop.f32.mrb[85].mxu0  ;;  %v3893_v36 = vsel %vm234_vm0, %v7529_v56, 0.0 }
 0x835   : > { %v3891_v13 = vsel %vm234_vm0, %v7531_v7, 0.0  ;;  %v4856_v15 = vpop.f32.mrb[53].mxu1  ;;  %v3533_v57 = vpop.f32.mrb[86].mxu0 }
 0x836   : > { %v3892_v19 = vadd.f32 %v3891_v13, %v3890_v37  ;;  %v3490_v14 = vpop.f32.mrb[54].mxu1  ;;  %v4865_v3 = vpop.f32.mrb[87].mxu0 }
 0x837   : > { %v4857_v47 = vpop.f32.mrb[55].mxu1 }
 0x838   : > { %v3894_v60 = vadd.f32 %v3893_v36, %v3892_v19 }
 0x847   : > { %v7537_v21 = vpop.f32.mrb[88].mxu0 }
 0x848   : > { %v3573_v34 = vpop.f32.mrb[56].mxu1  ;;  %v4880_v16 = vpop.f32.mrb[89].mxu0  ;;  %v3897_v1 = vsel %vm234_vm0, %v7537_v21, 0.0 }
 0x849   : > { %v3895_v48 = vsel %vm234_vm0, %v3573_v34, 0.0  ;;  %v4872_v52 = vpop.f32.mrb[57].mxu1  ;;  %v3619_v50 = vpop.f32.mrb[90].mxu0 }
 0x84a   : > { %v3896_v28 = vadd.f32 %v3895_v48, %v3894_v60  ;;  %v3576_v46 = vpop.f32.mrb[58].mxu1  ;;  %v4881_v0 = vpop.f32.mrb[91].mxu0 }
 0x84b   : > { %v4873_v41 = vpop.f32.mrb[59].mxu1 }
 0x84c   : > { %v3898_v62 = vadd.f32 %v3897_v1, %v3896_v28 }
 0x86d   : > { %v3702_v9 = vpop.f32.mrb[92].mxu0 }
 0x86e   : > { %v3659_v22 = vpop.f32.mrb[60].mxu1  ;;  %v4896_v42 = vpop.f32.mrb[93].mxu0  ;;  %v3901_v8 = vsel %vm234_vm0, %v3702_v9, 0.0 }
 0x86f   : > { %v3899_v35 = vsel %vm234_vm0, %v3659_v22, 0.0  ;;  %v4888_v32 = vpop.f32.mrb[61].mxu1  ;;  %v3705_v40 = vpop.f32.mrb[94].mxu0 }
 0x870   : > { %v3900_v33 = vadd.f32 %v3899_v35, %v3898_v62  ;;  %v3662_v38 = vpop.f32.mrb[62].mxu1  ;;  %v4897_v27 = vpop.f32.mrb[95].mxu0 }
 0x871   : > { %v4889_v20 = vpop.f32.mrb[63].mxu1 }
 0x872   : > { %v3902_v23 = vadd.f32 %v3901_v8, %v3900_v33 }
 0x895   : > { %v3788_v31 = vpop.f32.mrb[96].mxu0 }
 0x896   : > { %v3745_v10 = vpop.f32.mrb[64].mxu1  ;;  %v4912_v45 = vpop.f32.mrb[97].mxu0  ;;  %v3905_v26 = vsel %vm234_vm0, %v3788_v31, 0.0 }
 0x897   : > { %v3903_v17 = vsel %vm234_vm0, %v3745_v10, 0.0  ;;  %v4904_v59 = vpop.f32.mrb[65].mxu1  ;;  %v3791_v30 = vpop.f32.mrb[98].mxu0 }
 0x898   : > { %v3904_v61 = vadd.f32 %v3903_v17, %v3902_v23  ;;  %v3748_v44 = vpop.f32.mrb[66].mxu1  ;;  %v4913_v2 = vpop.f32.mrb[99].mxu0 }
 0x899   : > { %v4905_v55 = vpop.f32.mrb[67].mxu1 }
 0x89a   : > { %v3906_v6 = vadd.f32 %v3905_v26, %v3904_v61 }
 0x8ac   : > { %v3874_v4 = vpop.f32.mrb[100].mxu0 }
 0x8ad   : > { %v3831_v25 = vpop.f32.mrb[68].mxu1  ;;  %v4928_v51 = vpop.f32.mrb[101].mxu0  ;;  %v3909_v13 = vsel %vm234_vm0, %v3874_v4, 0.0 }
 0x8ae   : > { %v3907_v18 = vsel %vm234_vm0, %v3831_v25, 0.0  ;;  %v4920_v43 = vpop.f32.mrb[69].mxu1  ;;  %v3877_v5 = vpop.f32.mrb[102].mxu0 }
 0x8af   : > { %v3908_v24 = vadd.f32 %v3907_v18, %v3906_v6  ;;  %v3834_v37 = vpop.f32.mrb[70].mxu1  ;;  %v4929_v53 = vpop.f32.mrb[103].mxu0 }
 0x8b0   : > { %v4921_v15 = vpop.f32.mrb[71].mxu1 }
 0x8b1   : > { %v3910_v57 = vadd.f32 %v3909_v13, %v3908_v24 }
 0x8b3   : > { %v3911_v19 = vmul.f32 0.0625, %v3910_v57 }
 0x8b5   : > { %v7555_v14 = vsub.f32 %v7505_v58, %v3911_v19  ;;  %v7558_v3 = vsub.f32 %v7509_v12, %v3911_v19  ;;  %v7561_v36 = vsub.f32 %v7515_v63, %v3911_v19  ;;  %v7564_v47 = vsub.f32 %v7507_v29, %v3911_v19 }
 0x8b6   : > { %v7567_v60 = vsub.f32 %v7523_v54, %v3911_v19  ;;  %v7570_v16 = vsub.f32 %v7521_v49, %v3911_v19  ;;  %v7573_v48 = vsub.f32 %v7531_v7, %v3911_v19  ;;  %v7576_v58 = vsub.f32 %v7529_v56, %v3911_v19 }
 0x8b7   : > { %v7578_v12 = vsub.f32 %v3573_v34, %v3911_v19  ;;  %v7581_v63 = vsub.f32 %v7537_v21, %v3911_v19  ;;  %v7583_v52 = vsub.f32 %v3659_v22, %v3911_v19  ;;  %v7585_v29 = vsub.f32 %v3702_v9, %v3911_v19 }
 0x8b8   : > { %v7587_v54 = vsub.f32 %v3745_v10, %v3911_v19  ;;  %v7589_v50 = vsub.f32 %v3788_v31, %v3911_v19  ;;  %v3926_v49 = vsub.f32 %v3831_v25, %v3911_v19  ;;  %v7591_v28 = vsub.f32 %v3874_v4, %v3911_v19 }
 0x8b9   : > { %v3928_v56 = vmul.f32 %v7555_v14, %v7555_v14  ;;  %v3929_v7 = vmul.f32 %v7558_v3, %v7558_v3  ;;  %v3930_v21 = vmul.f32 %v7561_v36, %v7561_v36  ;;  %v3931_v34 = vmul.f32 %v7564_v47, %v7564_v47 }
 0x8ba   : > { %v3932_v41 = vmul.f32 %v7567_v60, %v7567_v60  ;;  %v3933_v22 = vmul.f32 %v7570_v16, %v7570_v16  ;;  %v3934_v35 = vmul.f32 %v7573_v48, %v7573_v48  ;;  %v3935_v11 = vmul.f32 %v7576_v58, %v7576_v58 }
 0x8bb   : > { %v3944_v46 = vsel %vm234_vm0, %v3928_v56, 0.0  ;;  %v3945_v0 = vsel %vm234_vm0, %v3929_v7, 0.0  ;;  %v3947_v62 = vsel %vm234_vm0, %v3930_v21, 0.0  ;;  %v3949_v42 = vsel %vm234_vm0, %v3931_v34, 0.0 }
 0x8bc   : > { %v3946_v1 = vadd.f32 %v3945_v0, %v3944_v46  ;;  %v3951_v32 = vsel %vm234_vm0, %v3932_v41, 0.0  ;;  %v3953_v33 = vsel %vm234_vm0, %v3933_v22, 0.0  ;;  %v3936_v27 = vmul.f32 %v7578_v12, %v7578_v12  ;;  %v8124_v22 = vld [vmem:[#allocation10_spill] sm:$0xff] }
 0x8bd   : > { %v3955_v8 = vsel %vm234_vm0, %v3934_v35, 0.0  ;;  %v3937_v23 = vmul.f32 %v7581_v63, %v7581_v63  ;;  %v3957_v31 = vsel %vm234_vm0, %v3935_v11, 0.0  ;;  %v3938_v45 = vmul.f32 %v7583_v52, %v7583_v52  ;;  %v8125_v35 = vld [vmem:[#allocation11_spill] sm:$0xff] }
 0x8be   : > { %v3948_v9 = vadd.f32 %v3947_v62, %v3946_v1  ;;  %v3959_v17 = vsel %vm234_vm0, %v3936_v27, 0.0  ;;  %v3939_v30 = vmul.f32 %v7585_v29, %v7585_v29  ;;  %v3940_v2 = vmul.f32 %v7587_v54, %v7587_v54 }
 0x8bf   : > { %v3961_v61 = vsel %vm234_vm0, %v3937_v23, 0.0  ;;  %v3963_v26 = vsel %vm234_vm0, %v3938_v45, 0.0  ;;  %v3941_v6 = vmul.f32 %v7589_v50, %v7589_v50  ;;  %v3942_v51 = vmul.f32 %v3926_v49, %v3926_v49 }
 0x8c0   : > { %v3950_v39 = vadd.f32 %v3949_v42, %v3948_v9  ;;  %v3965_v4 = vsel %vm234_vm0, %v3939_v30, 0.0  ;;  %v3967_v18 = vsel %vm234_vm0, %v3940_v2, 0.0  ;;  %v3943_v5 = vmul.f32 %v7591_v28, %v7591_v28 }
 0x8c1   : > { %v3969_v24 = vsel %vm234_vm0, %v3941_v6, 0.0  ;;  %v3971_v53 = vsel %vm234_vm0, %v3942_v51, 0.0 }
 0x8c2   : > { %v3952_v40 = vadd.f32 %v3951_v32, %v3950_v39  ;;  %v3973_v15 = vsel %vm234_vm0, %v3943_v5, 0.0 }
 0x8c4   : > { %v3954_v38 = vadd.f32 %v3953_v33, %v3952_v40 }
 0x8c6   : > { %v3956_v20 = vadd.f32 %v3955_v8, %v3954_v38 }
 0x8c8   : > { %v3958_v10 = vadd.f32 %v3957_v31, %v3956_v20 }
 0x8ca   : > { %v3960_v59 = vadd.f32 %v3959_v17, %v3958_v10 }
 0x8cc   : > { %v3962_v44 = vadd.f32 %v3961_v61, %v3960_v59 }
 0x8ce   : > { %v3964_v55 = vadd.f32 %v3963_v26, %v3962_v44 }
 0x8d0   : > { %v3966_v25 = vadd.f32 %v3965_v4, %v3964_v55 }
 0x8d2   : > { %v3968_v43 = vadd.f32 %v3967_v18, %v3966_v25 }
 0x8d4   : > { %v3970_v37 = vadd.f32 %v3969_v24, %v3968_v43 }
 0x8d6   : > { %v3972_v13 = vadd.f32 %v3971_v53, %v3970_v37 }
 0x8d8   : > { %v3974_v57 = vadd.f32 %v3973_v15, %v3972_v13  ;;  %v8126_v15 = vld [vmem:[#allocation12_spill] sm:$0xff] }
 0x8da   : > { %v3975_v19 = vmul.f32 0.0625, %v3974_v57 }
 0x8dc   : > { %v3976_v56 = vadd.f32 1e-05, %v3975_v19 }
 0x8de   : > { %5249 = vrsqrt.f32 %v3976_v56 }
 0x8e8   : > { %v5250_v7 = vpop.eup %5249 }
 0x8e9   : > { %v3992_v21 = vmul.f32 %v5250_v7, %v3926_v49  ;;  %v3978_v34 = vmul.f32 %v5250_v7, %v7555_v14  ;;  %v3979_v46 = vmul.f32 %v5250_v7, %v7558_v3  ;;  %v3980_v0 = vmul.f32 %v5250_v7, %v7561_v36 }
 0x8ea   : > { %v3981_v1 = vmul.f32 %v5250_v7, %v7564_v47  ;;  %v3982_v41 = vmul.f32 %v5250_v7, %v7567_v60  ;;  %v3983_v62 = vmul.f32 %v5250_v7, %v7570_v16  ;;  %v3984_v9 = vmul.f32 %v5250_v7, %v7573_v48 }
 0x8eb   : > { %v4012_v42 = vmul.f32 %v8124_v22, %v3992_v21  ;;  %v3998_v39 = vmul.f32 %v8124_v22, %v3978_v34  ;;  %v3999_v49 = vmul.f32 %v8124_v22, %v3979_v46  ;;  %v4000_v14 = vmul.f32 %v8124_v22, %v3980_v0  ;;  %v8127_v21 = vld [vmem:[#allocation13_spill] sm:$0xff] }
 0x8ec   : > { %v4001_v3 = vmul.f32 %v8124_v22, %v3981_v1  ;;  %v4002_v36 = vmul.f32 %v8124_v22, %v3982_v41  ;;  %v4003_v47 = vmul.f32 %v8124_v22, %v3983_v62  ;;  %v3985_v60 = vmul.f32 %v5250_v7, %v7576_v58  ;;  %v5251_v62 = vld [vmem:[%s5513_s22 + $0x10] sm:$0xff] }
 0x8ed   : > { %v4032_v16 = vadd.f32 %v8125_v35, %v4012_v42  ;;  %v4018_v48 = vadd.f32 %v8125_v35, %v3998_v39  ;;  %v4019_v32 = vadd.f32 %v8125_v35, %v3999_v49  ;;  %v4020_v40 = vadd.f32 %v8125_v35, %v4000_v14  ;;  %v5252_v42 = vld [vmem:[%s5513_s22] sm:$0xff]  ;;  %v5253_v14 = vld [vmem:[%s5513_s22 + $0x18] sm:$0xff] }
 0x8ee   : > { %v4021_v11 = vadd.f32 %v8125_v35, %v4001_v3  ;;  %v4022_v33 = vadd.f32 %v8125_v35, %v4002_v36  ;;  %v4023_v38 = vadd.f32 %v8125_v35, %v4003_v47  ;;  %v4004_v27 = vmul.f32 %v8124_v22, %v3984_v9  ;;  %v5254_v36 = vld [vmem:[%s5513_s22 + $0x8] sm:$0xff] }
 0x8ef   : > { %v4034_v8 = vpack.c.bf16 %v4019_v32, %v4018_v48  ;;  %v4005_v20 = vmul.f32 %v8124_v22, %v3985_v60  ;;  %v3986_v58 = vmul.f32 %v5250_v7, %v7578_v12  ;;  %v3987_v23 = vmul.f32 %v5250_v7, %v7581_v63 }
 0x8f0   : > { %v4035_v31 = vpack.c.bf16 %v4021_v11, %v4020_v40  ;;  %v4036_v10 = vpack.c.bf16 %v4023_v38, %v4022_v33  ;;  %v4024_v45 = vadd.f32 %v8125_v35, %v4004_v27  ;;  %v3988_v17 = vmul.f32 %v5250_v7, %v7583_v52 }
 0x8f1   : > { %4934 = vmatprep.mubr.msk.bf16.mxu1 %vm234_vm0, %v4034_v8  ;;  %v4025_v59 = vadd.f32 %v8125_v35, %v4005_v20  ;;  %v4006_v30 = vmul.f32 %v8124_v22, %v3986_v58  ;;  %v4007_v61 = vmul.f32 %v8124_v22, %v3987_v23  ;;  %v3989_v44 = vmul.f32 %v5250_v7, %v7585_v29  ;;  %v5255_v8 = vld [vmem:[%s5513_s22 + $0x30] sm:$0xff]  ;;  %v5256_v23 = vld [vmem:[%s5513_s22 + $0x20] sm:$0xff] }
 0x8f2   : > { %4935 = vmatmul.mubr.msk.bf16.vlgmr.msra.gmra.mrb[72].mxu1 %vm234_vm0, %v4035_v31  ;;  %v4008_v12 = vmul.f32 %v8124_v22, %v3988_v17  ;;  %v3990_v63 = vmul.f32 %v5250_v7, %v7587_v54  ;;  %v3991_v2 = vmul.f32 %v5250_v7, %v7589_v50  ;;  %v3993_v52 = vmul.f32 %v5250_v7, %v7591_v28 }
 0x8f3   : > { %4938 = vmatprep.mubr.msk.bf16.mxu1 %vm234_vm0, %v4036_v10  ;;  %v4037_v26 = vpack.c.bf16 %v4025_v59, %v4024_v45  ;;  %v4026_v55 = vadd.f32 %v8125_v35, %v4006_v30  ;;  %v4027_v6 = vadd.f32 %v8125_v35, %v4007_v61  ;;  %v4009_v4 = vmul.f32 %v8124_v22, %v3989_v44  ;;  %v5257_v45 = vld [vmem:[%s5513_s22 + $0x38] sm:$0xff]  ;;  %v5258_v59 = vld [vmem:[%s5513_s22 + $0x28] sm:$0xff] }
 0x8f4   : > { %v4028_v29 = vadd.f32 %v8125_v35, %v4008_v12  ;;  %v4010_v25 = vmul.f32 %v8124_v22, %v3990_v63  ;;  %v4011_v51 = vmul.f32 %v8124_v22, %v3991_v2  ;;  %v4013_v54 = vmul.f32 %v8124_v22, %v3993_v52 }
 0x8f5   : > { %v4038_v50 = vpack.c.bf16 %v4027_v6, %v4026_v55  ;;  %v4029_v28 = vadd.f32 %v8125_v35, %v4009_v4 }
 0x8f6   : > { %v4030_v18 = vadd.f32 %v8125_v35, %v4010_v25  ;;  %v4031_v43 = vadd.f32 %v8125_v35, %v4011_v51  ;;  %v4033_v5 = vadd.f32 %v8125_v35, %v4013_v54  ;;  %v5260_v54 = vld [vmem:[%s5513_s22 + $0x40] sm:$0xff] }
 0x8f7   : > { %v4039_v24 = vpack.c.bf16 %v4029_v28, %v4028_v29  ;;  %v5259_v29 = vld [vmem:[%s5513_s22 + $0x50] sm:$0xff] }
 0x8f8   : > { %v4040_v37 = vpack.c.bf16 %v4031_v43, %v4030_v18  ;;  %v4041_v53 = vpack.c.bf16 %v4033_v5, %v4032_v16  ;;  %v5261_v18 = vld [vmem:[%s5513_s22 + $0x58] sm:$0xff]  ;;  %v5262_v5 = vld [vmem:[%s5513_s22 + $0x48] sm:$0xff] }
 0x8fa   : > { %4939 = vmatmul.mubr.msk.bf16.gmra.mrb[76].mxu1 %vm234_vm0, %v4037_v26 }
 0x8fb   : > { %4942 = vmatprep.mubr.msk.bf16.mxu1 %vm234_vm0, %v4038_v50 }
 0x902   : > { %4943 = vmatmul.mubr.msk.bf16.gmra.mrb[80].mxu1 %vm234_vm0, %v4039_v24 }
 0x903   : > { %4946 = vmatprep.mubr.msk.bf16.mxu1 %vm234_vm0, %v4040_v37 }
 0x90a   : > { %4947 = vmatmul.mubr.msk.bf16.gmra.mrb[84].mxu1 %vm234_vm0, %v4041_v53 }
 0x9c5   : > { %v4936_v13 = vpop.f32.mrb[72].mxu1 }
 0x9c6   : > { %v4129_v57 = vadd.f32 %v4936_v13, %v8126_v15  ;;  %v4120_v19 = vpop.f32.mrb[73].mxu1 }
 0x9c7   : > { %v4121_v56 = vadd.f32 %v4120_v19, %v8126_v15  ;;  %v4937_v7 = vpop.f32.mrb[74].mxu1 }
 0x9c8   : > { %v4189_v34 = vmul.f32 %v8127_v21, %v4129_v57  ;;  %v4132_v46 = vadd.f32 %v4937_v7, %v8126_v15  ;;  %v4123_v0 = vpop.f32.mrb[75].mxu1 }
 0x9c9   : > { %v4187_v1 = vmul.f32 %v8127_v21, %v4121_v56  ;;  %v4124_v41 = vadd.f32 %v4123_v0, %v8126_v15 }
 0x9ca   : > { %v4205_v9 = vadd.f32 %v5251_v62, %v4189_v34  ;;  %v4190_v22 = vmul.f32 %v8127_v21, %v4132_v46 }
 0x9cb   : > { %v4203_v39 = vadd.f32 %v5252_v42, %v4187_v1  ;;  %v4188_v49 = vmul.f32 %v8127_v21, %v4124_v41  ;;  %v5263_v1 = vld [vmem:[%s5513_s22 + $0x70] sm:$0xff] }
 0x9cc   : > { %4221 = vst.msk [vmem:[%s7706_s11 + $0x10] sm:$0xff] %vm234_vm0, %v4205_v9  ;;  %v4206_v3 = vadd.f32 %v5253_v14, %v4190_v22  ;;  %v5264_v9 = vld [vmem:[%s5513_s22 + $0x60] sm:$0xff] }
 0x9cd   : > { %4219 = vst.msk [vmem:[%s7706_s11] sm:$0xff] %vm234_vm0, %v4203_v39  ;;  %v4204_v47 = vadd.f32 %v5254_v36, %v4188_v49  ;;  %v4940_v60 = vpop.f32.mrb[76].mxu1  ;;  %v5265_v39 = vld [vmem:[%s5513_s22 + $0x78] sm:$0xff] }
 0x9ce   : > { %4222 = vst.msk [vmem:[%s7706_s11 + $0x18] sm:$0xff] %vm234_vm0, %v4206_v3  ;;  %v4145_v35 = vadd.f32 %v4940_v60, %v8126_v15  ;;  %v4136_v16 = vpop.f32.mrb[77].mxu1 }
 0x9cf   : > { %4220 = vst.msk [vmem:[%s7706_s11 + $0x8] sm:$0xff] %vm234_vm0, %v4204_v47  ;;  %v4137_v48 = vadd.f32 %v4136_v16, %v8126_v15  ;;  %v4941_v32 = vpop.f32.mrb[78].mxu1 }
 0x9d0   : > { %v4193_v40 = vmul.f32 %v8127_v21, %v4145_v35  ;;  %v4148_v11 = vadd.f32 %v4941_v32, %v8126_v15  ;;  %v4139_v33 = vpop.f32.mrb[79].mxu1 }
 0x9d1   : > { %v4191_v38 = vmul.f32 %v8127_v21, %v4137_v48  ;;  %v4140_v27 = vadd.f32 %v4139_v33, %v8126_v15 }
 0x9d2   : > { %v4209_v20 = vadd.f32 %v5255_v8, %v4193_v40  ;;  %v4194_v58 = vmul.f32 %v8127_v21, %v4148_v11 }
 0x9d3   : > { %v4207_v31 = vadd.f32 %v5256_v23, %v4191_v38  ;;  %v4192_v10 = vmul.f32 %v8127_v21, %v4140_v27 }
 0x9d4   : > { %4225 = vst.msk [vmem:[%s7706_s11 + $0x30] sm:$0xff] %vm234_vm0, %v4209_v20  ;;  %v4210_v17 = vadd.f32 %v5257_v45, %v4194_v58 }
 0x9d5   : > { %4223 = vst.msk [vmem:[%s7706_s11 + $0x20] sm:$0xff] %vm234_vm0, %v4207_v31  ;;  %v4208_v30 = vadd.f32 %v5258_v59, %v4192_v10  ;;  %v4944_v61 = vpop.f32.mrb[80].mxu1 }
 0x9d6   : > { %4226 = vst.msk [vmem:[%s7706_s11 + $0x38] sm:$0xff] %vm234_vm0, %v4210_v17  ;;  %v4161_v44 = vadd.f32 %v4944_v61, %v8126_v15  ;;  %v4152_v12 = vpop.f32.mrb[81].mxu1 }
 0x9d7   : > { %4224 = vst.msk [vmem:[%s7706_s11 + $0x28] sm:$0xff] %vm234_vm0, %v4208_v30  ;;  %v4153_v63 = vadd.f32 %v4152_v12, %v8126_v15  ;;  %v4945_v2 = vpop.f32.mrb[82].mxu1 }
 0x9d8   : > { %v4197_v52 = vmul.f32 %v8127_v21, %v4161_v44  ;;  %v4164_v26 = vadd.f32 %v4945_v2, %v8126_v15  ;;  %v4155_v55 = vpop.f32.mrb[83].mxu1 }
 0x9d9   : > { %v4195_v6 = vmul.f32 %v8127_v21, %v4153_v63  ;;  %v4156_v4 = vadd.f32 %v4155_v55, %v8126_v15 }
 0x9da   : > { %v4213_v25 = vadd.f32 %v5259_v29, %v4197_v52  ;;  %v4198_v51 = vmul.f32 %v8127_v21, %v4164_v26 }
 0x9db   : > { %v4211_v50 = vadd.f32 %v5260_v54, %v4195_v6  ;;  %v4196_v28 = vmul.f32 %v8127_v21, %v4156_v4 }
 0x9dc   : > { %4229 = vst.msk [vmem:[%s7706_s11 + $0x50] sm:$0xff] %vm234_vm0, %v4213_v25  ;;  %v4214_v43 = vadd.f32 %v5261_v18, %v4198_v51 }
 0x9dd   : > { %4227 = vst.msk [vmem:[%s7706_s11 + $0x40] sm:$0xff] %vm234_vm0, %v4211_v50  ;;  %v4212_v24 = vadd.f32 %v5262_v5, %v4196_v28  ;;  %v4948_v37 = vpop.f32.mrb[84].mxu1 }
 0x9de   : > { %4230 = vst.msk [vmem:[%s7706_s11 + $0x58] sm:$0xff] %vm234_vm0, %v4214_v43  ;;  %v4177_v53 = vadd.f32 %v4948_v37, %v8126_v15  ;;  %v4168_v13 = vpop.f32.mrb[85].mxu1 }
 0x9df   : > { %4228 = vst.msk [vmem:[%s7706_s11 + $0x48] sm:$0xff] %vm234_vm0, %v4212_v24  ;;  %v4169_v57 = vadd.f32 %v4168_v13, %v8126_v15  ;;  %v4949_v19 = vpop.f32.mrb[86].mxu1 }
 0x9e0   : > { %v4201_v56 = vmul.f32 %v8127_v21, %v4177_v53  ;;  %v4180_v7 = vadd.f32 %v4949_v19, %v8126_v15  ;;  %v4171_v34 = vpop.f32.mrb[87].mxu1 }
 0x9e1   : > { %v4199_v46 = vmul.f32 %v8127_v21, %v4169_v57  ;;  %v4172_v0 = vadd.f32 %v4171_v34, %v8126_v15  ;;  %v5266_v15 = vld [vmem:[%s5513_s22 + $0x68] sm:$0xff] }
 0x9e2   : > { %v4217_v41 = vadd.f32 %v5263_v1, %v4201_v56  ;;  %v4202_v62 = vmul.f32 %v8127_v21, %v4180_v7 }
 0x9e3   : > { %v4215_v22 = vadd.f32 %v5264_v9, %v4199_v46  ;;  %v4200_v42 = vmul.f32 %v8127_v21, %v4172_v0 }
 0x9e4   : > { %4233 = vst.msk [vmem:[%s7706_s11 + $0x70] sm:$0xff] %vm234_vm0, %v4217_v41  ;;  %v4218_v49 = vadd.f32 %v5265_v39, %v4202_v62 }
 0x9e5   : > { %4231 = vst.msk [vmem:[%s7706_s11 + $0x60] sm:$0xff] %vm234_vm0, %v4215_v22  ;;  %v4216_v14 = vadd.f32 %v5266_v15, %v4200_v42 }
 0x9e6   : > { %4234 = vst.msk [vmem:[%s7706_s11 + $0x78] sm:$0xff] %vm234_vm0, %v4218_v49 }
 0x9e7   : > { %4232 = vst.msk [vmem:[%s7706_s11 + $0x68] sm:$0xff] %vm234_vm0, %v4216_v14 }
 0x9e8   : > { %5310 = shalt.err (!%p5307_p2)
}
 0x9e9   : > { %s5311_s22 = scalar_lea.hbm %s7776_s19, 2048  ;;  %s5315_s8 = scalar_lea.hbm %s7833_s4, 4096 }
 0x9ea   : > { %p5312_p4 = scmp.ne.s32.totalorder %s7776_s19, %s5311_s22  ;;  %p5316_p9 = scmp.lt.u32.totalorder %s7776_s19, %s7833_s4 }
 0x9eb   : > { %p5317_p1 = scmp.lt.u32.totalorder %s5315_s8, %s5311_s22  ;;  %p5319_p6 = scmp.lt.u32.totalorder %s5311_s22, %s7776_s19 }
 0x9ec   : > { %p5313_p5 = pnand %p5312_p4, %p8128_p11 }
 0x9ed   : > { %p5318_p3 = por %p5317_p1, %p5316_p9 }
 0x9ee   : > { %p5314_p7 = pneg %p5313_p5 }
 0x9ef   : > { %p5320_p12 = por %p5319_p6, %p5318_p3 }
 0x9f1   : > { %p5321_p13 = pnand %p5320_p12, %p5314_p7 }
 0x9f3   : > { %5324 = shalt.err (!%p5321_p13)
}
 0x9f4   : > { %s5376_s11 = smov 128   ;;  %s5377_s14 = smov 8  }
 0x9f5   : > { %4960 = dma.vmem_to_hbm [thread:$0]  (%p8128_p11), %s7778_s12, 2048, %s7776_s19, %s4236_s29, %s5376_s11, %s5376_s11, %s5377_s14  }
 0x9f6 PF: > { %s4264_s23 = sand.u32 1, %s5351_s15   ;;  %p8129_p8 = scmp.ne.s32.totalorder %s7926_s28, 0 }
 0x9f7   : > { %p8130_p10 = scmp.ge.s32.totalorder %s5363_s18, 2  ;;  %s4265_s25 = scalar_lea.sflag [#allocation4], %s4264_s23 }
 0x9f9   : > { %p4967_p0 = pnand %p8130_p10, %p8129_p8 }
 0x9fb   : > { %5346 = dma.done.wait (!%p4967_p0), %s4265_s25, 2048  }
 0x9fc   : > { %5348 = vsyncadd (!%p4967_p0), %s4265_s25, 4294965248  ;;  %p17_p2 = scmp.ge.s32.totalorder %s5428_s21, 4   ;;  %s8131_s15 = smov %s5355_s16 }
 0x9fd   : > { %s8132_s16 = smov %s5359_s17  ;;  %s8133_s17 = smov %s5440_s24 }
 0x9fe   : > { %s8134_s18 = smov %s5428_s21  ;;  %19 = sbr.rel (!%p17_p2) target bundleno = 5 (0x5), region = 81 }
 0xa05   :  { %4270 = vsyncpa [#allocation3], 1 }
 0xa06   :  { %4272 = vsyncpa [#allocation3 + $0x1], 1 }
 0xa07   :  { %4273 = vsyncpa [#allocation4], 1 }
 0xa08   :  { %4275 = vsyncpa [#allocation4 + $0x1], 1 }

</bundles_post_ra>
